<compile_context>
chip_gen: v5e
topology: v5e:2x2
jax: 0.10.0
libtpu: 0.0.40
codegen_flags: <defaults>
</compile_context>

<pallas_src>
import jax
import jax.numpy as jnp
from jax.experimental import pallas as pl
from jax.experimental.pallas import tpu as pltpu

_LANE = 128
_SUBLANE = 8
_MASK_BIAS = -1e30   # plain Python float: used only in the wrapper, never captured


# ---------------------------------------------------------------------------
# Kernel
# ---------------------------------------------------------------------------
def match_attn_kernel(x_ref, y_ref, ypt_ref, bias_ref,
                      wx_ref, bx_ref, w_ref,
                      out_ref, alpha_ref):
    # x_proj = relu(x @ Wx + bx)   (bf16 operands, f32 accumulation on the MXU)
    x_proj = jnp.maximum(
        jnp.dot(x_ref[0], wx_ref[...], preferred_element_type=jnp.float32)
        + bx_ref[...], 0.0)

    # x_w = x_proj @ W
    x_w = jnp.dot(x_proj.astype(jnp.bfloat16), w_ref[...],
                  preferred_element_type=jnp.float32)

    # scores = x_w @ y_proj^T — y_proj is passed in already transposed (H, L2),
    # so this is a plain NN MXU matmul (no in-kernel XLU transpose).
    scores = jnp.dot(x_w.astype(jnp.bfloat16), ypt_ref[0],
                     preferred_element_type=jnp.float32)

    # masked_fill(y_mask, -inf): additive bias (0 real / -1e30 pad) from the
    # wrapper — no int8 unpack / compare / select per L1 tile.
    scores = scores + bias_ref[0]

    # Softmax over L2: exp on the bf16 EUP path (v6e/v7x), f32 sum/normalize,
    # EUP approximate reciprocal for the divide.
    m = jnp.max(scores, axis=-1, keepdims=True)
    p = jnp.exp((scores - m).astype(jnp.bfloat16)).astype(jnp.float32)
    s = jnp.sum(p, axis=-1, keepdims=True)
    alpha = p * pl.reciprocal(s, approx=True)

    # matched = alpha @ y   (bf16 operands, f32 accumulation)
    matched = jnp.dot(alpha.astype(jnp.bfloat16), y_ref[0],
                      preferred_element_type=jnp.float32)

    out_ref[0] = matched.astype(out_ref.dtype)
    alpha_ref[0] = alpha.astype(alpha_ref.dtype)


# ---------------------------------------------------------------------------
# Tiling helpers (generation-aware VMEM budget)
# ---------------------------------------------------------------------------
def _round_up(n, m):
    return ((n + m - 1) // m) * m


def _pad_to(a, shape):
    pads = [(0, t - s) for s, t in zip(a.shape, shape)]
    if any(p[1] for p in pads):
        a = jnp.pad(a, pads)
    return a


def _vmem_budget_bytes():
    kind = ""
    try:
        kind = jax.devices()[0].device_kind.lower()
    except Exception:
        pass
    if "v7" in kind or "7x" in kind:
        return 48 * 1024 * 1024        # v7x: 64 MiB/TC physical, keep headroom
    if "v5" in kind or "v6" in kind:
        return 100 * 1024 * 1024       # v5e/v6e: 128 MiB physical
    return 64 * 1024 * 1024            # conservative default


def _estimate_vmem_bytes(tl1, l2, d1, d2, h):
    """Working set, counting the 2x double-buffering BlockSpec applies to every
    input/output block (including the per-batch / constant-index ones)."""
    bf, f4 = 2, 4
    b = 0
    b += 2 * tl1 * d1 * bf                    # x tile
    b += 2 * l2 * d2 * bf                     # y tile (per-batch, still 2x buffered)
    b += 2 * h * l2 * bf                      # y_proj^T tile (per-batch)
    b += 2 * l2 * f4                          # mask-bias tile
    b += 2 * (d1 * h + h * h + h) * bf        # Wx, W, bx (constant, still 2x buffered)
    b += 2 * tl1 * d2 * f4                    # matched output tile
    b += 2 * tl1 * l2 * f4                    # alpha output tile
    b += 4 * tl1 * l2 * f4                    # scores / exp / alpha temporaries
    b += 3 * tl1 * h * f4                     # x_proj / x_w temporaries
    return b


def _pick_tl1(l2, d1, d2, h, budget):
    # Big tiles amortize the ~0.35 us per-grid-step overhead and shrink the
    # number of output writebacks; shrink only when the estimate exceeds the
    # per-generation budget (v7x hits the ceiling first).
    for tl1 in (512, 384, 256, 128, 64, 32, 16, 8):
        if _estimate_vmem_bytes(tl1, l2, d1, d2, h) <= budget:
            return tl1
    return 8


# ---------------------------------------------------------------------------
# Wrapper
# ---------------------------------------------------------------------------
def match_attn(x, y, y_mask, wx, bx, wy, by, w):
    """x: (B,L1,D1), y: (B,L2,D2), y_mask: (B,L2) with 1 = pad.
    wx: (D1,H), bx: (H,), wy: (D2,H), by: (H,), w: (H,H) (already (in,out))."""
    B, L1, D1 = x.shape
    _, L2, D2 = y.shape
    H = wx.shape[1]

    D1p, D2p, Hp = (_round_up(d, _LANE) for d in (D1, D2, H))
    L2p = _round_up(L2, _LANE)
    budget = _vmem_budget_bytes()
    tl1 = min(_pick_tl1(L2p, D1p, D2p, Hp, budget), _round_up(L1, _SUBLANE))
    L1p = _round_up(L1, tl1)
    n_l1 = L1p // tl1

    # y_proj = relu(y @ Wy + by), hoisted out of the kernel (computed once per
    # batch element by XLA, bf16 operands / f32 accumulation) and transposed so
    # the in-kernel scores matmul needs no XLU transpose.
    y_proj = jax.nn.relu(
        jnp.einsum("bld,dh->blh",
                   y.astype(jnp.bfloat16), wy.astype(jnp.bfloat16),
                   preferred_element_type=jnp.float32) + by)
    ypt = _pad_to(jnp.swapaxes(y_proj, 1, 2), (B, Hp, L2p)).astype(jnp.bfloat16)

    # Additive softmax mask bias: 0 for real tokens, -1e30 for padding (both the
    # module's y_mask and the lane padding beyond L2).
    bias = jnp.where(y_mask > 0.5, _MASK_BIAS, 0.0).astype(jnp.float32)
    bias = jnp.pad(bias.reshape(B, 1, L2), ((0, 0), (0, 0), (0, L2p - L2)),
                   constant_values=_MASK_BIAS)

    xp = _pad_to(x, (B, L1p, D1p)).astype(jnp.bfloat16)
    yp = _pad_to(y, (B, L2p, D2p)).astype(jnp.bfloat16)
    wxp = _pad_to(wx, (D1p, Hp)).astype(jnp.bfloat16)
    wp = _pad_to(w, (Hp, Hp)).astype(jnp.bfloat16)
    bxp = _pad_to(bx.reshape(1, H), (1, Hp)).astype(jnp.float32)

    const = lambda shape: pl.BlockSpec(shape, lambda b, j: (0,) * len(shape))

    out_shapes = (
        jax.ShapeDtypeStruct((B, L1p, D2p), jnp.float32),
        jax.ShapeDtypeStruct((B, L1p, L2p), jnp.float32),
    )

    matched, alpha = pl.pallas_call(
        match_attn_kernel,
        out_shape=out_shapes,
        grid_spec=pltpu.PrefetchScalarGridSpec(
            num_scalar_prefetch=0,
            grid=(B, n_l1),
            in_specs=[
                pl.BlockSpec((1, tl1, D1p), lambda b, j: (b, j, 0)),   # x
                pl.BlockSpec((1, L2p, D2p), lambda b, j: (b, 0, 0)),   # y
                pl.BlockSpec((1, Hp, L2p), lambda b, j: (b, 0, 0)),    # y_proj^T
                pl.BlockSpec((1, 1, L2p), lambda b, j: (b, 0, 0)),     # mask bias
                const((D1p, Hp)),                                      # Wx
                const((1, Hp)),                                        # bx
                const((Hp, Hp)),                                       # W
            ],
            out_specs=[
                pl.BlockSpec((1, tl1, D2p), lambda b, j: (b, j, 0)),   # matched
                pl.BlockSpec((1, tl1, L2p), lambda b, j: (b, j, 0)),   # alpha
            ],
        ),
        compiler_params=pltpu.CompilerParams(
            # Every grid step is stateless (y_proj hoisted), so both the batch
            # and the L1-tile axes can be megacore-sharded (2 TCs on v7x).
            dimension_semantics=("parallel", "parallel"),
            vmem_limit_bytes=int(budget),
        ),
    )(xp, yp, ypt, bias, wxp, bxp, wp)

    return matched[:, :L1, :D2], alpha[:, :L1, :L2]


# ---------------------------------------------------------------------------
# Plain-JAX reference (f32) for correctness checking
# ---------------------------------------------------------------------------
def match_attn_ref(x, y, y_mask, wx, bx, wy, by, w):
    x_proj = jax.nn.relu(jnp.einsum("bld,dh->blh", x, wx) + bx)
    y_proj = jax.nn.relu(jnp.einsum("bld,dh->blh", y, wy) + by)
    x_w = jnp.einsum("blh,hk->blk", x_proj, w)
    scores = jnp.einsum("blh,bmh->blm", x_w, y_proj)
    scores = jnp.where(y_mask[:, None, :] > 0.5, -jnp.inf, scores)
    alpha = jax.nn.softmax(scores, axis=-1)
    matched = jnp.einsum("blm,bmd->bld", alpha, y)
    return matched, alpha


if __name__ == "__main__":
    key = jax.random.PRNGKey(0)
    # MXU/lane-friendly small shapes: H = min(D1, D2) = 128.
    B, L1, L2, D1, D2 = 2, 512, 256, 128, 128
    H = min(D1, D2)

    k = jax.random.split(key, 8)
    x = jax.random.normal(k[0], (B, L1, D1), dtype=jnp.float32)
    y = jax.random.normal(k[1], (B, L2, D2), dtype=jnp.float32)
    # 1 = padding, 0 = real token; ensure at least one real token per row.
    y_mask = (jax.random.uniform(k[2], (B, L2)) > 0.7).astype(jnp.float32)
    y_mask = y_mask.at[:, 0].set(0.0)

    # Deterministic "Linear" parameters, stored as (in, out) for the kernel.
    scale = 0.05
    wx = scale * jax.random.normal(k[3], (D1, H), dtype=jnp.float32)
    bx = scale * jax.random.normal(k[4], (H,), dtype=jnp.float32)
    wy = scale * jax.random.normal(k[5], (D2, H), dtype=jnp.float32)
    by = scale * jax.random.normal(k[6], (H,), dtype=jnp.float32)
    w = scale * jax.random.normal(k[7], (H, H), dtype=jnp.float32)

    matched, alpha = match_attn(x, y, y_mask, wx, bx, wy, by, w)
    jax.block_until_ready((matched, alpha))

    matched_ref, alpha_ref = match_attn_ref(x, y, y_mask, wx, bx, wy, by, w)

    # bf16 MXU operands + bf16 exp + approx reciprocal vs f32 ref -> relaxed tol.
    assert jnp.allclose(alpha.sum(-1), 1.0, atol=1e-2), "alpha rows must sum to 1"
    assert jnp.allclose(alpha, alpha_ref, atol=3e-2, rtol=3e-2), "alpha mismatch"
    assert jnp.allclose(matched, matched_ref, atol=3e-2, rtol=3e-2), "matched mismatch"

    print("KERNEL_OK")
</pallas_src>

<mosaic_0001>
module attributes {stable_mosaic.version = 11 : i64} {
  func.func @match_attn_kernel(%arg0: i32, %arg1: i32, %arg2: memref<1x512x128xbf16, #tpu.memory_space<vmem>>, %arg3: memref<1x256x128xbf16, #tpu.memory_space<vmem>>, %arg4: memref<1x128x256xbf16, #tpu.memory_space<vmem>>, %arg5: memref<1x1x256xf32, #tpu.memory_space<vmem>>, %arg6: memref<128x128xbf16, #tpu.memory_space<vmem>>, %arg7: memref<1x128xf32, #tpu.memory_space<vmem>>, %arg8: memref<128x128xbf16, #tpu.memory_space<vmem>>, %arg9: memref<1x512x128xf32, #tpu.memory_space<vmem>>, %arg10: memref<1x512x256xf32, #tpu.memory_space<vmem>>) attributes {dimension_semantics = [#tpu.dimension_semantics<parallel>, #tpu.dimension_semantics<parallel>], iteration_bounds = array<i64: 2, 1>, scalar_prefetch = 0 : i64, scratch_operands = 0 : i64, tpu.core_type = #tpu.core_type<tc>, window_params = [{transform_indices = @transform_0, window_bounds = array<i64: 1, 512, 128>}, {transform_indices = @transform_1, window_bounds = array<i64: 1, 256, 128>}, {transform_indices = @transform_2, window_bounds = array<i64: 1, 128, 256>}, {transform_indices = @transform_3, window_bounds = array<i64: 1, 1, 256>}, {pipeline_mode = #tpu.pipeline_mode<synchronous>, transform_indices = @transform_4, window_bounds = array<i64: 128, 128>}, {pipeline_mode = #tpu.pipeline_mode<synchronous>, transform_indices = @transform_5, window_bounds = array<i64: 1, 128>}, {pipeline_mode = #tpu.pipeline_mode<synchronous>, transform_indices = @transform_6, window_bounds = array<i64: 128, 128>}, {transform_indices = @transform_7, window_bounds = array<i64: 1, 512, 128>}, {transform_indices = @transform_8, window_bounds = array<i64: 1, 512, 256>}]} {
    %c0 = arith.constant 0 : index
    %c0_0 = arith.constant 0 : index
    %c0_1 = arith.constant 0 : index
    %0 = vector.load %arg2[%c0, %c0_0, %c0_1] : memref<1x512x128xbf16, #tpu.memory_space<vmem>>, vector<1x512x128xbf16>
    %1 = vector.shape_cast %0 : vector<1x512x128xbf16> to vector<512x128xbf16>
    %c0_2 = arith.constant 0 : index
    %c0_3 = arith.constant 0 : index
    %2 = vector.load %arg6[%c0_2, %c0_3] : memref<128x128xbf16, #tpu.memory_space<vmem>>, vector<128x128xbf16>
    %cst = arith.constant dense<0.000000e+00> : vector<512x128xf32>
    %3 = tpu.matmul %1, %2, %cst {dimension_numbers = #tpu.dot_dimension_numbers<[1], [0], [0], [1], [0, 0, 1, 1], [], []>} : vector<512x128xbf16>, vector<128x128xbf16>, vector<512x128xf32> -> vector<512x128xf32>
    %c0_4 = arith.constant 0 : index
    %c0_5 = arith.constant 0 : index
    %4 = vector.load %arg7[%c0_4, %c0_5] : memref<1x128xf32, #tpu.memory_space<vmem>>, vector<1x128xf32>
    %5 = vector.broadcast %4 : vector<1x128xf32> to vector<512x128xf32>
    %6 = arith.addf %3, %5 : vector<512x128xf32>
    %cst_6 = arith.constant 0.000000e+00 : f32
    %7 = vector.broadcast %cst_6 : f32 to vector<512x128xf32>
    %8 = arith.maximumf %6, %7 : vector<512x128xf32>
    %9 = arith.truncf %8 : vector<512x128xf32> to vector<512x128xbf16>
    %c0_7 = arith.constant 0 : index
    %c0_8 = arith.constant 0 : index
    %10 = vector.load %arg8[%c0_7, %c0_8] : memref<128x128xbf16, #tpu.memory_space<vmem>>, vector<128x128xbf16>
    %cst_9 = arith.constant dense<0.000000e+00> : vector<512x128xf32>
    %11 = tpu.matmul %9, %10, %cst_9 {dimension_numbers = #tpu.dot_dimension_numbers<[1], [0], [0], [1], [0, 0, 1, 1], [], []>} : vector<512x128xbf16>, vector<128x128xbf16>, vector<512x128xf32> -> vector<512x128xf32>
    %12 = arith.truncf %11 : vector<512x128xf32> to vector<512x128xbf16>
    %c0_10 = arith.constant 0 : index
    %c0_11 = arith.constant 0 : index
    %c0_12 = arith.constant 0 : index
    %13 = vector.load %arg4[%c0_10, %c0_11, %c0_12] : memref<1x128x256xbf16, #tpu.memory_space<vmem>>, vector<1x128x256xbf16>
    %14 = vector.shape_cast %13 : vector<1x128x256xbf16> to vector<128x256xbf16>
    %cst_13 = arith.constant dense<0.000000e+00> : vector<512x256xf32>
    %15 = tpu.matmul %12, %14, %cst_13 {dimension_numbers = #tpu.dot_dimension_numbers<[1], [0], [0], [1], [0, 0, 1, 1], [], []>} : vector<512x128xbf16>, vector<128x256xbf16>, vector<512x256xf32> -> vector<512x256xf32>
    %c0_14 = arith.constant 0 : index
    %c0_15 = arith.constant 0 : index
    %c0_16 = arith.constant 0 : index
    %16 = vector.load %arg5[%c0_14, %c0_15, %c0_16] : memref<1x1x256xf32, #tpu.memory_space<vmem>>, vector<1x1x256xf32>
    %17 = vector.shape_cast %16 : vector<1x1x256xf32> to vector<1x256xf32>
    %18 = vector.broadcast %17 : vector<1x256xf32> to vector<512x256xf32>
    %19 = arith.addf %15, %18 : vector<512x256xf32>
    %cst_17 = arith.constant dense<0xFF800000> : vector<512xf32>
    %20 = vector.multi_reduction <maximumf>, %19, %cst_17 [1] : vector<512x256xf32> to vector<512xf32>
    %21 = vector.shape_cast %20 : vector<512xf32> to vector<512x1xf32>
    %22 = vector.broadcast %21 : vector<512x1xf32> to vector<512x256xf32>
    %23 = arith.subf %19, %22 : vector<512x256xf32>
    %24 = arith.truncf %23 : vector<512x256xf32> to vector<512x256xbf16>
    %25 = math.exp %24 : vector<512x256xbf16>
    %26 = arith.extf %25 : vector<512x256xbf16> to vector<512x256xf32>
    %cst_18 = arith.constant dense<0.000000e+00> : vector<512xf32>
    %27 = vector.multi_reduction <add>, %26, %cst_18 [1] : vector<512x256xf32> to vector<512xf32>
    %28 = vector.shape_cast %27 : vector<512xf32> to vector<512x1xf32>
    %29 = tpu.reciprocal %28 {approx = true} : vector<512x1xf32> -> vector<512x1xf32>
    %30 = vector.broadcast %29 : vector<512x1xf32> to vector<512x256xf32>
    %31 = arith.mulf %26, %30 : vector<512x256xf32>
    %32 = arith.truncf %31 : vector<512x256xf32> to vector<512x256xbf16>
    %c0_19 = arith.constant 0 : index
    %c0_20 = arith.constant 0 : index
    %c0_21 = arith.constant 0 : index
    %33 = vector.load %arg3[%c0_19, %c0_20, %c0_21] : memref<1x256x128xbf16, #tpu.memory_space<vmem>>, vector<1x256x128xbf16>
    %34 = vector.shape_cast %33 : vector<1x256x128xbf16> to vector<256x128xbf16>
    %cst_22 = arith.constant dense<0.000000e+00> : vector<512x128xf32>
    %35 = tpu.matmul %32, %34, %cst_22 {dimension_numbers = #tpu.dot_dimension_numbers<[1], [0], [0], [1], [0, 0, 1, 1], [], []>} : vector<512x256xbf16>, vector<256x128xbf16>, vector<512x128xf32> -> vector<512x128xf32>
    %c0_23 = arith.constant 0 : index
    %c0_24 = arith.constant 0 : index
    %c0_25 = arith.constant 0 : index
    %36 = vector.load %arg9[%c0_23, %c0_24, %c0_25] : memref<1x512x128xf32, #tpu.memory_space<vmem>>, vector<1x512x128xf32>
    %37 = vector.shape_cast %36 : vector<1x512x128xf32> to vector<512x128xf32>
    %38 = vector.shape_cast %35 : vector<512x128xf32> to vector<1x512x128xf32>
    tpu.vector_store %arg9[%c0_23, %c0_24, %c0_25], %38 {strides = array<i32>} : memref<1x512x128xf32, #tpu.memory_space<vmem>>, vector<1x512x128xf32>,
    %c0_26 = arith.constant 0 : index
    %c0_27 = arith.constant 0 : index
    %c0_28 = arith.constant 0 : index
    %39 = vector.load %arg10[%c0_26, %c0_27, %c0_28] : memref<1x512x256xf32, #tpu.memory_space<vmem>>, vector<1x512x256xf32>
    %40 = vector.shape_cast %39 : vector<1x512x256xf32> to vector<512x256xf32>
    %41 = vector.shape_cast %31 : vector<512x256xf32> to vector<1x512x256xf32>
    tpu.vector_store %arg10[%c0_26, %c0_27, %c0_28], %41 {strides = array<i32>} : memref<1x512x256xf32, #tpu.memory_space<vmem>>, vector<1x512x256xf32>,
    return
  }
  func.func @transform_0(%arg0: i32, %arg1: i32) -> (i32, i32, i32) {
    %c0_i32 = arith.constant 0 : i32
    %c0_i32_0 = arith.constant 0 : i32
    return %arg0, %arg1, %c0_i32 : i32, i32, i32
  }
  func.func @transform_1(%arg0: i32, %arg1: i32) -> (i32, i32, i32) {
    %c0_i32 = arith.constant 0 : i32
    %c0_i32_0 = arith.constant 0 : i32
    %c0_i32_1 = arith.constant 0 : i32
    return %arg0, %c0_i32, %c0_i32_0 : i32, i32, i32
  }
  func.func @transform_2(%arg0: i32, %arg1: i32) -> (i32, i32, i32) {
    %c0_i32 = arith.constant 0 : i32
    %c0_i32_0 = arith.constant 0 : i32
    %c0_i32_1 = arith.constant 0 : i32
    return %arg0, %c0_i32, %c0_i32_0 : i32, i32, i32
  }
  func.func @transform_3(%arg0: i32, %arg1: i32) -> (i32, i32, i32) {
    %c0_i32 = arith.constant 0 : i32
    %c0_i32_0 = arith.constant 0 : i32
    %c0_i32_1 = arith.constant 0 : i32
    return %arg0, %c0_i32, %c0_i32_0 : i32, i32, i32
  }
  func.func @transform_4(%arg0: i32, %arg1: i32) -> (i32, i32) {
    %c0_i32 = arith.constant 0 : i32
    %c0_i32_0 = arith.constant 0 : i32
    %c0_i32_1 = arith.constant 0 : i32
    return %c0_i32, %c0_i32_0 : i32, i32
  }
  func.func @transform_5(%arg0: i32, %arg1: i32) -> (i32, i32) {
    %c0_i32 = arith.constant 0 : i32
    %c0_i32_0 = arith.constant 0 : i32
    %c0_i32_1 = arith.constant 0 : i32
    return %c0_i32, %c0_i32_0 : i32, i32
  }
  func.func @transform_6(%arg0: i32, %arg1: i32) -> (i32, i32) {
    %c0_i32 = arith.constant 0 : i32
    %c0_i32_0 = arith.constant 0 : i32
    %c0_i32_1 = arith.constant 0 : i32
    return %c0_i32, %c0_i32_0 : i32, i32
  }
  func.func @transform_7(%arg0: i32, %arg1: i32) -> (i32, i32, i32) {
    %c0_i32 = arith.constant 0 : i32
    %c0_i32_0 = arith.constant 0 : i32
    return %arg0, %arg1, %c0_i32 : i32, i32, i32
  }
  func.func @transform_8(%arg0: i32, %arg1: i32) -> (i32, i32, i32) {
    %c0_i32 = arith.constant 0 : i32
    %c0_i32_0 = arith.constant 0 : i32
    return %arg0, %arg1, %c0_i32 : i32, i32, i32
  }
}

</mosaic_0001>

<bundles_post_ra>
// kernel: tpu_custom_call.1
= control target key start
LH: loop header
LB: loop body
LE: loop exit
PB: predicated region body
PF: predicated region fallthrough
CT: control target
= control target key end

     0   :  { %s7865_s0 = inlined_call_operand.hbm [shape: bf16[2,512,128], index: 0, kind: input, shape index: {}]   ;;  %s7866_s1 = inlined_call_operand.hbm [shape: bf16[2,256,128], index: 1, kind: input, shape index: {}]   ;;  %s7867_s2 = inlined_call_operand.hbm [shape: bf16[2,128,256], index: 2, kind: input, shape index: {}]   ;;  %s7868_s3 = inlined_call_operand.hbm [shape: f32[2,1,256], index: 3, kind: input, shape index: {}]   ;;  %s7869_s4 = inlined_call_operand.hbm [shape: bf16[128,128], index: 4, kind: input, shape index: {}]   ;;  %s7870_s5 = inlined_call_operand.vmem [shape: f32[1,128], index: 5, kind: input, shape index: {}]   ;;  %s7871_s6 = inlined_call_operand.hbm [shape: bf16[128,128], index: 6, kind: input, shape index: {}]   ;;  %s7872_s7 = inlined_call_operand.hbm [shape: f32[2,512,128], index: 7, kind: output, shape index: {0}]   ;;  %s7873_s8 = inlined_call_operand.hbm [shape: f32[2,512,256], index: 8, kind: output, shape index: {1}]  }
   0x1   :  { %7932 = sst [smem:[#allocation52_spill]] %s7865_s0 }
   0x2   :  { %7933 = sst [smem:[#allocation53_spill]] %s7866_s1 }
   0x3   :  { %7934 = sst [smem:[#allocation54_spill]] %s7867_s2 }
   0x4   :  { %7935 = sst [smem:[#allocation55_spill]] %s7869_s4 }
   0x5   :  { %7936 = sst [smem:[#allocation56_spill]] %s7872_s7 }
   0x6   :  { %7937 = sst [smem:[#allocation57_spill]] %s7873_s8 }
   0x7   :  { %14 = vsyncpa [#allocation3], 0 }
   0x8   :  { %16 = vsyncpa [#allocation3 + $0x1], 0 }
   0x9   :  { %17 = vsyncpa [#allocation6], 0 }
   0xa   :  { %19 = vsyncpa [#allocation6 + $0x1], 0 }
   0xb   :  { %20 = vsyncpa [#allocation9], 0 }
   0xc   :  { %22 = vsyncpa [#allocation9 + $0x1], 0 }
   0xd   :  { %23 = vsyncpa [#allocation12], 0 }
   0xe   :  { %24 = vsyncpa [#allocation4], 0 }
   0xf   :  { %26 = vsyncpa [#allocation4 + $0x1], 0 }
  0x10   :  { %27 = vsyncpa [#allocation15], 0 }
  0x11   :  { %29 = vsyncpa [#allocation15 + $0x1], 0  ;;  %s5442_s27 = smov 0   ;;  %s5444_s28 = smov 0  }
  0x12   :  { %s5446_s29 = smov 0   ;;  %s5448_s30 = smov 0  }
  0x13   :  { %s5450_s9 = smov 0   ;;  %s5452_s10 = smov 0  }
  0x14 LB: > { %7938 = sst [smem:[#allocation23_spill]] %s5365_s27  ;;  %s5473_s11 = sadd.s32 4294967295, %s5385_s10   ;;  %s5385_s10 = sphi %s5452_s10, %s35_s10   ;;  %s5381_s9 = sphi %s5450_s9, %s8061_s9   ;;  %s5377_s30 = sphi %s5448_s30, %s8060_s30   ;;  %s5373_s29 = sphi %s5446_s29, %s8056_s29   ;;  %s5369_s28 = sphi %s5444_s28, %s8059_s28   ;;  %s5365_s27 = sphi %s5442_s27, %s8058_s27  }
  0x15   : > { %7939 = sst [smem:[#allocation24_spill]] %s5373_s29  ;;  %s4125_s12 = sadd.s32 4294967294, %s5385_s10  }
  0x16   : > { %7940 = sst [smem:[#allocation25_spill]] %s5377_s30  ;;  %p69_p0 = scmp.ne.s32.totalorder %s5369_s28, %s5365_s27 }
  0x17   : > { %p70_p1 = scmp.eq.s32.totalorder %s5473_s11, 0  ;;  %p236_p2 = scmp.eq.s32.totalorder %s5473_s11, 1 }
  0x18   : > { %p242_p3 = scmp.eq.s32.totalorder %s4125_s12, 1  ;;  %p4126_p5 = scmp.ge.s32.totalorder %s5385_s10, 1 }
  0x19   : > { %p5482_p4 = por %p70_p1, %p69_p0  ;;  %p277_p7 = scmp.lt.s32.totalorder %s5385_s10, 3 }
  0x1a   : > { %p5487_p6 = por %p242_p3, %p69_p0  ;;  %s7944_s4 = sld [smem:[#allocation55_spill]] }
  0x1b   : > { %p5495_p8 = pnand %p4126_p5, %p277_p7  ;;  %s5387_s19 = smov [#allocation10]  }
  0x1c   : > { %s7942_s14 = scalar_select %p5487_p6, 1, 0 }
  0x1d   : > { %p4599_p9 = pneg %p5495_p8  ;;  %s290_s20 = sshll.u32 %s5387_s19, 4  ;;  %s291_s20 = int_to_ptr.vmem [resolvable:$true] %s290_s20 }
  0x1e   : > { %7943 = sst [smem:[#allocation26_spill]] %s7942_s14  ;;  %s7874_s22 = smov 64  }
  0x1f   : > { %p5503_p10 = pnand %p4599_p9, %p70_p1  ;;  %s7876_s23 = smov 4  }
  0x20   : > { %s288_s17 = sshll.u32 %s7944_s4, 4  ;;  %s47_s24 = sadd.s32 1, %s5381_s9  ;;  %s289_s17 = int_to_ptr.hbm [resolvable:$true] %s288_s17 }
  0x21   : > { %4602 = dma.hbm_to_vmem [thread:$0]  (!%p5503_p10), %s289_s17, 1024, %s291_s20, [#allocation9], %s7874_s22, %s7874_s22, %s7876_s23  }
  0x22   : > { %p49_p12 = scmp.ge.s32.totalorder %s47_s24, 2  ;;  %s56_s25 = sadd.s32 1, %s5373_s29 }
  0x23   : > { %p63_p13 = scmp.ne.s32.totalorder %s5373_s29, %s5369_s28  ;;  %p64_p0 = scmp.eq.s32.totalorder %s5385_s10, 0 }
  0x24   : > { %s8063_s24 = smov (%p49_p12, %s47_s24), 0  ;;  %p4628_p7 = scmp.lt.s32.totalorder %s5385_s10, 2 }
  0x25   : > { %7947 = sst [smem:[#allocation27_spill]] %s8063_s24  ;;  %p65_p3 = por %p64_p0, %p63_p13 }
  0x26   : > { %p5522_p5 = por %p236_p2, %p63_p13  ;;  %s51_s12 = ssub.s32 %s5381_s9, %s8063_s24 }
  0x27   : > { %p54_p9 = scmp.eq.s32.totalorder %s51_s12, 0  ;;  %s5530_s15 = sand.u32 1, %s5373_s29  }
  0x28   : > { %s7948_s26 = scalar_select %p5522_p5, 1, 0 }
  0x29   : > { %p5532_p11 = pnand %p4628_p7, %p65_p3  ;;  %s7886_s17 = sand.u32 1, %s5385_s10  }
  0x2a   : > { %7949 = sst [smem:[#allocation28_spill]] %s7948_s26  ;;  %s4133_s20 = sshll.u32 %s5530_s15, 7 }
  0x2b   : > { %s5538_s19 = scalar_select %p54_p9, %s5373_s29, %s56_s25  }
  0x2c   : > { %s4479_s22 = sshll.u32 %s5381_s9, 7  ;;  %s7952_s1 = sld [smem:[#allocation53_spill]] }
  0x2d   : > { %7951 = sst [smem:[#allocation29_spill]] %s5538_s19  ;;  %s349_s27 = scalar_lea.vmem [#allocation5], %s4133_s20 }
  0x2e   : > { %s357_s12 = sshll.u32 %s349_s27, 4  ;;  %s5547_s7 = scalar_lea.sflag [#allocation6], %s7886_s17  ;;  %s358_s12 = int_to_ptr.vmem [resolvable:$true] %s357_s12 }
  0x2f   : > { %s7953_s25 = smov 4   ;;  %s7954_s19 = smov 64  }
  0x30   : > { %s7955_s2 = sld [smem:[#allocation54_spill]]  ;;  %s371_s27 = scalar_lea.vmem [#allocation7], %s4133_s20 }
  0x31   : > { %s305_s17 = sshll.u32 %s7871_s6, 4  ;;  %s5390_s30 = smov [#allocation11]   ;;  %s306_s17 = int_to_ptr.hbm [resolvable:$true] %s305_s17 }
  0x32   : > { %s354_s14 = scalar_lea.hbm %s7952_s1, %s4479_s22  ;;  %s379_s1 = sshll.u32 %s371_s27, 4  ;;  %s380_s1 = int_to_ptr.vmem [resolvable:$true] %s379_s1 }
  0x33   : > { %s355_s24 = sshll.u32 %s354_s14, 4  ;;  %s4130_s29 = sshll.u32 %s5530_s15, 8  ;;  %s356_s24 = int_to_ptr.hbm [resolvable:$true] %s355_s24 }
  0x34   : > { %4612 = dma.hbm_to_vmem [thread:$0]  (!%p5532_p11), %s356_s24, 2048, %s358_s12, %s5547_s7, %s7954_s19, %s7954_s19, %s7953_s25  }
  0x35   : > { %s307_s24 = sshll.u32 %s5390_s30, 4  ;;  %s7956_s0 = sld [smem:[#allocation52_spill]]  ;;  %s308_s24 = int_to_ptr.vmem [resolvable:$true] %s307_s24 }
  0x36   : > { %s376_s14 = scalar_lea.hbm %s7955_s2, %s4479_s22  ;;  %s4478_s22 = sshll.u32 %s5381_s9, 8 }
  0x37   : > { %s377_s23 = sshll.u32 %s376_s14, 4  ;;  %s325_s4 = scalar_lea.vmem [#allocation2], %s4130_s29  ;;  %s378_s23 = int_to_ptr.hbm [resolvable:$true] %s377_s23 }
  0x38   : > { %4605 = dma.hbm_to_vmem [thread:$0]  (!%p5503_p10), %s306_s17, 1024, %s308_s24, [#allocation12], %s7954_s19, %s7954_s19, %s7953_s25  }
  0x39   : > { %s335_s14 = sshll.u32 %s325_s4, 4  ;;  %s322_s30 = scalar_lea.sflag [#allocation3], %s5530_s15  ;;  %s336_s14 = int_to_ptr.vmem [resolvable:$true] %s335_s14 }
  0x3a   : > { %s5391_s21 = smov 128   ;;  %s5392_s17 = smov 8  }
  0x3b   : > { %s332_s8 = scalar_lea.hbm %s7956_s0, %s4478_s22  ;;  %s4139_s27 = sshll.u32 %s5530_s15, 1 }
  0x3c   : > { %s333_s26 = sshll.u32 %s332_s8, 4  ;;  %s4140_s24 = sshll.u32 %s5381_s9, 1  ;;  %s334_s26 = int_to_ptr.hbm [resolvable:$true] %s333_s26 }
  0x3d   : > { %4609 = dma.hbm_to_vmem [thread:$0]  (!%p5532_p11), %s334_s26, 4096, %s336_s14, %s322_s30, %s7954_s19, %s7954_s19, %s7953_s25  }
  0x3e   : > { %4615 = dma.hbm_to_vmem [thread:$0]  (!%p5532_p11), %s378_s23, 2048, %s380_s1, %s5547_s7, %s5391_s21, %s5391_s21, %s5392_s17  }
  0x3f   : > { %s397_s29 = scalar_lea.hbm %s7868_s3, %s4140_s24  ;;  %s393_s12 = scalar_lea.vmem [#allocation8], %s4139_s27 }
  0x40   : > { %s401_s8 = sshll.u32 %s393_s12, 4  ;;  %s399_s4 = sshll.u32 %s397_s29, 4  ;;  %s402_s8 = int_to_ptr.vmem [resolvable:$true] %s401_s8  ;;  %s400_s4 = int_to_ptr.hbm [resolvable:$true] %s399_s4 }
  0x41   : > { %s7957_s0 = sand.u32 1, %s5385_s10   ;;  %410 = sbr.rel (%p5495_p8) target bundleno = 2015 (0x7df), region = 48 }
  0x42   : > { %s390_s2 = scalar_lea.sflag [#allocation9], %s7957_s0 }
  0x43   : > { %4618 = dma.hbm_to_vmem [thread:$0]  (!%p5532_p11), %s400_s4, 32, %s402_s8, %s390_s2  }
  0x46   : > { %s5592_s1 = sand.u32 1, %s5369_s28  }
  0x47   : > { %s4142_s7 = sshll.u32 %s5592_s1, 8  ;;  %s413_s15 = scalar_lea.sflag [#allocation3], %s5592_s1 }
  0x48   : > { %s5596_s19 = scalar_lea.vmem [#allocation2], %s4142_s7 }
  0x49   : > { %5336 = dma.done.wait (%p5482_p4), %s413_s15, 4096  }
  0x4a   : > { %5338 = vsyncadd (%p5482_p4), %s413_s15, 4294963200  ;;  %s422_s0 = sand.u32 1, %s5473_s11   ;;  %s4143_s2 = sshll.u32 %s5592_s1, 7 }
  0x4b   : > { %s423_s18 = scalar_lea.sflag [#allocation6], %s422_s0  ;;  %s5604_s16 = scalar_lea.vmem [#allocation5], %s4143_s2 }
  0x4c   : > { %5340 = dma.done.wait (%p5482_p4), %s423_s18, 4096  }
  0x4d   : > { %5342 = vsyncadd (%p5482_p4), %s423_s18, 4294963200  ;;  %s4145_s25 = sshll.u32 %s5592_s1, 1  ;;  %s5611_s23 = scalar_lea.vmem [#allocation7], %s4143_s2 }
  0x4e   : > { %s443_s26 = scalar_lea.sflag [#allocation9], %s422_s0  ;;  %s5613_s14 = scalar_lea.vmem [#allocation8], %s4145_s25 }
  0x4f   : > { %5344 = dma.done.wait (%p5482_p4), %s443_s26, 32  }
  0x50   : > { %5346 = vsyncadd (%p5482_p4), %s443_s26, 4294967264 }
  0x51   : > { %5348 = dma.done.wait (%p70_p1), [#allocation9], 1024  }
  0x52   : > { %5350 = vsyncadd (%p70_p1), [#allocation9], 4294966272 }
  0x53   : > { %5352 = dma.done.wait (%p70_p1), [#allocation12], 1024  }
  0x54   : > { %5354 = vsyncadd (%p70_p1), [#allocation12], 4294966272  ;;  %v4520_v0 = vld [vmem:[#allocation10 + $0x38] sm:$0xff]  ;;  %v4519_v1 = vld [vmem:[#allocation10 + $0x30] sm:$0xff]  ;;  %s4149_s30 = sshll.u32 %s5592_s1, 10  ;;  %s4148_s17 = sshll.u32 %s5592_s1, 9 }
  0x55   : > { %837 = vmatpush.bf16.msra.mxu0 %v4520_v0  ;;  %4563 = vmatpush.bf16.msra.mxu2 %v4520_v0  ;;  %v4518_v2 = vld [vmem:[#allocation10 + $0x28] sm:$0xff]  ;;  %v4517_v3 = vld [vmem:[#allocation10 + $0x20] sm:$0xff]  ;;  %v4516_v4 = vld [vmem:[#allocation10 + $0x18] sm:$0xff]  ;;  %s6302_s21 = scalar_lea.vmem [#allocation14], %s4149_s30  ;;  %s6586_s27 = scalar_lea.vmem [#allocation13], %s4148_s17 }
  0x56   : > { %v4515_v5 = vld [vmem:[#allocation10 + $0x10] sm:$0xff]  ;;  %v4514_v6 = vld [vmem:[#allocation10 + $0x8] sm:$0xff]  ;;  %v4513_v7 = vld [vmem:[#allocation10] sm:$0xff]  ;;  %s8048_s24 = sld [smem:[#allocation25_spill]]  ;;  %s3913_s7 = sshll.u32 %s6302_s21, 4  ;;  %s3914_s7 = int_to_ptr.vmem [resolvable:$true] %s3913_s7 }
  0x57   : > { %v4481_v8 = vld [vmem:[%s5596_s19] sm:$0xff]  ;;  %v4482_v10 = vld [vmem:[%s5596_s19 + $0x8] sm:$0xff]  ;;  %v4483_v12 = vld [vmem:[%s5596_s19 + $0x10] sm:$0xff]  ;;  %s8050_s8 = sld [smem:[#allocation57_spill]] }
  0x58   : > { %v4497_v9 = vld [vmem:[%s5596_s19 + $0x80] sm:$0xff]  ;;  %v4498_v11 = vld [vmem:[%s5596_s19 + $0x88] sm:$0xff]  ;;  %v4499_v13 = vld [vmem:[%s5596_s19 + $0x90] sm:$0xff] }
  0x59   : > { %838 = vmatpush.bf16.msra.mxu0 %v4519_v1  ;;  %4564 = vmatpush.bf16.msra.mxu2 %v4519_v1  ;;  %v4484_v14 = vld [vmem:[%s5596_s19 + $0x18] sm:$0xff]  ;;  %v4485_v16 = vld [vmem:[%s5596_s19 + $0x20] sm:$0xff]  ;;  %v4486_v19 = vld [vmem:[%s5596_s19 + $0x28] sm:$0xff] }
  0x5a   : > { %v4500_v15 = vld [vmem:[%s5596_s19 + $0x98] sm:$0xff]  ;;  %v4501_v17 = vld [vmem:[%s5596_s19 + $0xa0] sm:$0xff]  ;;  %v4502_v20 = vld [vmem:[%s5596_s19 + $0xa8] sm:$0xff] }
  0x5b   : > { %v4528_v18 = vld [vmem:[#allocation11 + $0x38] sm:$0xff]  ;;  %v4527_v21 = vld [vmem:[#allocation11 + $0x30] sm:$0xff]  ;;  %v4526_v22 = vld [vmem:[#allocation11 + $0x28] sm:$0xff] }
  0x5c   : > { %1166 = vmatpush.bf16.msra.mxu1 %v4528_v18  ;;  %4571 = vmatpush.bf16.msra.mxu3 %v4528_v18  ;;  %v4525_v23 = vld [vmem:[#allocation11 + $0x20] sm:$0xff]  ;;  %v4524_v24 = vld [vmem:[#allocation11 + $0x18] sm:$0xff]  ;;  %v4487_v25 = vld [vmem:[%s5596_s19 + $0x30] sm:$0xff]  ;;  %s4562_s20 = sshll.u32 %s8048_s24, 10 }
  0x5d   : > { %839 = vmatpush.bf16.msra.mxu0 %v4518_v2  ;;  %4565 = vmatpush.bf16.msra.mxu2 %v4518_v2  ;;  %v4503_v26 = vld [vmem:[%s5596_s19 + $0xb0] sm:$0xff]  ;;  %v4521_v29 = vld [vmem:[#allocation11] sm:$0xff]  ;;  %v4488_v30 = vld [vmem:[%s5596_s19 + $0x38] sm:$0xff]  ;;  %s3912_s4 = scalar_lea.hbm %s8050_s8, %s4562_s20  ;;  %s5275_s25 = scalar_lea.hbm %s8050_s8, 2048 }
  0x5e   : > { %v4523_v27 = vld [vmem:[#allocation11 + $0x10] sm:$0xff]  ;;  %v4522_v28 = vld [vmem:[#allocation11 + $0x8] sm:$0xff]  ;;  %v4402_v36 = vld [vmem:[%s5611_s23 + $0x78] sm:$0xf0]  ;;  %s3915_s15 = sshll.u32 %s3912_s4, 4  ;;  %s3916_s15 = int_to_ptr.hbm [resolvable:$true] %s3915_s15 }
  0x5f   : > { %v4504_v31 = vld [vmem:[%s5596_s19 + $0xb8] sm:$0xff]  ;;  %v4400_v32 = vld [vmem:[%s5611_s23 + $0x70] sm:$0xf]  ;;  %v4543_v34 = vld [vmem:[%s5611_s23 + $0x74] sm:$0xf]  ;;  %s5269_s0 = sshra.s32 %s3916_s15, 4  ;;  %s5270_s0 = int_to_ptr.hbm [resolvable:$true] %s5269_s0 }
  0x60   : > { %1167 = vmatpush.bf16.msra.mxu1 %v4527_v21  ;;  %4572 = vmatpush.bf16.msra.mxu3 %v4527_v21  ;;  %v4544_v33 = vld [vmem:[%s5611_s23 + $0x74] sm:$0xf0]  ;;  %v4405_v37 = vor.u32 %v4543_v34, %v4402_v36  ;;  %v4489_v38 = vld [vmem:[%s5596_s19 + $0x40] sm:$0xff]  ;;  %v4490_v52 = vld [vmem:[%s5596_s19 + $0x48] sm:$0xff]  ;;  %s5271_s2 = scalar_lea.hbm %s5270_s0, 1024  ;;  %p5276_p8 = scmp.lt.s32.totalorder %s5270_s0, %s8050_s8 }
  0x61   : > { %840 = vmatpush.bf16.msra.mxu0 %v4517_v3  ;;  %4566 = vmatpush.bf16.msra.mxu2 %v4517_v3  ;;  %v4401_v35 = vor.u32 %v4544_v33, %v4400_v32  ;;  %v4505_v39 = vld [vmem:[%s5596_s19 + $0xc0] sm:$0xff]  ;;  %v4506_v53 = vld [vmem:[%s5596_s19 + $0xc8] sm:$0xff]  ;;  %v4384_v33 = vld [vmem:[%s5611_s23 + $0x50] sm:$0xf]  ;;  %p5272_p1 = scmp.ne.s32.totalorder %s5270_s0, %s5271_s2  ;;  %p5277_p10 = scmp.lt.s32.totalorder %s5275_s25, %s5271_s2 }
  0x62   : > { %v5652_v41 = vld [vmem:[%s7870_s5] ss:$0 sm:$0xff]  ;;  %v4542_v60 = vld [vmem:[%s5611_s23 + $0x64] sm:$0xf0]  ;;  %v4541_v61 = vld [vmem:[%s5611_s23 + $0x64] sm:$0xf] }
  0x63   : > { %v4392_v59 = vld [vmem:[%s5611_s23 + $0x60] sm:$0xf]  ;;  %v4394_v0 = vld [vmem:[%s5611_s23 + $0x68] sm:$0xf0]  ;;  %v4540_v34 = vld [vmem:[%s5611_s23 + $0x54] sm:$0xf0]  ;;  %p5273_p2 = pnand %p5272_p1, %p5522_p5  ;;  %p5278_p11 = por %p5277_p10, %p5276_p8 }
  0x64   : > { %1168 = vmatpush.bf16.msra.mxu1 %v4526_v22  ;;  %4573 = vmatpush.bf16.msra.mxu3 %v4526_v22  ;;  %v4393_v63 = vor.u32 %v4542_v60, %v4392_v59  ;;  %v4397_v1 = vor.u32 %v4541_v61, %v4394_v0 }
  0x65   : > { %841 = vmatpush.bf16.msra.mxu0 %v4516_v4  ;;  %4567 = vmatpush.bf16.msra.mxu2 %v4516_v4  ;;  %p5274_p4 = pneg %p5273_p2 }
  0x67   : > { %p5279_p12 = pnand %p5278_p11, %p5274_p4 }
  0x68   : > { %1169 = vmatpush.bf16.msra.mxu1 %v4525_v23  ;;  %4574 = vmatpush.bf16.msra.mxu3 %v4525_v23 }
  0x69   : > { %842 = vmatpush.bf16.msra.mxu0 %v4515_v5  ;;  %4568 = vmatpush.bf16.msra.mxu2 %v4515_v5 }
  0x6c   : > { %1170 = vmatpush.bf16.msra.mxu1 %v4524_v24  ;;  %4575 = vmatpush.bf16.msra.mxu3 %v4524_v24 }
  0x6d   : > { %843 = vmatpush.bf16.msra.mxu0 %v4514_v6  ;;  %4569 = vmatpush.bf16.msra.mxu2 %v4514_v6 }
  0x70   : > { %1171 = vmatpush.bf16.msra.mxu1 %v4523_v27  ;;  %4576 = vmatpush.bf16.msra.mxu3 %v4523_v27  ;;  %v4508_v27 = vld [vmem:[%s5596_s19 + $0xd8] sm:$0xff] }
  0x71   : > { %844 = vmatpush.bf16.msra.mxu0 %v4513_v7  ;;  %4570 = vmatpush.bf16.msra.mxu2 %v4513_v7 }
  0x74   : > { %845 = vmatmul.bf16.vlgmr.msra.gmra.mxu0 %v4481_v8  ;;  %925 = vmatmul.bf16.vlgmr.msra.gmra.mxu2 %v4497_v9 }
  0x75   : > { %1172 = vmatpush.bf16.msra.mxu1 %v4522_v28  ;;  %4577 = vmatpush.bf16.msra.mxu3 %v4522_v28 }
  0x76   : > { %1469 = vmatpush.bf16.msrb.mxu2 %v4401_v35  ;;  %v4539_v35 = vld [vmem:[%s5611_s23 + $0x54] sm:$0xf] }
  0x79   : > { %1173 = vmatpush.bf16.msra.mxu1 %v4521_v29  ;;  %4578 = vmatpush.bf16.msra.mxu3 %v4521_v29 }
  0x7a   : > { %1470 = vmatpush.bf16.msrb.mxu2 %v4393_v63 }
  0x7d   : > { %1638 = vmatpush.bf16.msrb.mxu3 %v4405_v37  ;;  %v4385_v37 = vor.u32 %v4540_v34, %v4384_v33 }
  0x7f   : > { %1471 = vmatpush.bf16.msrb.mxu2 %v4385_v37  ;;  %v4360_v37 = vld [vmem:[%s5611_s23 + $0x20] sm:$0xf] }
  0x81   : > { %1639 = vmatpush.bf16.msrb.mxu3 %v4397_v1  ;;  %v4494_v1 = vld [vmem:[%s5596_s19 + $0x68] sm:$0xff] }
  0x84   : > { %850 = vmatmul.bf16.gmra.mxu0 %v4482_v10  ;;  %930 = vmatmul.bf16.gmra.mxu2 %v4498_v11  ;;  %v4491_v10 = vld [vmem:[%s5596_s19 + $0x50] sm:$0xff] }
  0x85   : > { %v4507_v11 = vld [vmem:[%s5596_s19 + $0xd0] sm:$0xff] }
  0x94   : > { %855 = vmatmul.bf16.gmra.mxu0 %v4483_v12  ;;  %935 = vmatmul.bf16.gmra.mxu2 %v4499_v13 }
  0xa4   : > { %860 = vmatmul.bf16.gmra.mxu0 %v4484_v14  ;;  %940 = vmatmul.bf16.gmra.mxu2 %v4500_v15 }
  0xb4   : > { %865 = vmatmul.bf16.gmra.mxu0 %v4485_v16  ;;  %945 = vmatmul.bf16.gmra.mxu2 %v4501_v17 }
  0xc4   : > { %870 = vmatmul.bf16.gmra.mxu0 %v4486_v19  ;;  %950 = vmatmul.bf16.gmra.mxu2 %v4502_v20 }
  0xd4   : > { %875 = vmatmul.bf16.gmra.mxu0 %v4487_v25  ;;  %955 = vmatmul.bf16.gmra.mxu2 %v4503_v26  ;;  %v4492_v26 = vld [vmem:[%s5596_s19 + $0x58] sm:$0xff] }
  0xe4   : > { %880 = vmatmul.bf16.gmra.mxu0 %v4488_v30  ;;  %960 = vmatmul.bf16.gmra.mxu2 %v4504_v31 }
  0xf1   : > { %v846_v40 = vpop.f32.mrf.mxu0 }
  0xf2   : > { %v847_v42 = vadd.f32 %v5652_v41, %v846_v40 }
  0xf4   : > { %885 = vmatmul.bf16.gmra.mxu0 %v4489_v38  ;;  %965 = vmatmul.bf16.gmra.mxu2 %v4505_v39  ;;  %v1006_v45 = vmax.f32 %v847_v42, 0.0  ;;  %v4386_v38 = vld [vmem:[%s5611_s23 + $0x58] sm:$0xf0] }
  0xf5   : > { %v4389_v39 = vor.u32 %v4539_v35, %v4386_v38  ;;  %v4534_v38 = vld [vmem:[%s5611_s23 + $0x24] sm:$0xf0] }
  0xf7   : > { %v926_v43 = vpop.f32.mrf.mxu2  ;;  %1640 = vmatpush.bf16.msrb.mxu3 %v4389_v39  ;;  %v4361_v39 = vor.u32 %v4534_v38, %v4360_v37 }
  0xf8   : > { %v927_v48 = vadd.f32 %v5652_v41, %v926_v43 }
  0xf9   : > { %v848_v44 = vpop.f32.mrf.mxu0 }
  0xfa   : > { %v849_v46 = vadd.f32 %v5652_v41, %v848_v44  ;;  %v1038_v55 = vmax.f32 %v927_v48, 0.0 }
  0xfc   : > { %v1007_v47 = vmax.f32 %v849_v46, 0.0 }
  0xfe   : > { %v1070_v49 = vpack.c.bf16 %v1007_v47, %v1006_v45 }
  0xff   : > { %v928_v50 = vpop.f32.mrf.mxu2 }
 0x100   : > { %v929_v51 = vadd.f32 %v5652_v41, %v928_v50  ;;  %1174 = vmatmul.bf16.vlgmr.msra.gmra.mxu1 %v1070_v49  ;;  %v4493_v49 = vld [vmem:[%s5596_s19 + $0x60] sm:$0xff] }
 0x101   : > { %v851_v54 = vpop.f32.mrf.mxu0  ;;  %v4509_v50 = vld [vmem:[%s5596_s19 + $0xe0] sm:$0xff] }
 0x102   : > { %v1039_v56 = vmax.f32 %v929_v51, 0.0  ;;  %v852_v58 = vadd.f32 %v5652_v41, %v851_v54 }
 0x104   : > { %890 = vmatmul.bf16.gmra.mxu0 %v4490_v52  ;;  %970 = vmatmul.bf16.gmra.mxu2 %v4506_v53  ;;  %v1086_v57 = vpack.c.bf16 %v1039_v56, %v1038_v55  ;;  %v1008_v3 = vmax.f32 %v852_v58, 0.0 }
 0x106   : > { %1254 = vmatmul.bf16.vlgmr.msra.gmra.mxu3 %v1086_v57 }
 0x107   : > { %v931_v62 = vpop.f32.mrf.mxu2 }
 0x108   : > { %v932_v6 = vadd.f32 %v5652_v41, %v931_v62 }
 0x109   : > { %v853_v2 = vpop.f32.mrf.mxu0 }
 0x10a   : > { %v854_v4 = vadd.f32 %v5652_v41, %v853_v2  ;;  %v1040_v13 = vmax.f32 %v932_v6, 0.0  ;;  %v4510_v2 = vld [vmem:[%s5596_s19 + $0xe8] sm:$0xff] }
 0x10c   : > { %v1009_v5 = vmax.f32 %v854_v4, 0.0 }
 0x10e   : > { %v1071_v7 = vpack.c.bf16 %v1009_v5, %v1008_v3 }
 0x10f   : > { %v933_v8 = vpop.f32.mrf.mxu2 }
 0x110   : > { %v934_v9 = vadd.f32 %v5652_v41, %v933_v8  ;;  %1179 = vmatmul.bf16.gmra.mxu1 %v1071_v7  ;;  %v4376_v8 = vld [vmem:[%s5611_s23 + $0x40] sm:$0xf] }
 0x111   : > { %v856_v12 = vpop.f32.mrf.mxu0 }
 0x112   : > { %v1041_v14 = vmax.f32 %v934_v9, 0.0  ;;  %v857_v16 = vadd.f32 %v5652_v41, %v856_v12  ;;  %v4538_v9 = vld [vmem:[%s5611_s23 + $0x44] sm:$0xf0] }
 0x113   : > { %v4377_v12 = vor.u32 %v4538_v9, %v4376_v8 }
 0x114   : > { %895 = vmatmul.bf16.gmra.mxu0 %v4491_v10  ;;  %975 = vmatmul.bf16.gmra.mxu2 %v4507_v11  ;;  %v1087_v15 = vpack.c.bf16 %v1041_v14, %v1040_v13  ;;  %v1010_v19 = vmax.f32 %v857_v16, 0.0  ;;  %v4537_v10 = vld [vmem:[%s5611_s23 + $0x44] sm:$0xf]  ;;  %v4378_v13 = vld [vmem:[%s5611_s23 + $0x48] sm:$0xf0] }
 0x115   : > { %v4381_v14 = vor.u32 %v4537_v10, %v4378_v13  ;;  %1472 = vmatpush.bf16.msrb.mxu2 %v4377_v12 }
 0x116   : > { %1259 = vmatmul.bf16.gmra.mxu3 %v1087_v15 }
 0x117   : > { %v936_v17 = vpop.f32.mrf.mxu2  ;;  %1641 = vmatpush.bf16.msrb.mxu3 %v4381_v14 }
 0x118   : > { %v937_v22 = vadd.f32 %v5652_v41, %v936_v17 }
 0x119   : > { %v858_v18 = vpop.f32.mrf.mxu0 }
 0x11a   : > { %v859_v20 = vadd.f32 %v5652_v41, %v858_v18  ;;  %v1042_v29 = vmax.f32 %v937_v22, 0.0 }
 0x11c   : > { %v1011_v21 = vmax.f32 %v859_v20, 0.0 }
 0x11e   : > { %v1072_v23 = vpack.c.bf16 %v1011_v21, %v1010_v19 }
 0x11f   : > { %v938_v24 = vpop.f32.mrf.mxu2 }
 0x120   : > { %v939_v25 = vadd.f32 %v5652_v41, %v938_v24  ;;  %1184 = vmatmul.bf16.gmra.mxu1 %v1072_v23  ;;  %v4495_v23 = vld [vmem:[%s5596_s19 + $0x70] sm:$0xff] }
 0x121   : > { %v861_v28 = vpop.f32.mrf.mxu0  ;;  %v4511_v24 = vld [vmem:[%s5596_s19 + $0xf0] sm:$0xff] }
 0x122   : > { %v1043_v30 = vmax.f32 %v939_v25, 0.0  ;;  %v862_v32 = vadd.f32 %v5652_v41, %v861_v28 }
 0x124   : > { %900 = vmatmul.bf16.gmra.mxu0 %v4492_v26  ;;  %980 = vmatmul.bf16.gmra.mxu2 %v4508_v27  ;;  %v1088_v31 = vpack.c.bf16 %v1043_v30, %v1042_v29  ;;  %v1012_v42 = vmax.f32 %v862_v32, 0.0  ;;  %v4368_v30 = vld [vmem:[%s5611_s23 + $0x30] sm:$0xf] }
 0x126   : > { %1264 = vmatmul.bf16.gmra.mxu3 %v1088_v31  ;;  %v4536_v31 = vld [vmem:[%s5611_s23 + $0x34] sm:$0xf0] }
 0x127   : > { %v941_v36 = vpop.f32.mrf.mxu2  ;;  %v4369_v33 = vor.u32 %v4536_v31, %v4368_v30  ;;  %v4362_v30 = vld [vmem:[%s5611_s23 + $0x28] sm:$0xf0] }
 0x128   : > { %v942_v45 = vadd.f32 %v5652_v41, %v941_v36 }
 0x129   : > { %v863_v40 = vpop.f32.mrf.mxu0  ;;  %1473 = vmatpush.bf16.msrb.mxu2 %v4369_v33 }
 0x12a   : > { %v864_v43 = vadd.f32 %v5652_v41, %v863_v40  ;;  %v1044_v52 = vmax.f32 %v942_v45, 0.0  ;;  %v4532_v45 = vld [vmem:[%s5611_s23 + $0x14] sm:$0xf0] }
 0x12c   : > { %v1013_v44 = vmax.f32 %v864_v43, 0.0 }
 0x12d   : > { %1474 = vmatpush.bf16.msrb.mxu2 %v4361_v39 }
 0x12e   : > { %v1073_v46 = vpack.c.bf16 %v1013_v44, %v1012_v42  ;;  %v4352_v44 = vld [vmem:[%s5611_s23 + $0x10] sm:$0xf] }
 0x12f   : > { %v943_v47 = vpop.f32.mrf.mxu2 }
 0x130   : > { %v944_v48 = vadd.f32 %v5652_v41, %v943_v47  ;;  %1189 = vmatmul.bf16.gmra.mxu1 %v1073_v46  ;;  %v4353_v47 = vor.u32 %v4532_v45, %v4352_v44 }
 0x131   : > { %v866_v51 = vpop.f32.mrf.mxu0 }
 0x132   : > { %v1045_v53 = vmax.f32 %v944_v48, 0.0  ;;  %v867_v55 = vadd.f32 %v5652_v41, %v866_v51  ;;  %1475 = vmatpush.bf16.msrb.mxu2 %v4353_v47 }
 0x134   : > { %905 = vmatmul.bf16.gmra.mxu0 %v4493_v49  ;;  %985 = vmatmul.bf16.gmra.mxu2 %v4509_v50  ;;  %v1089_v54 = vpack.c.bf16 %v1045_v53, %v1044_v52  ;;  %v1014_v58 = vmax.f32 %v867_v55, 0.0  ;;  %v4496_v49 = vld [vmem:[%s5596_s19 + $0x78] sm:$0xff]  ;;  %v4530_v55 = vld [vmem:[%s5611_s23 + $0x4] sm:$0xf0] }
 0x135   : > { %v4512_v50 = vld [vmem:[%s5596_s19 + $0xf8] sm:$0xff]  ;;  %s3879_s19 = scalar_lea.sflag [#allocation15], %s5592_s1 }
 0x136   : > { %1269 = vmatmul.bf16.gmra.mxu3 %v1089_v54  ;;  %v4344_v54 = vld [vmem:[%s5611_s23] sm:$0xf] }
 0x137   : > { %v946_v56 = vpop.f32.mrf.mxu2 }
 0x138   : > { %v947_v61 = vadd.f32 %v5652_v41, %v946_v56  ;;  %v4345_v56 = vor.u32 %v4530_v55, %v4344_v54 }
 0x139   : > { %v868_v57 = vpop.f32.mrf.mxu0 }
 0x13a   : > { %v869_v59 = vadd.f32 %v5652_v41, %v868_v57  ;;  %v1046_v4 = vmax.f32 %v947_v61, 0.0  ;;  %1476 = vmatpush.bf16.msrb.mxu2 %v4345_v56 }
 0x13c   : > { %v1015_v60 = vmax.f32 %v869_v59, 0.0  ;;  %v4535_v59 = vld [vmem:[%s5611_s23 + $0x34] sm:$0xf] }
 0x13e   : > { %v1074_v62 = vpack.c.bf16 %v1015_v60, %v1014_v58  ;;  %v4370_v60 = vld [vmem:[%s5611_s23 + $0x38] sm:$0xf0] }
 0x13f   : > { %v948_v63 = vpop.f32.mrf.mxu2 }
 0x140   : > { %v949_v0 = vadd.f32 %v5652_v41, %v948_v63  ;;  %1194 = vmatmul.bf16.gmra.mxu1 %v1074_v62  ;;  %v4373_v62 = vor.u32 %v4535_v59, %v4370_v60 }
 0x141   : > { %v871_v3 = vpop.f32.mrf.mxu0 }
 0x142   : > { %v1047_v5 = vmax.f32 %v949_v0, 0.0  ;;  %v872_v7 = vadd.f32 %v5652_v41, %v871_v3  ;;  %1642 = vmatpush.bf16.msrb.mxu3 %v4373_v62 }
 0x144   : > { %910 = vmatmul.bf16.gmra.mxu0 %v4494_v1  ;;  %990 = vmatmul.bf16.gmra.mxu2 %v4510_v2  ;;  %v1090_v6 = vpack.c.bf16 %v1047_v5, %v1046_v4  ;;  %v1016_v16 = vmax.f32 %v872_v7, 0.0 }
 0x146   : > { %1274 = vmatmul.bf16.gmra.mxu3 %v1090_v6 }
 0x147   : > { %v951_v11 = vpop.f32.mrf.mxu2 }
 0x148   : > { %v952_v19 = vadd.f32 %v5652_v41, %v951_v11 }
 0x149   : > { %v873_v15 = vpop.f32.mrf.mxu0 }
 0x14a   : > { %v874_v17 = vadd.f32 %v5652_v41, %v873_v15  ;;  %v1048_v26 = vmax.f32 %v952_v19, 0.0 }
 0x14c   : > { %v1017_v18 = vmax.f32 %v874_v17, 0.0 }
 0x14e   : > { %v1075_v20 = vpack.c.bf16 %v1017_v18, %v1016_v16 }
 0x14f   : > { %v953_v21 = vpop.f32.mrf.mxu2 }
 0x150   : > { %v954_v22 = vadd.f32 %v5652_v41, %v953_v21  ;;  %1199 = vmatmul.bf16.gmra.mxu1 %v1075_v20 }
 0x151   : > { %v876_v25 = vpop.f32.mrf.mxu0 }
 0x152   : > { %v1049_v27 = vmax.f32 %v954_v22, 0.0  ;;  %v877_v29 = vadd.f32 %v5652_v41, %v876_v25 }
 0x154   : > { %915 = vmatmul.bf16.gmra.mxu0 %v4495_v23  ;;  %995 = vmatmul.bf16.gmra.mxu2 %v4511_v24  ;;  %v1091_v28 = vpack.c.bf16 %v1049_v27, %v1048_v26  ;;  %v1018_v35 = vmax.f32 %v877_v29, 0.0  ;;  %v4533_v29 = vld [vmem:[%s5611_s23 + $0x24] sm:$0xf] }
 0x156   : > { %1279 = vmatmul.bf16.gmra.mxu3 %v1091_v28 }
 0x157   : > { %v956_v32 = vpop.f32.mrf.mxu2 }
 0x158   : > { %v957_v42 = vadd.f32 %v5652_v41, %v956_v32  ;;  %v4365_v32 = vor.u32 %v4533_v29, %v4362_v30 }
 0x159   : > { %v878_v34 = vpop.f32.mrf.mxu0 }
 0x15a   : > { %v879_v36 = vadd.f32 %v5652_v41, %v878_v34  ;;  %v1050_v52 = vmax.f32 %v957_v42, 0.0  ;;  %1643 = vmatpush.bf16.msrb.mxu3 %v4365_v32 }
 0x15c   : > { %v1019_v40 = vmax.f32 %v879_v36, 0.0 }
 0x15e   : > { %v1076_v43 = vpack.c.bf16 %v1019_v40, %v1018_v35 }
 0x15f   : > { %v958_v46 = vpop.f32.mrf.mxu2 }
 0x160   : > { %v959_v48 = vadd.f32 %v5652_v41, %v958_v46  ;;  %1204 = vmatmul.bf16.gmra.mxu1 %v1076_v43 }
 0x161   : > { %v881_v51 = vpop.f32.mrf.mxu0 }
 0x162   : > { %v1051_v53 = vmax.f32 %v959_v48, 0.0  ;;  %v882_v58 = vadd.f32 %v5652_v41, %v881_v51 }
 0x164   : > { %920 = vmatmul.bf16.gmra.mxu0 %v4496_v49  ;;  %1000 = vmatmul.bf16.gmra.mxu2 %v4512_v50  ;;  %v1092_v57 = vpack.c.bf16 %v1051_v53, %v1050_v52  ;;  %v1020_v0 = vmax.f32 %v882_v58, 0.0 }
 0x166   : > { %1284 = vmatmul.bf16.gmra.mxu3 %v1092_v57 }
 0x167   : > { %v961_v61 = vpop.f32.mrf.mxu2 }
 0x168   : > { %v962_v3 = vadd.f32 %v5652_v41, %v961_v61 }
 0x169   : > { %v883_v63 = vpop.f32.mrf.mxu0 }
 0x16a   : > { %v884_v1 = vadd.f32 %v5652_v41, %v883_v63  ;;  %v1052_v8 = vmax.f32 %v962_v3, 0.0 }
 0x16c   : > { %v1021_v2 = vmax.f32 %v884_v1, 0.0 }
 0x16e   : > { %v1077_v4 = vpack.c.bf16 %v1021_v2, %v1020_v0 }
 0x16f   : > { %v963_v5 = vpop.f32.mrf.mxu2 }
 0x170   : > { %v964_v6 = vadd.f32 %v5652_v41, %v963_v5  ;;  %1209 = vmatmul.bf16.gmra.mxu1 %v1077_v4 }
 0x171   : > { %v886_v7 = vpop.f32.mrf.mxu0 }
 0x172   : > { %v1053_v9 = vmax.f32 %v964_v6, 0.0  ;;  %v887_v11 = vadd.f32 %v5652_v41, %v886_v7 }
 0x174   : > { %v1093_v10 = vpack.c.bf16 %v1053_v9, %v1052_v8  ;;  %v1022_v14 = vmax.f32 %v887_v11, 0.0  ;;  %v4531_v9 = vld [vmem:[%s5611_s23 + $0x14] sm:$0xf] }
 0x176   : > { %1289 = vmatmul.bf16.gmra.mxu3 %v1093_v10  ;;  %v4354_v10 = vld [vmem:[%s5611_s23 + $0x18] sm:$0xf0] }
 0x177   : > { %v966_v12 = vpop.f32.mrf.mxu2 }
 0x178   : > { %v967_v18 = vadd.f32 %v5652_v41, %v966_v12  ;;  %v4357_v12 = vor.u32 %v4531_v9, %v4354_v10 }
 0x179   : > { %v888_v13 = vpop.f32.mrf.mxu0 }
 0x17a   : > { %v889_v15 = vadd.f32 %v5652_v41, %v888_v13  ;;  %v1054_v23 = vmax.f32 %v967_v18, 0.0  ;;  %1644 = vmatpush.bf16.msrb.mxu3 %v4357_v12 }
 0x17c   : > { %v1023_v16 = vmax.f32 %v889_v15, 0.0 }
 0x17d   : > { %v1175_v17 = vpop.f32.mrf.mxu1 }
 0x17e   : > { %v1078_v19 = vpack.c.bf16 %v1023_v16, %v1022_v14 }
 0x17f   : > { %v968_v20 = vpop.f32.mrf.mxu2 }
 0x180   : > { %v969_v21 = vadd.f32 %v5652_v41, %v968_v20  ;;  %1214 = vmatmul.bf16.gmra.mxu1 %v1078_v19 }
 0x181   : > { %v891_v22 = vpop.f32.mrf.mxu0 }
 0x182   : > { %v1055_v24 = vmax.f32 %v969_v21, 0.0  ;;  %v892_v27 = vadd.f32 %v5652_v41, %v891_v22 }
 0x184   : > { %v1094_v25 = vpack.c.bf16 %v1055_v24, %v1054_v23  ;;  %v1024_v35 = vmax.f32 %v892_v27, 0.0 }
 0x185   : > { %v1177_v26 = vpop.f32.mrf.mxu1 }
 0x186   : > { %v5727_v28 = vpack.c.bf16 %v1177_v26, %v1175_v17  ;;  %1294 = vmatmul.bf16.gmra.mxu3 %v1094_v25 }
 0x187   : > { %v971_v31 = vpop.f32.mrf.mxu2 }
 0x188   : > { %1477 = vmatmul.bf16.vlgmr.msrb.gmra.mxu2 %v5727_v28  ;;  %v972_v39 = vadd.f32 %v5652_v41, %v971_v31 }
 0x189   : > { %v893_v33 = vpop.f32.mrf.mxu0  ;;  %v1255_v34 = vpop.f32.mrf.mxu3 }
 0x18a   : > { %v894_v36 = vadd.f32 %v5652_v41, %v893_v33  ;;  %v1056_v46 = vmax.f32 %v972_v39, 0.0 }
 0x18c   : > { %v1025_v37 = vmax.f32 %v894_v36, 0.0 }
 0x18d   : > { %v1180_v38 = vpop.f32.mrf.mxu1 }
 0x18e   : > { %v1079_v40 = vpack.c.bf16 %v1025_v37, %v1024_v35 }
 0x18f   : > { %v973_v42 = vpop.f32.mrf.mxu2 }
 0x190   : > { %v974_v43 = vadd.f32 %v5652_v41, %v973_v42  ;;  %1219 = vmatmul.bf16.gmra.mxu1 %v1079_v40 }
 0x191   : > { %v896_v44 = vpop.f32.mrf.mxu0  ;;  %v1257_v45 = vpop.f32.mrf.mxu3 }
 0x192   : > { %v1057_v47 = vmax.f32 %v974_v43, 0.0  ;;  %v5735_v48 = vpack.c.bf16 %v1257_v45, %v1255_v34  ;;  %v897_v51 = vadd.f32 %v5652_v41, %v896_v44 }
 0x194   : > { %v1095_v49 = vpack.c.bf16 %v1057_v47, %v1056_v46  ;;  %v1026_v56 = vmax.f32 %v897_v51, 0.0 }
 0x195   : > { %v1182_v50 = vpop.f32.mrf.mxu1 }
 0x196   : > { %v5738_v52 = vpack.c.bf16 %v1182_v50, %v1180_v38  ;;  %1299 = vmatmul.bf16.gmra.mxu3 %v1095_v49 }
 0x197   : > { %v976_v53 = vpop.f32.mrf.mxu2 }
 0x198   : > { %1482 = vmatmul.bf16.gmra.mxu2 %v5738_v52  ;;  %v977_v60 = vadd.f32 %v5652_v41, %v976_v53 }
 0x199   : > { %v898_v54 = vpop.f32.mrf.mxu0  ;;  %v1260_v55 = vpop.f32.mrf.mxu3 }
 0x19a   : > { %v899_v57 = vadd.f32 %v5652_v41, %v898_v54  ;;  %v1058_v2 = vmax.f32 %v977_v60, 0.0 }
 0x19c   : > { %v1027_v58 = vmax.f32 %v899_v57, 0.0  ;;  %v4346_v57 = vld [vmem:[%s5611_s23 + $0x8] sm:$0xf0] }
 0x19d   : > { %v1185_v59 = vpop.f32.mrf.mxu1 }
 0x19e   : > { %v1080_v61 = vpack.c.bf16 %v1027_v58, %v1026_v56  ;;  %v4529_v56 = vld [vmem:[%s5611_s23 + $0x4] sm:$0xf] }
 0x19f   : > { %v978_v62 = vpop.f32.mrf.mxu2 }
 0x1a0   : > { %v979_v63 = vadd.f32 %v5652_v41, %v978_v62  ;;  %1224 = vmatmul.bf16.gmra.mxu1 %v1080_v61 }
 0x1a1   : > { %v901_v0 = vpop.f32.mrf.mxu0  ;;  %v1262_v1 = vpop.f32.mrf.mxu3 }
 0x1a2   : > { %v1059_v3 = vmax.f32 %v979_v63, 0.0  ;;  %v5744_v4 = vpack.c.bf16 %v1262_v1, %v1260_v55  ;;  %v902_v7 = vadd.f32 %v5652_v41, %v901_v0 }
 0x1a4   : > { %v1096_v5 = vpack.c.bf16 %v1059_v3, %v1058_v2  ;;  %v1028_v15 = vmax.f32 %v902_v7, 0.0 }
 0x1a5   : > { %v1187_v6 = vpop.f32.mrf.mxu1 }
 0x1a6   : > { %v5747_v8 = vpack.c.bf16 %v1187_v6, %v1185_v59  ;;  %1304 = vmatmul.bf16.gmra.mxu3 %v1096_v5  ;;  %v4349_v59 = vor.u32 %v4529_v56, %v4346_v57 }
 0x1a7   : > { %v981_v11 = vpop.f32.mrf.mxu2 }
 0x1a8   : > { %1487 = vmatmul.bf16.gmra.mxu2 %v5747_v8  ;;  %v982_v19 = vadd.f32 %v5652_v41, %v981_v11  ;;  %1645 = vmatpush.bf16.msrb.mxu3 %v4349_v59 }
 0x1a9   : > { %v903_v13 = vpop.f32.mrf.mxu0  ;;  %v1265_v14 = vpop.f32.mrf.mxu3 }
 0x1aa   : > { %v904_v16 = vadd.f32 %v5652_v41, %v903_v13  ;;  %v1060_v25 = vmax.f32 %v982_v19, 0.0 }
 0x1ac   : > { %v1029_v17 = vmax.f32 %v904_v16, 0.0 }
 0x1ad   : > { %v1190_v18 = vpop.f32.mrf.mxu1 }
 0x1ae   : > { %v1081_v20 = vpack.c.bf16 %v1029_v17, %v1028_v15 }
 0x1af   : > { %v983_v21 = vpop.f32.mrf.mxu2 }
 0x1b0   : > { %v984_v22 = vadd.f32 %v5652_v41, %v983_v21  ;;  %1229 = vmatmul.bf16.gmra.mxu1 %v1081_v20 }
 0x1b1   : > { %v906_v23 = vpop.f32.mrf.mxu0  ;;  %v1267_v24 = vpop.f32.mrf.mxu3 }
 0x1b2   : > { %v1061_v26 = vmax.f32 %v984_v22, 0.0  ;;  %v5755_v27 = vpack.c.bf16 %v1267_v24, %v1265_v14  ;;  %v907_v31 = vadd.f32 %v5652_v41, %v906_v23 }
 0x1b4   : > { %v1097_v29 = vpack.c.bf16 %v1061_v26, %v1060_v25  ;;  %v1030_v36 = vmax.f32 %v907_v31, 0.0 }
 0x1b5   : > { %v1192_v30 = vpop.f32.mrf.mxu1 }
 0x1b6   : > { %v5758_v32 = vpack.c.bf16 %v1192_v30, %v1190_v18  ;;  %1309 = vmatmul.bf16.gmra.mxu3 %v1097_v29 }
 0x1b7   : > { %v986_v33 = vpop.f32.mrf.mxu2 }
 0x1b8   : > { %1492 = vmatmul.bf16.gmra.mxu2 %v5758_v32  ;;  %v987_v40 = vadd.f32 %v5652_v41, %v986_v33 }
 0x1b9   : > { %v908_v34 = vpop.f32.mrf.mxu0  ;;  %v1270_v35 = vpop.f32.mrf.mxu3 }
 0x1ba   : > { %v909_v37 = vadd.f32 %v5652_v41, %v908_v34  ;;  %v1062_v47 = vmax.f32 %v987_v40, 0.0 }
 0x1bc   : > { %v1031_v38 = vmax.f32 %v909_v37, 0.0 }
 0x1bd   : > { %v1195_v39 = vpop.f32.mrf.mxu1 }
 0x1be   : > { %v1082_v42 = vpack.c.bf16 %v1031_v38, %v1030_v36 }
 0x1bf   : > { %v988_v43 = vpop.f32.mrf.mxu2 }
 0x1c0   : > { %v989_v44 = vadd.f32 %v5652_v41, %v988_v43  ;;  %1234 = vmatmul.bf16.gmra.mxu1 %v1082_v42 }
 0x1c1   : > { %v911_v45 = vpop.f32.mrf.mxu0  ;;  %v1272_v46 = vpop.f32.mrf.mxu3 }
 0x1c2   : > { %v1063_v49 = vmax.f32 %v989_v44, 0.0  ;;  %v5764_v50 = vpack.c.bf16 %v1272_v46, %v1270_v35  ;;  %v912_v54 = vadd.f32 %v5652_v41, %v911_v45 }
 0x1c4   : > { %v1098_v51 = vpack.c.bf16 %v1063_v49, %v1062_v47  ;;  %v1032_v62 = vmax.f32 %v912_v54, 0.0 }
 0x1c5   : > { %v1197_v53 = vpop.f32.mrf.mxu1 }
 0x1c6   : > { %v5767_v55 = vpack.c.bf16 %v1197_v53, %v1195_v39  ;;  %1314 = vmatmul.bf16.gmra.mxu3 %v1098_v51 }
 0x1c7   : > { %v991_v58 = vpop.f32.mrf.mxu2 }
 0x1c8   : > { %1497 = vmatmul.bf16.gmra.mxu2 %v5767_v55  ;;  %v992_v2 = vadd.f32 %v5652_v41, %v991_v58 }
 0x1c9   : > { %v913_v60 = vpop.f32.mrf.mxu0  ;;  %v1275_v61 = vpop.f32.mrf.mxu3 }
 0x1ca   : > { %v914_v63 = vadd.f32 %v5652_v41, %v913_v60  ;;  %v1064_v10 = vmax.f32 %v992_v2, 0.0 }
 0x1cc   : > { %v1033_v0 = vmax.f32 %v914_v63, 0.0 }
 0x1cd   : > { %v1200_v1 = vpop.f32.mrf.mxu1 }
 0x1ce   : > { %v1083_v3 = vpack.c.bf16 %v1033_v0, %v1032_v62 }
 0x1cf   : > { %v993_v5 = vpop.f32.mrf.mxu2 }
 0x1d0   : > { %v994_v6 = vadd.f32 %v5652_v41, %v993_v5  ;;  %1239 = vmatmul.bf16.gmra.mxu1 %v1083_v3 }
 0x1d1   : > { %v916_v7 = vpop.f32.mrf.mxu0  ;;  %v1277_v9 = vpop.f32.mrf.mxu3 }
 0x1d2   : > { %v1065_v11 = vmax.f32 %v994_v6, 0.0  ;;  %v5775_v12 = vpack.c.bf16 %v1277_v9, %v1275_v61  ;;  %v917_v15 = vadd.f32 %v5652_v41, %v916_v7 }
 0x1d4   : > { %v1099_v13 = vpack.c.bf16 %v1065_v11, %v1064_v10  ;;  %v1034_v20 = vmax.f32 %v917_v15, 0.0 }
 0x1d5   : > { %v1202_v14 = vpop.f32.mrf.mxu1 }
 0x1d6   : > { %v5778_v16 = vpack.c.bf16 %v1202_v14, %v1200_v1  ;;  %1319 = vmatmul.bf16.gmra.mxu3 %v1099_v13 }
 0x1d7   : > { %v996_v17 = vpop.f32.mrf.mxu2 }
 0x1d8   : > { %1502 = vmatmul.bf16.gmra.mxu2 %v5778_v16  ;;  %v997_v24 = vadd.f32 %v5652_v41, %v996_v17 }
 0x1d9   : > { %v918_v18 = vpop.f32.mrf.mxu0  ;;  %v1280_v19 = vpop.f32.mrf.mxu3 }
 0x1da   : > { %v919_v21 = vadd.f32 %v5652_v41, %v918_v18  ;;  %v1066_v33 = vmax.f32 %v997_v24, 0.0 }
 0x1dc   : > { %v1035_v22 = vmax.f32 %v919_v21, 0.0 }
 0x1dd   : > { %v1205_v23 = vpop.f32.mrf.mxu1 }
 0x1de   : > { %v1084_v25 = vpack.c.bf16 %v1035_v22, %v1034_v20 }
 0x1df   : > { %v998_v26 = vpop.f32.mrf.mxu2 }
 0x1e0   : > { %v999_v29 = vadd.f32 %v5652_v41, %v998_v26  ;;  %1244 = vmatmul.bf16.gmra.mxu1 %v1084_v25 }
 0x1e1   : > { %v921_v30 = vpop.f32.mrf.mxu0  ;;  %v1282_v31 = vpop.f32.mrf.mxu3 }
 0x1e2   : > { %v1067_v34 = vmax.f32 %v999_v29, 0.0  ;;  %v5784_v35 = vpack.c.bf16 %v1282_v31, %v1280_v19  ;;  %v922_v38 = vadd.f32 %v5652_v41, %v921_v30 }
 0x1e4   : > { %v1100_v36 = vpack.c.bf16 %v1067_v34, %v1066_v33  ;;  %v1036_v44 = vmax.f32 %v922_v38, 0.0 }
 0x1e5   : > { %v1207_v37 = vpop.f32.mrf.mxu1 }
 0x1e6   : > { %v5787_v39 = vpack.c.bf16 %v1207_v37, %v1205_v23  ;;  %1324 = vmatmul.bf16.gmra.mxu3 %v1100_v36 }
 0x1e7   : > { %v1001_v40 = vpop.f32.mrf.mxu2 }
 0x1e8   : > { %1507 = vmatmul.bf16.gmra.mxu2 %v5787_v39  ;;  %v1002_v49 = vadd.f32 %v5652_v41, %v1001_v40 }
 0x1e9   : > { %v923_v42 = vpop.f32.mrf.mxu0  ;;  %v1285_v43 = vpop.f32.mrf.mxu3 }
 0x1ea   : > { %v924_v45 = vadd.f32 %v5652_v41, %v923_v42  ;;  %v1068_v57 = vmax.f32 %v1002_v49, 0.0 }
 0x1ec   : > { %v1037_v46 = vmax.f32 %v924_v45, 0.0 }
 0x1ed   : > { %v1210_v47 = vpop.f32.mrf.mxu1 }
 0x1ee   : > { %v1085_v51 = vpack.c.bf16 %v1037_v46, %v1036_v44 }
 0x1ef   : > { %v1003_v53 = vpop.f32.mrf.mxu2 }
 0x1f0   : > { %v1004_v54 = vadd.f32 %v5652_v41, %v1003_v53  ;;  %1249 = vmatmul.bf16.gmra.mxu1 %v1085_v51 }
 0x1f1   : > { %v1287_v56 = vpop.f32.mrf.mxu3 }
 0x1f2   : > { %v1069_v58 = vmax.f32 %v1004_v54, 0.0  ;;  %v5793_v59 = vpack.c.bf16 %v1287_v56, %v1285_v43 }
 0x1f4   : > { %v1101_v60 = vpack.c.bf16 %v1069_v58, %v1068_v57 }
 0x1f5   : > { %v1212_v61 = vpop.f32.mrf.mxu1 }
 0x1f6   : > { %v5795_v62 = vpack.c.bf16 %v1212_v61, %v1210_v47  ;;  %1329 = vmatmul.bf16.gmra.mxu3 %v1101_v60 }
 0x1f8   : > { %1512 = vmatmul.bf16.gmra.mxu2 %v5795_v62 }
 0x1f9   : > { %v1290_v63 = vpop.f32.mrf.mxu3 }
 0x1fd   : > { %v1215_v0 = vpop.f32.mrf.mxu1 }
 0x201   : > { %v1292_v1 = vpop.f32.mrf.mxu3 }
 0x202   : > { %v5798_v2 = vpack.c.bf16 %v1292_v1, %v1290_v63 }
 0x205   : > { %v1217_v3 = vpop.f32.mrf.mxu1 }
 0x206   : > { %v5800_v41 = vpack.c.bf16 %v1217_v3, %v1215_v0  ;;  %1646 = vmatmul.bf16.vlgmr.msrb.gmra.mxu3 %v5727_v28 }
 0x208   : > { %1517 = vmatmul.bf16.gmra.mxu2 %v5800_v41 }
 0x209   : > { %v1295_v5 = vpop.f32.mrf.mxu3 }
 0x20b   : > { %v5804_v6 = vpop.f32.mrf.mxu2 }
 0x20d   : > { %v1220_v7 = vpop.f32.mrf.mxu1 }
 0x211   : > { %v1297_v9 = vpop.f32.mrf.mxu3 }
 0x212   : > { %v5806_v10 = vpack.c.bf16 %v1297_v9, %v1295_v5 }
 0x213   : > { %v5808_v11 = vpop.f32.mrf.mxu2 }
 0x214   : > { %7958 = vst [vmem:[#allocation30_spill] sm:$0xff] %v5806_v10 }
 0x215   : > { %v1222_v13 = vpop.f32.mrf.mxu1 }
 0x216   : > { %v5810_v14 = vpack.c.bf16 %v1222_v13, %v1220_v7  ;;  %1651 = vmatmul.bf16.gmra.mxu3 %v5738_v52 }
 0x218   : > { %1522 = vmatmul.bf16.gmra.mxu2 %v5810_v14 }
 0x219   : > { %v1300_v15 = vpop.f32.mrf.mxu3 }
 0x21b   : > { %v5814_v28 = vpop.f32.mrf.mxu2 }
 0x21d   : > { %v1225_v17 = vpop.f32.mrf.mxu1 }
 0x221   : > { %v1302_v18 = vpop.f32.mrf.mxu3 }
 0x222   : > { %v5816_v19 = vpack.c.bf16 %v1302_v18, %v1300_v15  ;;  %v1383_v18 = vld [vmem:[%s5613_s14] sm:$0x3] }
 0x223   : > { %v5818_v20 = vpop.f32.mrf.mxu2 }
 0x225   : > { %v1227_v21 = vpop.f32.mrf.mxu1 }
 0x226   : > { %v5820_v22 = vpack.c.bf16 %v1227_v21, %v1225_v17  ;;  %1656 = vmatmul.bf16.gmra.mxu3 %v5747_v8  ;;  %v5879_v21 = vperm.slane %v1383_v18, 0 }
 0x228   : > { %1527 = vmatmul.bf16.gmra.mxu2 %v5820_v22 }
 0x229   : > { %v1305_v23 = vpop.f32.mrf.mxu3 }
 0x22b   : > { %v5824_v52 = vpop.f32.mrf.mxu2 }
 0x22d   : > { %v1230_v24 = vpop.f32.mrf.mxu1 }
 0x231   : > { %v1307_v25 = vpop.f32.mrf.mxu3 }
 0x232   : > { %v5826_v26 = vpack.c.bf16 %v1307_v25, %v1305_v23  ;;  %v5882_v23 = vperm.slane %v1383_v18, 1  ;;  %v5889_v25 = vadd.f32 %v5804_v6, %v5879_v21 }
 0x233   : > { %v5828_v29 = vpop.f32.mrf.mxu2 }
 0x235   : > { %v1232_v30 = vpop.f32.mrf.mxu1 }
 0x236   : > { %v5830_v31 = vpack.c.bf16 %v1232_v30, %v1230_v24  ;;  %1661 = vmatmul.bf16.gmra.mxu3 %v5758_v32 }
 0x238   : > { %1532 = vmatmul.bf16.gmra.mxu2 %v5830_v31 }
 0x239   : > { %v1310_v33 = vpop.f32.mrf.mxu3 }
 0x23b   : > { %v5834_v8 = vpop.f32.mrf.mxu2 }
 0x23d   : > { %v1235_v34 = vpop.f32.mrf.mxu1 }
 0x241   : > { %v1312_v36 = vpop.f32.mrf.mxu3 }
 0x242   : > { %v5836_v37 = vpack.c.bf16 %v1312_v36, %v1310_v33 }
 0x243   : > { %v5838_v38 = vpop.f32.mrf.mxu2 }
 0x245   : > { %v1237_v40 = vpop.f32.mrf.mxu1 }
 0x246   : > { %v5840_v42 = vpack.c.bf16 %v1237_v40, %v1235_v34  ;;  %1666 = vmatmul.bf16.gmra.mxu3 %v5767_v55 }
 0x248   : > { %1537 = vmatmul.bf16.gmra.mxu2 %v5840_v42 }
 0x249   : > { %v1315_v43 = vpop.f32.mrf.mxu3 }
 0x24b   : > { %v5844_v32 = vpop.f32.mrf.mxu2 }
 0x24d   : > { %v1240_v44 = vpop.f32.mrf.mxu1 }
 0x251   : > { %v1317_v45 = vpop.f32.mrf.mxu3 }
 0x252   : > { %v5846_v46 = vpack.c.bf16 %v1317_v45, %v1315_v43 }
 0x253   : > { %v5848_v47 = vpop.f32.mrf.mxu2 }
 0x255   : > { %v1242_v49 = vpop.f32.mrf.mxu1 }
 0x256   : > { %v5850_v51 = vpack.c.bf16 %v1242_v49, %v1240_v44  ;;  %1671 = vmatmul.bf16.gmra.mxu3 %v5778_v16  ;;  %v5911_v44 = vadd.f32 %v5814_v28, %v5879_v21 }
 0x258   : > { %1542 = vmatmul.bf16.gmra.mxu2 %v5850_v51 }
 0x259   : > { %v1320_v53 = vpop.f32.mrf.mxu3 }
 0x25b   : > { %v5854_v55 = vpop.f32.mrf.mxu2 }
 0x25d   : > { %v1245_v54 = vpop.f32.mrf.mxu1 }
 0x261   : > { %v1322_v56 = vpop.f32.mrf.mxu3 }
 0x262   : > { %v5856_v57 = vpack.c.bf16 %v1322_v56, %v1320_v53 }
 0x263   : > { %v5858_v58 = vpop.f32.mrf.mxu2 }
 0x265   : > { %v1247_v60 = vpop.f32.mrf.mxu1 }
 0x266   : > { %v5860_v61 = vpack.c.bf16 %v1247_v60, %v1245_v54  ;;  %1676 = vmatmul.bf16.gmra.mxu3 %v5787_v39 }
 0x268   : > { %1547 = vmatmul.bf16.gmra.mxu2 %v5860_v61 }
 0x269   : > { %v1325_v16 = vpop.f32.mrf.mxu3 }
 0x26b   : > { %v5864_v63 = vpop.f32.mrf.mxu2 }
 0x26d   : > { %v1250_v0 = vpop.f32.mrf.mxu1 }
 0x271   : > { %v1327_v1 = vpop.f32.mrf.mxu3 }
 0x272   : > { %v5866_v3 = vpack.c.bf16 %v1327_v1, %v1325_v16  ;;  %v5935_v16 = vadd.f32 %v5824_v52, %v5879_v21 }
 0x273   : > { %v5868_v5 = vpop.f32.mrf.mxu2 }
 0x275   : > { %v1252_v7 = vpop.f32.mrf.mxu1 }
 0x276   : > { %v5870_v9 = vpack.c.bf16 %v1252_v7, %v1250_v0  ;;  %1681 = vmatmul.bf16.gmra.mxu3 %v5795_v62 }
 0x278   : > { %1552 = vmatmul.bf16.gmra.mxu2 %v5870_v9 }
 0x279   : > { %v1330_v39 = vpop.f32.mrf.mxu3 }
 0x27b   : > { %v5874_v13 = vpop.f32.mrf.mxu2 }
 0x281   : > { %v1332_v15 = vpop.f32.mrf.mxu3 }
 0x282   : > { %v5876_v17 = vpack.c.bf16 %v1332_v15, %v1330_v39  ;;  %v5956_v15 = vadd.f32 %v5834_v8, %v5879_v21 }
 0x283   : > { %v5884_v24 = vpop.f32.mrf.mxu2 }
 0x284   : > { %7959 = vst [vmem:[#allocation31_spill] sm:$0xff] %v5876_v17 }
 0x286   : > { %1686 = vmatmul.bf16.gmra.mxu3 %v5800_v41  ;;  %v5898_v41 = vadd.f32 %v5808_v11, %v5879_v21 }
 0x288   : > { %1557 = vmatmul.bf16.gmra.mxu2 %v5735_v48 }
 0x289   : > { %v1647_v62 = vpop.f32.mrf.mxu3 }
 0x28a   : > { %v5892_v30 = vadd.f32 %v1647_v62, %v5882_v23 }
 0x28b   : > { %v5900_v36 = vpop.f32.mrf.mxu2 }
 0x28c   : > { %v1807_v33 = vmax.f32 %v5889_v25, %v5892_v30 }
 0x28e   : > { %1808 = vmax.xlane.f32.xlu0 %v1807_v33 }
 0x291   : > { %v1649_v34 = vpop.f32.mrf.mxu3 }
 0x292   : > { %v5903_v40 = vadd.f32 %v1649_v34, %v5882_v23  ;;  %v5968_v34 = vadd.f32 %v5838_v38, %v5879_v21 }
 0x293   : > { %v5916_v45 = vpop.f32.mrf.mxu2 }
 0x294   : > { %v1810_v6 = vmax.f32 %v5898_v41, %v5903_v40 }
 0x296   : > { %1811 = vmax.xlane.f32.xlu0 %v1810_v6  ;;  %1691 = vmatmul.bf16.gmra.mxu3 %v5810_v14  ;;  %v5922_v14 = vadd.f32 %v5818_v20, %v5879_v21 }
 0x298   : > { %1562 = vmatmul.bf16.gmra.mxu2 %v5744_v4 }
 0x299   : > { %v1652_v43 = vpop.f32.mrf.mxu3 }
 0x29a   : > { %v5914_v11 = vadd.f32 %v1652_v43, %v5882_v23 }
 0x29b   : > { %v5929_v56 = vpop.f32.mrf.mxu2 }
 0x29c   : > { %v1813_v49 = vmax.f32 %v5911_v44, %v5914_v11 }
 0x29e   : > { %1814 = vmax.xlane.f32.xlu1 %v1813_v49  ;;  %v5980_v49 = vadd.f32 %v5844_v32, %v5879_v21 }
 0x2a1   : > { %v1654_v53 = vpop.f32.mrf.mxu3 }
 0x2a2   : > { %v5925_v54 = vadd.f32 %v1654_v53, %v5882_v23 }
 0x2a3   : > { %v5942_v1 = vpop.f32.mrf.mxu2 }
 0x2a4   : > { %v1816_v28 = vmax.f32 %v5922_v14, %v5925_v54  ;;  %7960 = vst [vmem:[#allocation32_spill] sm:$0xff] %v5942_v1 }
 0x2a6   : > { %1817 = vmax.xlane.f32.xlu1 %v1816_v28  ;;  %1696 = vmatmul.bf16.gmra.mxu3 %v5820_v22  ;;  %v5946_v22 = vadd.f32 %v5828_v29, %v5879_v21 }
 0x2a8   : > { %1567 = vmatmul.bf16.gmra.mxu2 %v5755_v27 }
 0x2a9   : > { %v1657_v60 = vpop.f32.mrf.mxu3 }
 0x2aa   : > { %v5938_v20 = vadd.f32 %v1657_v60, %v5882_v23 }
 0x2ab   : > { %v5959_v62 = vpop.f32.mrf.mxu2 }
 0x2ac   : > { %v1819_v0 = vmax.f32 %v5935_v16, %v5938_v20  ;;  %7961 = vst [vmem:[#allocation33_spill] sm:$0xff] %v5959_v62 }
 0x2ae   : > { %1820 = vmax.xlane.f32.xlu2 %v1819_v0 }
 0x2b1   : > { %v1659_v7 = vpop.f32.mrf.mxu3 }
 0x2b2   : > { %v5949_v39 = vadd.f32 %v1659_v7, %v5882_v23 }
 0x2b3   : > { %v5973_v6 = vpop.f32.mrf.mxu2 }
 0x2b4   : > { %v1822_v52 = vmax.f32 %v5946_v22, %v5949_v39  ;;  %7962 = vst [vmem:[#allocation34_spill] sm:$0xff] %v5973_v6 }
 0x2b6   : > { %1823 = vmax.xlane.f32.xlu2 %v1822_v52  ;;  %1701 = vmatmul.bf16.gmra.mxu3 %v5830_v31 }
 0x2b8   : > { %1572 = vmatmul.bf16.gmra.mxu2 %v5764_v50 }
 0x2b9   : > { %v1662_v18 = vpop.f32.mrf.mxu3 }
 0x2ba   : > { %v5962_v29 = vadd.f32 %v1662_v18, %v5882_v23 }
 0x2bb   : > { %v5988_v60 = vpop.f32.mrf.mxu2 }
 0x2bc   : > { %v1825_v33 = vmax.f32 %v5956_v15, %v5962_v29  ;;  %7963 = vst [vmem:[#allocation35_spill] sm:$0xff] %v5988_v60 }
 0x2be   : > { %1826 = vmax.xlane.f32.xlu0 %v1825_v33 }
 0x2c1   : > { %v1664_v31 = vpop.f32.mrf.mxu3 }
 0x2c2   : > { %v5971_v8 = vadd.f32 %v1664_v31, %v5882_v23 }
 0x2c4   : > { %v1828_v43 = vmax.f32 %v5968_v34, %v5971_v8 }
 0x2c6   : > { %1829 = vmax.xlane.f32.xlu1 %v1828_v43  ;;  %1706 = vmatmul.bf16.gmra.mxu3 %v5840_v42  ;;  %v5993_v42 = vpop.f32.mrf.mxu2 }
 0x2c7   : > { %7964 = vst [vmem:[#allocation36_spill] sm:$0xff] %v5993_v42 }
 0x2c8   : > { %1577 = vmatmul.bf16.gmra.mxu2 %v5775_v12 }
 0x2c9   : > { %v1667_v38 = vpop.f32.mrf.mxu3 }
 0x2ca   : > { %v5984_v53 = vadd.f32 %v1667_v38, %v5882_v23 }
 0x2cc   : > { %v1831_v28 = vmax.f32 %v5980_v49, %v5984_v53 }
 0x2ce   : > { %1832 = vmax.xlane.f32.xlu1 %v1831_v28  ;;  %v6000_v52 = vpop.f32.mrf.mxu2 }
 0x2cf   : > { %7965 = vst [vmem:[#allocation37_spill] sm:$0xff] %v6000_v52 }
 0x2d1   : > { %v5990_v0 = vpop.f32.mrf.mxu3 }
 0x2d6   : > { %1711 = vmatmul.bf16.gmra.mxu3 %v5850_v51  ;;  %v6006_v33 = vpop.f32.mrf.mxu2 }
 0x2d7   : > { %7966 = vst [vmem:[#allocation38_spill] sm:$0xff] %v6006_v33 }
 0x2d8   : > { %1582 = vmatmul.bf16.gmra.mxu2 %v5784_v35 }
 0x2d9   : > { %v5996_v32 = vpop.f32.mrf.mxu3 }
 0x2de   : > { %v6010_v51 = vpop.f32.mrf.mxu2 }
 0x2df   : > { %7967 = vst [vmem:[#allocation39_spill] sm:$0xff] %v6010_v51 }
 0x2e1   : > { %v5998_v7 = vpop.f32.mrf.mxu3 }
 0x2e6   : > { %1716 = vmatmul.bf16.gmra.mxu3 %v5860_v61  ;;  %v6016_v38 = vpop.f32.mrf.mxu2 }
 0x2e7   : > { %7968 = vst [vmem:[#allocation40_spill] sm:$0xff] %v6016_v38 }
 0x2e8   : > { %1587 = vmatmul.bf16.gmra.mxu2 %v5793_v59 }
 0x2e9   : > { %v6004_v18 = vpop.f32.mrf.mxu3 }
 0x2ee   : > { %v6024_v1 = vpop.f32.mrf.mxu2 }
 0x2f1   : > { %v6008_v31 = vpop.f32.mrf.mxu3 }
 0x2f6   : > { %1721 = vmatmul.bf16.gmra.mxu3 %v5870_v9 }
 0x2f8   : > { %1592 = vmatmul.bf16.gmra.mxu2 %v5798_v2 }
 0x2f9   : > { %v6014_v43 = vpop.f32.mrf.mxu3 }
 0x301   : > { %v1809_v28 = vpop.xlane.xlu0 %1808  ;;  %v6020_v60 = vpop.f32.mrf.mxu3 }
 0x302   : > { %v1999_v61 = vsub.f32 %v5889_v25, %v1809_v28  ;;  %v2000_v52 = vsub.f32 %v5892_v30, %v1809_v28 }
 0x304   : > { %v2127_v42 = vpack.c.bf16 %v2000_v52, %v1999_v61 }
 0x306   : > { %v2191_v33 = vunpack.c.l.bf16 %v2127_v42  ;;  %v2192_v6 = vunpack.c.h.bf16 %v2127_v42  ;;  %1726 = vmatmul.bf16.gmra.mxu3 %v5735_v48 }
 0x308   : > { %v2319_v51 = vmul.f32 1.442695, %v2191_v33  ;;  %v2321_v9 = vmul.f32 1.442695, %v2192_v6  ;;  %1597 = vmatmul.bf16.gmra.mxu2 %v5806_v10 }
 0x309   : > { %v1812_v62 = vpop.xlane.xlu0 %1811  ;;  %v6028_v61 = vpop.f32.mrf.mxu3 }
 0x30a   : > { %4691 = vpow2.f32 %v2319_v51  ;;  %v2001_v38 = vsub.f32 %v5898_v41, %v1812_v62  ;;  %v2002_v25 = vsub.f32 %v5903_v40, %v1812_v62  ;;  %v6034_v40 = vpop.f32.mrf.mxu2 }
 0x30b   : > { %4693 = vpow2.f32 %v2321_v9  ;;  %7969 = vst [vmem:[#allocation41_spill] sm:$0xff] %v6034_v40 }
 0x30c   : > { %v2128_v30 = vpack.c.bf16 %v2002_v25, %v2001_v38 }
 0x30e   : > { %v2193_v52 = vunpack.c.l.bf16 %v2128_v30  ;;  %v2194_v28 = vunpack.c.h.bf16 %v2128_v30 }
 0x310   : > { %v4692_v42 = vpop.eup %4691  ;;  %v2323_v48 = vmul.f32 1.442695, %v2193_v52  ;;  %v2325_v33 = vmul.f32 1.442695, %v2194_v28 }
 0x311   : > { %v4694_v6 = vpop.eup %4693  ;;  %v1815_v17 = vpop.xlane.xlu1 %1814 }
 0x312   : > { %4695 = vpow2.f32 %v2323_v48  ;;  %v2003_v10 = vsub.f32 %v5911_v44, %v1815_v17  ;;  %v2004_v51 = vsub.f32 %v5914_v11, %v1815_v17  ;;  %v6032_v41 = vpack.c.bf16 %v4694_v6, %v4692_v42 }
 0x313   : > { %4697 = vpow2.f32 %v2325_v33  ;;  %v6050_v33 = vadd.f32 %v5848_v47, %v5879_v21  ;;  %v6054_v6 = vadd.f32 %v5990_v0, %v5882_v23 }
 0x314   : > { %v2129_v62 = vpack.c.bf16 %v2004_v51, %v2003_v10  ;;  %v7907_v38 = vunpack.c.l.bf16 %v6032_v41  ;;  %v7906_v9 = vunpack.c.h.bf16 %v6032_v41  ;;  %v6044_v10 = vpop.f32.mrf.mxu3 }
 0x315   : > { %v1834_v0 = vmax.f32 %v6050_v33, %v6054_v6 }
 0x316   : > { %v2195_v25 = vunpack.c.l.bf16 %v2129_v62  ;;  %v2196_v30 = vunpack.c.h.bf16 %v2129_v62  ;;  %1731 = vmatmul.bf16.gmra.mxu3 %v5744_v4  ;;  %v2767_v44 = vadd.f32 %v7906_v9, %v7907_v38  ;;  %v4557_v9 = vld [vmem:[%s5604_s16 + $0x60] sm:$0xff] }
 0x318   : > { %v4696_v17 = vpop.eup %4695  ;;  %v2327_v11 = vmul.f32 1.442695, %v2195_v25  ;;  %v2329_v52 = vmul.f32 1.442695, %v2196_v30  ;;  %1602 = vmatmul.bf16.gmra.mxu2 %v5816_v19  ;;  %2768 = vadd.xlane.f32.xlu2 %v2767_v44  ;;  %v6060_v44 = vpop.f32.mrf.mxu2 }
 0x319   : > { %v4698_v28 = vpop.eup %4697  ;;  %v1818_v42 = vpop.xlane.xlu1 %1817  ;;  %7970 = vst [vmem:[#allocation42_spill] sm:$0xff] %v6060_v44 }
 0x31a   : > { %4699 = vpow2.f32 %v2327_v11  ;;  %v2005_v48 = vsub.f32 %v5922_v14, %v1818_v42  ;;  %v2006_v4 = vsub.f32 %v5925_v54, %v1818_v42  ;;  %v6056_v51 = vpack.c.bf16 %v4698_v28, %v4696_v17 }
 0x31b   : > { %4701 = vpow2.f32 %v2329_v52 }
 0x31c   : > { %v2130_v62 = vpack.c.bf16 %v2006_v4, %v2005_v48  ;;  %v7893_v25 = vunpack.c.l.bf16 %v6056_v51  ;;  %v7890_v30 = vunpack.c.h.bf16 %v6056_v51 }
 0x31e   : > { %v2197_v14 = vunpack.c.l.bf16 %v2130_v62  ;;  %v2198_v54 = vunpack.c.h.bf16 %v2130_v62  ;;  %v2770_v47 = vadd.f32 %v7890_v30, %v7893_v25  ;;  %v6072_v62 = vadd.f32 %v5854_v55, %v5879_v21 }
 0x31f   : > { %v6076_v30 = vadd.f32 %v5996_v32, %v5882_v23 }
 0x320   : > { %v4700_v11 = vpop.eup %4699  ;;  %v2331_v17 = vmul.f32 1.442695, %v2197_v14  ;;  %v2333_v52 = vmul.f32 1.442695, %v2198_v54  ;;  %2771 = vadd.xlane.f32.xlu0 %v2770_v47  ;;  %1835 = vmax.xlane.f32.xlu2 %v1834_v0  ;;  %v6078_v14 = vpop.f32.mrf.mxu3 }
 0x321   : > { %v4702_v28 = vpop.eup %4701  ;;  %v1821_v42 = vpop.xlane.xlu2 %1820  ;;  %v1837_v32 = vmax.f32 %v6072_v62, %v6076_v30 }
 0x322   : > { %4703 = vpow2.f32 %v2331_v17  ;;  %v2007_v48 = vsub.f32 %v5935_v16, %v1821_v42  ;;  %v2008_v4 = vsub.f32 %v5938_v20, %v1821_v42  ;;  %v6080_v54 = vpack.c.bf16 %v4702_v28, %v4700_v11  ;;  %v6091_v11 = vpop.f32.mrf.mxu2 }
 0x323   : > { %4705 = vpow2.f32 %v2333_v52  ;;  %7971 = vst [vmem:[#allocation43_spill] sm:$0xff] %v6091_v11 }
 0x324   : > { %v2131_v47 = vpack.c.bf16 %v2008_v4, %v2007_v48  ;;  %v7892_v0 = vunpack.c.l.bf16 %v6080_v54  ;;  %v7891_v16 = vunpack.c.h.bf16 %v6080_v54 }
 0x326   : > { %v2199_v17 = vunpack.c.l.bf16 %v2131_v47  ;;  %v2200_v20 = vunpack.c.h.bf16 %v2131_v47  ;;  %1736 = vmatmul.bf16.gmra.mxu3 %v5755_v27  ;;  %v2773_v55 = vadd.f32 %v7891_v16, %v7892_v0  ;;  %v6098_v16 = vadd.f32 %v5858_v58, %v5879_v21 }
 0x327   : > { %v6102_v0 = vadd.f32 %v5998_v7, %v5882_v23 }
 0x328   : > { %v4704_v52 = vpop.eup %4703  ;;  %v2335_v28 = vmul.f32 1.442695, %v2199_v17  ;;  %v2337_v42 = vmul.f32 1.442695, %v2200_v20  ;;  %1607 = vmatmul.bf16.gmra.mxu2 %v5826_v26  ;;  %2774 = vadd.xlane.f32.xlu0 %v2773_v55  ;;  %v6106_v55 = vpop.f32.mrf.mxu3 }
 0x329   : > { %v4706_v48 = vpop.eup %4705  ;;  %1838 = vmax.xlane.f32.xlu2 %v1837_v32  ;;  %v1824_v4 = vpop.xlane.xlu2 %1823  ;;  %v1840_v7 = vmax.f32 %v6098_v16, %v6102_v0 }
 0x32a   : > { %4707 = vpow2.f32 %v2335_v28  ;;  %v2009_v27 = vsub.f32 %v5946_v22, %v1824_v4  ;;  %v2010_v47 = vsub.f32 %v5949_v39, %v1824_v4  ;;  %v6104_v17 = vpack.c.bf16 %v4706_v48, %v4704_v52 }
 0x32b   : > { %4709 = vpow2.f32 %v2337_v42 }
 0x32c   : > { %v2132_v20 = vpack.c.bf16 %v2010_v47, %v2009_v27  ;;  %v7895_v32 = vunpack.c.l.bf16 %v6104_v17  ;;  %v7894_v22 = vunpack.c.h.bf16 %v6104_v17  ;;  %v6116_v47 = vpop.f32.mrf.mxu2 }
 0x32d   : > { %7972 = vst [vmem:[#allocation44_spill] sm:$0xff] %v6116_v47 }
 0x32e   : > { %v2201_v28 = vunpack.c.l.bf16 %v2132_v20  ;;  %v2202_v39 = vunpack.c.h.bf16 %v2132_v20  ;;  %v2776_v58 = vadd.f32 %v7894_v22, %v7895_v32  ;;  %v6122_v22 = vadd.f32 %v5864_v63, %v5879_v21 }
 0x32f   : > { %v6126_v32 = vadd.f32 %v6004_v18, %v5882_v23 }
 0x330   : > { %v4708_v42 = vpop.eup %4707  ;;  %v2339_v52 = vmul.f32 1.442695, %v2201_v28  ;;  %v2341_v48 = vmul.f32 1.442695, %v2202_v39  ;;  %2777 = vadd.xlane.f32.xlu1 %v2776_v58  ;;  %1841 = vmax.xlane.f32.xlu0 %v1840_v7 }
 0x331   : > { %v4710_v4 = vpop.eup %4709  ;;  %v1827_v27 = vpop.xlane.xlu0 %1826  ;;  %v1843_v18 = vmax.f32 %v6122_v22, %v6126_v32 }
 0x332   : > { %4711 = vpow2.f32 %v2339_v52  ;;  %v2011_v20 = vsub.f32 %v5956_v15, %v1827_v27  ;;  %v2012_v25 = vsub.f32 %v5962_v29, %v1827_v27  ;;  %v6128_v28 = vpack.c.bf16 %v4710_v4, %v4708_v42  ;;  %v6133_v29 = vpop.f32.mrf.mxu3 }
 0x333   : > { %4713 = vpow2.f32 %v2341_v48 }
 0x334   : > { %v2133_v39 = vpack.c.bf16 %v2012_v25, %v2011_v20  ;;  %v7897_v58 = vunpack.c.l.bf16 %v6128_v28  ;;  %v7896_v7 = vunpack.c.h.bf16 %v6128_v28 }
 0x336   : > { %v2203_v52 = vunpack.c.l.bf16 %v2133_v39  ;;  %v2204_v15 = vunpack.c.h.bf16 %v2133_v39  ;;  %1741 = vmatmul.bf16.gmra.mxu3 %v5764_v50  ;;  %v2779_v63 = vadd.f32 %v7896_v7, %v7897_v58  ;;  %v6146_v39 = vadd.f32 %v5868_v5, %v5879_v21 }
 0x337   : > { %v6150_v7 = vadd.f32 %v6008_v31, %v5882_v23 }
 0x338   : > { %v4712_v42 = vpop.eup %4711  ;;  %v2343_v25 = vmul.f32 1.442695, %v2203_v52  ;;  %v2345_v48 = vmul.f32 1.442695, %v2204_v15  ;;  %1612 = vmatmul.bf16.gmra.mxu2 %v5836_v37  ;;  %2780 = vadd.xlane.f32.xlu1 %v2779_v63  ;;  %v6154_v15 = vpop.f32.mrf.mxu2 }
 0x339   : > { %v4714_v4 = vpop.eup %4713  ;;  %1844 = vmax.xlane.f32.xlu0 %v1843_v18  ;;  %v1830_v27 = vpop.xlane.xlu1 %1829  ;;  %7973 = vst [vmem:[#allocation45_spill] sm:$0xff] %v6154_v15  ;;  %v1846_v31 = vmax.f32 %v6146_v39, %v6150_v7 }
 0x33a   : > { %4715 = vpow2.f32 %v2343_v25  ;;  %v2013_v50 = vsub.f32 %v5968_v34, %v1830_v27  ;;  %v2014_v20 = vsub.f32 %v5971_v8, %v1830_v27  ;;  %v6152_v52 = vpack.c.bf16 %v4714_v4, %v4712_v42  ;;  %v6164_v58 = vpop.f32.mrf.mxu3 }
 0x33b   : > { %4717 = vpow2.f32 %v2345_v48 }
 0x33c   : > { %v2134_v63 = vpack.c.bf16 %v2014_v20, %v2013_v50  ;;  %v7899_v18 = vunpack.c.l.bf16 %v6152_v52  ;;  %v7898_v34 = vunpack.c.h.bf16 %v6152_v52 }
 0x33e   : > { %v2205_v25 = vunpack.c.l.bf16 %v2134_v63  ;;  %v2206_v8 = vunpack.c.h.bf16 %v2134_v63  ;;  %v2782_v5 = vadd.f32 %v7898_v34, %v7899_v18  ;;  %v6170_v34 = vadd.f32 %v5874_v13, %v5879_v21 }
 0x33f   : > { %v6174_v18 = vadd.f32 %v6014_v43, %v5882_v23 }
 0x340   : > { %v4716_v48 = vpop.eup %4715  ;;  %v2347_v42 = vmul.f32 1.442695, %v2205_v25  ;;  %v2349_v4 = vmul.f32 1.442695, %v2206_v8  ;;  %2783 = vadd.xlane.f32.xlu2 %v2782_v5  ;;  %1847 = vmax.xlane.f32.xlu1 %v1846_v31 }
 0x341   : > { %v4718_v27 = vpop.eup %4717  ;;  %v1833_v50 = vpop.xlane.xlu1 %1832  ;;  %v1849_v43 = vmax.f32 %v6170_v34, %v6174_v18 }
 0x342   : > { %4719 = vpow2.f32 %v2347_v42  ;;  %v2015_v20 = vsub.f32 %v5980_v49, %v1833_v50  ;;  %v2016_v63 = vsub.f32 %v5984_v53, %v1833_v50  ;;  %v6176_v25 = vpack.c.bf16 %v4718_v27, %v4716_v48  ;;  %v6180_v42 = vpop.f32.mrf.mxu2 }
 0x343   : > { %4721 = vpow2.f32 %v2349_v4  ;;  %7974 = vst [vmem:[#allocation46_spill] sm:$0xff] %v6180_v42 }
 0x344   : > { %v2135_v8 = vpack.c.bf16 %v2016_v63, %v2015_v20  ;;  %v7905_v5 = vunpack.c.l.bf16 %v6176_v25  ;;  %v7902_v31 = vunpack.c.h.bf16 %v6176_v25  ;;  %v6198_v63 = vadd.f32 %v6020_v60, %v5882_v23 }
 0x346   : > { %v2207_v49 = vunpack.c.l.bf16 %v2135_v8  ;;  %v2208_v53 = vunpack.c.h.bf16 %v2135_v8  ;;  %1746 = vmatmul.bf16.gmra.mxu3 %v5775_v12  ;;  %v2785_v13 = vadd.f32 %v7902_v31, %v7905_v5  ;;  %v6194_v12 = vadd.f32 %v5884_v24, %v5879_v21  ;;  %v6200_v8 = vpop.f32.mrf.mxu3 }
 0x348   : > { %v4720_v48 = vpop.eup %4719  ;;  %v2351_v4 = vmul.f32 1.442695, %v2207_v49  ;;  %v2353_v27 = vmul.f32 1.442695, %v2208_v53  ;;  %1617 = vmatmul.bf16.gmra.mxu2 %v5846_v46  ;;  %2786 = vadd.xlane.f32.xlu2 %v2785_v13  ;;  %v1852_v24 = vmax.f32 %v6194_v12, %v6198_v63 }
 0x349   : > { %v4722_v50 = vpop.eup %4721  ;;  %1850 = vmax.xlane.f32.xlu1 %v1849_v43 }
 0x34a   : > { %4723 = vpow2.f32 %v2351_v4  ;;  %v6190_v20 = vpack.c.bf16 %v4722_v50, %v4720_v48  ;;  %v6210_v48 = vpop.f32.mrf.mxu2  ;;  %v6214_v4 = vadd.f32 %v5900_v36, %v5879_v21 }
 0x34b   : > { %4725 = vpow2.f32 %v2353_v27  ;;  %7975 = vst [vmem:[#allocation47_spill] sm:$0xff] %v6210_v48  ;;  %v6218_v27 = vadd.f32 %v6028_v61, %v5882_v23  ;;  %v6235_v61 = vadd.f32 %v5916_v45, %v5879_v21  ;;  %v7983_v48 = vunpack.c.l.bf16 %v6032_v41 }
 0x34c   : > { %v7901_v49 = vunpack.c.l.bf16 %v6190_v20  ;;  %v7900_v53 = vunpack.c.h.bf16 %v6190_v20 }
 0x34e   : > { %v2788_v13 = vadd.f32 %v7900_v53, %v7901_v49  ;;  %v6224_v31 = vpop.f32.mrf.mxu3 }
 0x350   : > { %v4724_v43 = vpop.eup %4723  ;;  %2789 = vadd.xlane.f32.xlu0 %v2788_v13  ;;  %1853 = vmax.xlane.f32.xlu2 %v1852_v24  ;;  %v1855_v13 = vmax.f32 %v6214_v4, %v6218_v27  ;;  %v6239_v24 = vadd.f32 %v6044_v10, %v5882_v23  ;;  %v6252_v10 = vadd.f32 %v5929_v56, %v5879_v21  ;;  %v4550_v56 = vld [vmem:[%s5604_s16 + $0x28] sm:$0xff] }
 0x351   : > { %v4726_v60 = vpop.eup %4725 }
 0x352   : > { %v6220_v50 = vpack.c.bf16 %v4726_v60, %v4724_v43  ;;  %v1858_v43 = vmax.f32 %v6235_v61, %v6239_v24  ;;  %v4552_v60 = vld [vmem:[%s5604_s16 + $0x38] sm:$0xff] }
 0x353   : > { %3343 = vmatpush.bf16.msrb.mxu0 %v4552_v60  ;;  %v4558_v60 = vld [vmem:[%s5604_s16 + $0x68] sm:$0xff] }
 0x354   : > { %v7904_v53 = vunpack.c.l.bf16 %v6220_v50  ;;  %v7903_v49 = vunpack.c.h.bf16 %v6220_v50 }
 0x356   : > { %1751 = vmatmul.bf16.gmra.mxu3 %v5784_v35  ;;  %v2791_v36 = vadd.f32 %v7903_v49, %v7904_v53  ;;  %v6242_v35 = vpop.f32.mrf.mxu2  ;;  %v4560_v49 = vld [vmem:[%s5604_s16 + $0x78] sm:$0xff]  ;;  %v6248_v45 = vpop.f32.mrf.mxu3  ;;  %v4559_v53 = vld [vmem:[%s5604_s16 + $0x70] sm:$0xff] }
 0x357   : > { %7976 = vst [vmem:[#allocation48_spill] sm:$0xff] %v6242_v35  ;;  %3512 = vmatpush.bf16.msrb.mxu1 %v4560_v49  ;;  %v7981_v35 = vld [vmem:[#allocation30_spill] sm:$0xff] }
 0x358   : > { %2792 = vadd.xlane.f32.xlu0 %v2791_v36  ;;  %1622 = vmatmul.bf16.gmra.mxu2 %v5856_v57  ;;  %v4551_v36 = vld [vmem:[%s5604_s16 + $0x30] sm:$0xff] }
 0x359   : > { %1856 = vmax.xlane.f32.xlu2 %v1855_v13  ;;  %v6256_v13 = vadd.f32 %v6078_v14, %v5882_v23  ;;  %3344 = vmatpush.bf16.msrb.mxu0 %v4551_v36 }
 0x35b   : > { %v1861_v49 = vmax.f32 %v6252_v10, %v6256_v13  ;;  %3513 = vmatpush.bf16.msrb.mxu1 %v4559_v53  ;;  %v4556_v53 = vld [vmem:[%s5604_s16 + $0x58] sm:$0xff] }
 0x35d   : > { %3345 = vmatpush.bf16.msrb.mxu0 %v4550_v56 }
 0x35e   : > { %v6260_v5 = vpop.f32.mrf.mxu2  ;;  %v6268_v14 = vpop.f32.mrf.mxu3 }
 0x35f   : > { %7977 = vst [vmem:[#allocation49_spill] sm:$0xff] %v6260_v5  ;;  %3514 = vmatpush.bf16.msrb.mxu1 %v4558_v60  ;;  %v4555_v5 = vld [vmem:[%s5604_s16 + $0x50] sm:$0xff] }
 0x360   : > { %1859 = vmax.xlane.f32.xlu0 %v1858_v43  ;;  %v4549_v43 = vld [vmem:[%s5604_s16 + $0x20] sm:$0xff]  ;;  %v7980_v60 = vld [vmem:[#allocation31_spill] sm:$0xff] }
 0x361   : > { %3346 = vmatpush.bf16.msrb.mxu0 %v4549_v43  ;;  %v4554_v43 = vld [vmem:[%s5604_s16 + $0x48] sm:$0xff] }
 0x363   : > { %3515 = vmatpush.bf16.msrb.mxu1 %v4557_v9  ;;  %v4546_v9 = vld [vmem:[%s5604_s16 + $0x8] sm:$0xff] }
 0x366   : > { %1756 = vmatmul.bf16.gmra.mxu3 %v5793_v59  ;;  %v6272_v38 = vpop.f32.mrf.mxu2  ;;  %v4548_v59 = vld [vmem:[%s5604_s16 + $0x18] sm:$0xff]  ;;  %v6276_v36 = vpop.f32.mrf.mxu3 }
 0x367   : > { %7978 = vst [vmem:[#allocation50_spill] sm:$0xff] %v6272_v38  ;;  %3347 = vmatpush.bf16.msrb.mxu0 %v4548_v59  ;;  %3516 = vmatpush.bf16.msrb.mxu1 %v4556_v53  ;;  %v4545_v53 = vld [vmem:[%s5604_s16] sm:$0xff] }
 0x368   : > { %1862 = vmax.xlane.f32.xlu0 %v1861_v49  ;;  %1627 = vmatmul.bf16.gmra.mxu2 %v5866_v3  ;;  %v4547_v49 = vld [vmem:[%s5604_s16 + $0x10] sm:$0xff]  ;;  %v4553_v38 = vld [vmem:[%s5604_s16 + $0x40] sm:$0xff] }
 0x36b   : > { %3348 = vmatpush.bf16.msrb.mxu0 %v4547_v49  ;;  %3517 = vmatpush.bf16.msrb.mxu1 %v4555_v5 }
 0x36e   : > { %v6281_v56 = vpop.f32.mrf.mxu2  ;;  %v6286_v59 = vpop.f32.mrf.mxu3 }
 0x36f   : > { %7979 = vst [vmem:[#allocation51_spill] sm:$0xff] %v6281_v56  ;;  %3349 = vmatpush.bf16.msrb.mxu0 %v4546_v9  ;;  %3518 = vmatpush.bf16.msrb.mxu1 %v4554_v43  ;;  %v7984_v43 = vunpack.c.h.bf16 %v6032_v41 }
 0x373   : > { %3350 = vmatpush.bf16.msrb.mxu0 %v4545_v53  ;;  %3519 = vmatpush.bf16.msrb.mxu1 %v4553_v38 }
 0x376   : > { %1761 = vmatmul.bf16.gmra.mxu3 %v5798_v2  ;;  %v6291_v2 = vpop.f32.mrf.mxu3 }
 0x378   : > { %1632 = vmatmul.bf16.gmra.mxu2 %v7980_v60 }
 0x37e   : > { %v6294_v49 = vpop.f32.mrf.mxu3 }
 0x37f   : > { %7982 = vst [vmem:[#allocation31_spill] sm:$0xff] %v6294_v49 }
 0x386   : > { %1766 = vmatmul.bf16.gmra.mxu3 %v7981_v35 }
 0x38b   : > { %v2769_v5 = vpop.xlane.xlu2 %2768 }
 0x38c   : > { %4727 = vrcp.f32 %v2769_v5  ;;  %v6307_v5 = vpop.f32.mrf.mxu3 }
 0x38d   : > { %7985 = vst [vmem:[#allocation30_spill] sm:$0xff] %v6307_v5 }
 0x392   : > { %v4728_v56 = vpop.eup %4727 }
 0x393   : > { %v3023_v9 = vmul.f32 %v4728_v56, %v7983_v48  ;;  %v3024_v42 = vmul.f32 %v4728_v56, %v7984_v43  ;;  %v2772_v15 = vpop.xlane.xlu0 %2771  ;;  %v1836_v47 = vpop.xlane.xlu2 %1835  ;;  %v7987_v43 = vunpack.c.h.bf16 %v6056_v51 }
 0x394   : > { %4729 = vrcp.f32 %v2772_v15  ;;  %v2017_v38 = vsub.f32 %v6050_v33, %v1836_v47  ;;  %v2018_v35 = vsub.f32 %v6054_v6, %v1836_v47  ;;  %v7986_v6 = vunpack.c.l.bf16 %v6056_v51 }
 0x395   : > { %3745 = vst [vmem:[%s6302_s21] sm:$0xff] %v3023_v9 }
 0x396   : > { %1771 = vmatmul.bf16.gmra.mxu3 %v5816_v19  ;;  %3746 = vst [vmem:[%s6302_s21 + $0x8] sm:$0xff] %v3024_v42  ;;  %v2136_v48 = vpack.c.bf16 %v2018_v35, %v2017_v38 }
 0x398   : > { %v2209_v53 = vunpack.c.l.bf16 %v2136_v48  ;;  %v2210_v41 = vunpack.c.h.bf16 %v2136_v48 }
 0x39a   : > { %v4730_v56 = vpop.eup %4729  ;;  %v2355_v15 = vmul.f32 1.442695, %v2209_v53  ;;  %v2357_v33 = vmul.f32 1.442695, %v2210_v41 }
 0x39b   : > { %v3025_v47 = vmul.f32 %v4730_v56, %v7986_v6  ;;  %v3026_v11 = vmul.f32 %v4730_v56, %v7987_v43  ;;  %v2775_v44 = vpop.xlane.xlu0 %2774 }
 0x39c   : > { %v1839_v49 = vpop.xlane.xlu2 %1838  ;;  %4731 = vpow2.f32 %v2355_v15 }
 0x39d   : > { %v2019_v19 = vsub.f32 %v6072_v62, %v1839_v49  ;;  %v2020_v38 = vsub.f32 %v6076_v30, %v1839_v49  ;;  %3747 = vst [vmem:[%s6302_s21 + $0x10] sm:$0xff] %v3025_v47  ;;  %4733 = vpow2.f32 %v2357_v33  ;;  %v3151_v35 = vpack.c.bf16 %v3025_v47, %v3023_v9 }
 0x39e   : > { %v3152_v48 = vpack.c.bf16 %v3026_v11, %v3024_v42  ;;  %3748 = vst [vmem:[%s6302_s21 + $0x18] sm:$0xff] %v3026_v11  ;;  %4735 = vrcp.f32 %v2775_v44  ;;  %v6321_v42 = vpop.f32.mrf.mxu3  ;;  %v7988_v49 = vunpack.c.l.bf16 %v6080_v54  ;;  %v7989_v33 = vunpack.c.h.bf16 %v6080_v54 }
 0x39f   : > { %v2137_v53 = vpack.c.bf16 %v2020_v38, %v2019_v19  ;;  %3351 = vmatmul.bf16.vlgmr.msrb.gmra.mxu0 %v3151_v35 }
 0x3a0   : > { %3520 = vmatmul.bf16.vlgmr.msrb.gmra.mxu1 %v3152_v48 }
 0x3a1   : > { %v2211_v41 = vunpack.c.l.bf16 %v2137_v53  ;;  %v2212_v6 = vunpack.c.h.bf16 %v2137_v53 }
 0x3a2   : > { %v4732_v51 = vpop.eup %4731 }
 0x3a3   : > { %v2359_v56 = vmul.f32 1.442695, %v2211_v41  ;;  %v2361_v43 = vmul.f32 1.442695, %v2212_v6  ;;  %v4734_v5 = vpop.eup %4733  ;;  %v2778_v15 = vpop.xlane.xlu1 %2777 }
 0x3a4   : > { %v1842_v62 = vpop.xlane.xlu0 %1841  ;;  %v4736_v40 = vpop.eup %4735  ;;  %v6319_v44 = vpack.c.bf16 %v4734_v5, %v4732_v51 }
 0x3a5   : > { %4737 = vpow2.f32 %v2359_v56  ;;  %v2021_v30 = vsub.f32 %v6098_v16, %v1842_v62  ;;  %v2022_v11 = vsub.f32 %v6102_v0, %v1842_v62  ;;  %v3027_v9 = vmul.f32 %v4736_v40, %v7988_v49 }
 0x3a6   : > { %4739 = vpow2.f32 %v2361_v43  ;;  %1776 = vmatmul.bf16.gmra.mxu3 %v5826_v26  ;;  %v3028_v47 = vmul.f32 %v4736_v40, %v7989_v33  ;;  %v2657_v16 = vunpack.c.l.bf16 %v6319_v44  ;;  %v2658_v38 = vunpack.c.h.bf16 %v6319_v44 }
 0x3a7   : > { %4741 = vrcp.f32 %v2778_v15  ;;  %v2138_v19 = vpack.c.bf16 %v2022_v11, %v2021_v30  ;;  %3749 = vst [vmem:[%s6302_s21 + $0x20] sm:$0xff] %v3027_v9  ;;  %v7990_v15 = vunpack.c.l.bf16 %v6104_v17  ;;  %v7991_v30 = vunpack.c.h.bf16 %v6104_v17 }
 0x3a8   : > { %v2794_v26 = vadd.f32 %v2658_v38, %v2657_v16  ;;  %3750 = vst [vmem:[%s6302_s21 + $0x28] sm:$0xff] %v3028_v47 }
 0x3a9   : > { %v2213_v0 = vunpack.c.l.bf16 %v2138_v19  ;;  %v2214_v5 = vunpack.c.h.bf16 %v2138_v19 }
 0x3aa   : > { %2795 = vadd.xlane.f32.xlu1 %v2794_v26 }
 0x3ab   : > { %v4738_v35 = vpop.eup %4737  ;;  %v2363_v48 = vmul.f32 1.442695, %v2213_v0  ;;  %v2365_v53 = vmul.f32 1.442695, %v2214_v5  ;;  %v2781_v54 = vpop.xlane.xlu1 %2780 }
 0x3ac   : > { %v4740_v40 = vpop.eup %4739  ;;  %v1845_v41 = vpop.xlane.xlu0 %1844 }
 0x3ad   : > { %v4742_v6 = vpop.eup %4741  ;;  %4743 = vpow2.f32 %v2363_v48  ;;  %v2023_v51 = vsub.f32 %v6122_v22, %v1845_v41  ;;  %v2024_v56 = vsub.f32 %v6126_v32, %v1845_v41  ;;  %v6338_v43 = vpack.c.bf16 %v4740_v40, %v4738_v35  ;;  %v6346_v0 = vpop.f32.mrf.mxu3 }
 0x3ae   : > { %4745 = vpow2.f32 %v2365_v53  ;;  %v3029_v62 = vmul.f32 %v4742_v6, %v7990_v15  ;;  %v3030_v11 = vmul.f32 %v4742_v6, %v7991_v30  ;;  %v7993_v30 = vunpack.c.l.bf16 %v6128_v28 }
 0x3af   : > { %4747 = vrcp.f32 %v2781_v54  ;;  %v2139_v49 = vpack.c.bf16 %v2024_v56, %v2023_v51  ;;  %v2659_v33 = vunpack.c.l.bf16 %v6338_v43  ;;  %v2660_v19 = vunpack.c.h.bf16 %v6338_v43  ;;  %v7992_v54 = vld [vmem:[#allocation32_spill] sm:$0xff] }
 0x3b0   : > { %v3153_v22 = vpack.c.bf16 %v3029_v62, %v3027_v9  ;;  %3751 = vst [vmem:[%s6302_s21 + $0x30] sm:$0xff] %v3029_v62  ;;  %v3154_v32 = vpack.c.bf16 %v3030_v11, %v3028_v47  ;;  %v6356_v9 = vadd.f32 %v7992_v54, %v5879_v21  ;;  %v6360_v47 = vadd.f32 %v6106_v55, %v5882_v23 }
 0x3b1   : > { %v2215_v5 = vunpack.c.l.bf16 %v2139_v49  ;;  %v2216_v26 = vunpack.c.h.bf16 %v2139_v49  ;;  %3752 = vst [vmem:[%s6302_s21 + $0x38] sm:$0xff] %v3030_v11  ;;  %v2797_v17 = vadd.f32 %v2660_v19, %v2659_v33  ;;  %v7994_v55 = vunpack.c.h.bf16 %v6128_v28 }
 0x3b2   : > { %3356 = vmatmul.bf16.gmra.mxu0 %v3153_v22  ;;  %3525 = vmatmul.bf16.gmra.mxu1 %v3154_v32 }
 0x3b3   : > { %v4744_v35 = vpop.eup %4743  ;;  %v2367_v48 = vmul.f32 1.442695, %v2215_v5  ;;  %v2369_v53 = vmul.f32 1.442695, %v2216_v26  ;;  %2798 = vadd.xlane.f32.xlu1 %v2797_v17  ;;  %v2784_v41 = vpop.xlane.xlu2 %2783  ;;  %v1864_v26 = vmax.f32 %v6356_v9, %v6360_v47 }
 0x3b4   : > { %v4746_v40 = vpop.eup %4745  ;;  %v1848_v6 = vpop.xlane.xlu1 %1847 }
 0x3b5   : > { %v4748_v51 = vpop.eup %4747  ;;  %4749 = vpow2.f32 %v2367_v48  ;;  %v2025_v56 = vsub.f32 %v6146_v39, %v1848_v6  ;;  %v2026_v15 = vsub.f32 %v6150_v7, %v1848_v6  ;;  %v6364_v62 = vpack.c.bf16 %v4746_v40, %v4744_v35  ;;  %v6381_v28 = vpop.f32.mrf.mxu3  ;;  %v7995_v40 = vld [vmem:[#allocation33_spill] sm:$0xff] }
 0x3b6   : > { %4751 = vpow2.f32 %v2369_v53  ;;  %1781 = vmatmul.bf16.gmra.mxu3 %v5836_v37  ;;  %v3031_v11 = vmul.f32 %v4748_v51, %v7993_v30  ;;  %v3032_v49 = vmul.f32 %v4748_v51, %v7994_v55  ;;  %v6385_v54 = vadd.f32 %v7995_v40, %v5879_v21 }
 0x3b7   : > { %4753 = vrcp.f32 %v2784_v41  ;;  %v2140_v22 = vpack.c.bf16 %v2026_v15, %v2025_v56  ;;  %v2661_v32 = vunpack.c.l.bf16 %v6364_v62  ;;  %v7908_v39 = vunpack.c.h.bf16 %v6364_v62 }
 0x3b8   : > { %3753 = vst [vmem:[%s6302_s21 + $0x40] sm:$0xff] %v3031_v11  ;;  %v6389_v41 = vadd.f32 %v6133_v29, %v5882_v23 }
 0x3b9   : > { %v2217_v5 = vunpack.c.l.bf16 %v2140_v22  ;;  %v2218_v7 = vunpack.c.h.bf16 %v2140_v22  ;;  %v2800_v37 = vadd.f32 %v7908_v39, %v2661_v32  ;;  %3754 = vst [vmem:[%s6302_s21 + $0x48] sm:$0xff] %v3032_v49  ;;  %v7996_v22 = vunpack.c.l.bf16 %v6152_v52 }
 0x3bb   : > { %v4750_v17 = vpop.eup %4749  ;;  %v2371_v35 = vmul.f32 1.442695, %v2217_v5  ;;  %v2373_v48 = vmul.f32 1.442695, %v2218_v7  ;;  %2801 = vadd.xlane.f32.xlu2 %v2800_v37  ;;  %1865 = vmax.xlane.f32.xlu1 %v1864_v26  ;;  %v2787_v6 = vpop.xlane.xlu2 %2786  ;;  %v7997_v7 = vunpack.c.h.bf16 %v6152_v52  ;;  %v1867_v52 = vmax.f32 %v6385_v54, %v6389_v41 }
 0x3bc   : > { %v4752_v53 = vpop.eup %4751  ;;  %v1851_v51 = vpop.xlane.xlu1 %1850 }
 0x3bd   : > { %v4754_v56 = vpop.eup %4753  ;;  %4755 = vpow2.f32 %v2371_v35  ;;  %v2027_v15 = vsub.f32 %v6170_v34, %v1851_v51  ;;  %v2028_v30 = vsub.f32 %v6174_v18, %v1851_v51  ;;  %v6393_v55 = vpack.c.bf16 %v4752_v53, %v4750_v17  ;;  %v7998_v51 = vld [vmem:[#allocation34_spill] sm:$0xff] }
 0x3be   : > { %4757 = vpow2.f32 %v2373_v48  ;;  %v3033_v5 = vmul.f32 %v4754_v56, %v7996_v22  ;;  %v3034_v29 = vmul.f32 %v4754_v56, %v7997_v7  ;;  %v6411_v56 = vadd.f32 %v7998_v51, %v5879_v21 }
 0x3bf   : > { %4759 = vrcp.f32 %v2787_v6  ;;  %v2141_v37 = vpack.c.bf16 %v2028_v30, %v2027_v15  ;;  %v2663_v26 = vunpack.c.l.bf16 %v6393_v55  ;;  %v2664_v35 = vunpack.c.h.bf16 %v6393_v55  ;;  %v6417_v30 = vpop.f32.mrf.mxu3 }
 0x3c0   : > { %v3155_v40 = vpack.c.bf16 %v3033_v5, %v3031_v11  ;;  %3755 = vst [vmem:[%s6302_s21 + $0x50] sm:$0xff] %v3033_v5  ;;  %v3156_v34 = vpack.c.bf16 %v3034_v29, %v3032_v49  ;;  %v6415_v15 = vadd.f32 %v6164_v58, %v5882_v23  ;;  %v7999_v58 = vunpack.c.l.bf16 %v6176_v25 }
 0x3c1   : > { %v2219_v39 = vunpack.c.l.bf16 %v2141_v37  ;;  %v2220_v18 = vunpack.c.h.bf16 %v2141_v37  ;;  %3756 = vst [vmem:[%s6302_s21 + $0x58] sm:$0xff] %v3034_v29  ;;  %v2803_v17 = vadd.f32 %v2664_v35, %v2663_v26  ;;  %v8001_v51 = vunpack.c.l.bf16 %v6190_v20 }
 0x3c2   : > { %3361 = vmatmul.bf16.gmra.mxu0 %v3155_v40  ;;  %3530 = vmatmul.bf16.gmra.mxu1 %v3156_v34  ;;  %v8000_v40 = vunpack.c.h.bf16 %v6176_v25 }
 0x3c3   : > { %v4756_v48 = vpop.eup %4755  ;;  %v2375_v53 = vmul.f32 1.442695, %v2219_v39  ;;  %v2377_v6 = vmul.f32 1.442695, %v2220_v18  ;;  %2804 = vadd.xlane.f32.xlu2 %v2803_v17  ;;  %1868 = vmax.xlane.f32.xlu1 %v1867_v52  ;;  %v2790_v11 = vpop.xlane.xlu0 %2789 }
 0x3c4   : > { %v4758_v49 = vpop.eup %4757  ;;  %4761 = vrcp.f32 %v2790_v11  ;;  %v1854_v22 = vpop.xlane.xlu2 %1853 }
 0x3c5   : > { %v4760_v5 = vpop.eup %4759  ;;  %4763 = vpow2.f32 %v2375_v53  ;;  %v2029_v39 = vsub.f32 %v6194_v12, %v1854_v22  ;;  %v2030_v7 = vsub.f32 %v6198_v63, %v1854_v22  ;;  %v6421_v29 = vpack.c.bf16 %v4758_v49, %v4756_v48 }
 0x3c6   : > { %4765 = vpow2.f32 %v2377_v6  ;;  %1786 = vmatmul.bf16.gmra.mxu3 %v5846_v46  ;;  %v3035_v37 = vmul.f32 %v4760_v5, %v7999_v58  ;;  %v3036_v34 = vmul.f32 %v4760_v5, %v8000_v40  ;;  %v1870_v46 = vmax.f32 %v6411_v56, %v6415_v15  ;;  %v8003_v58 = vld [vmem:[#allocation35_spill] sm:$0xff] }
 0x3c7   : > { %v2142_v18 = vpack.c.bf16 %v2030_v7, %v2029_v39  ;;  %v2665_v17 = vunpack.c.l.bf16 %v6421_v29  ;;  %v2666_v52 = vunpack.c.h.bf16 %v6421_v29  ;;  %v8002_v5 = vunpack.c.h.bf16 %v6190_v20 }
 0x3c8   : > { %3757 = vst [vmem:[%s6302_s21 + $0x60] sm:$0xff] %v3035_v37  ;;  %v6444_v40 = vadd.f32 %v8003_v58, %v5879_v21 }
 0x3c9   : > { %v2221_v12 = vunpack.c.l.bf16 %v2142_v18  ;;  %v2222_v53 = vunpack.c.h.bf16 %v2142_v18  ;;  %v2806_v63 = vadd.f32 %v2666_v52, %v2665_v17  ;;  %3758 = vst [vmem:[%s6302_s21 + $0x68] sm:$0xff] %v3036_v34 }
 0x3ca   : > { %v4762_v48 = vpop.eup %4761 }
 0x3cb   : > { %v4764_v25 = vpop.eup %4763  ;;  %v2379_v6 = vmul.f32 1.442695, %v2221_v12  ;;  %v2381_v11 = vmul.f32 1.442695, %v2222_v53  ;;  %2807 = vadd.xlane.f32.xlu0 %v2806_v63  ;;  %1871 = vmax.xlane.f32.xlu2 %v1870_v46  ;;  %v2793_v49 = vpop.xlane.xlu0 %2792  ;;  %v3037_v22 = vmul.f32 %v4762_v48, %v8001_v51  ;;  %v3038_v39 = vmul.f32 %v4762_v48, %v8002_v5 }
 0x3cc   : > { %v4766_v7 = vpop.eup %4765  ;;  %4767 = vrcp.f32 %v2793_v49  ;;  %v1857_v18 = vpop.xlane.xlu2 %1856  ;;  %v6448_v12 = vadd.f32 %v6200_v8, %v5882_v23 }
 0x3cd   : > { %4769 = vpow2.f32 %v2379_v6  ;;  %v2031_v53 = vsub.f32 %v6214_v4, %v1857_v18  ;;  %v2032_v63 = vsub.f32 %v6218_v27, %v1857_v18  ;;  %3759 = vst [vmem:[%s6302_s21 + $0x70] sm:$0xff] %v3037_v22  ;;  %v6453_v46 = vpop.f32.mrf.mxu3  ;;  %v3157_v20 = vpack.c.bf16 %v3037_v22, %v3035_v37 }
 0x3ce   : > { %4771 = vpow2.f32 %v2381_v11  ;;  %v3158_v48 = vpack.c.bf16 %v3038_v39, %v3036_v34  ;;  %3760 = vst [vmem:[%s6302_s21 + $0x78] sm:$0xff] %v3038_v39  ;;  %v6456_v51 = vpack.c.bf16 %v4766_v7, %v4764_v25  ;;  %v1873_v4 = vmax.f32 %v6444_v40, %v6448_v12 }
 0x3cf   : > { %v2143_v49 = vpack.c.bf16 %v2032_v63, %v2031_v53  ;;  %v8004_v39 = vunpack.c.l.bf16 %v6220_v50  ;;  %v8005_v18 = vunpack.c.h.bf16 %v6220_v50  ;;  %v6486_v50 = vadd.f32 %v6224_v31, %v5882_v23 }
 0x3d0   : > { %v2667_v5 = vunpack.c.l.bf16 %v6456_v51  ;;  %v7917_v8 = vunpack.c.h.bf16 %v6456_v51 }
 0x3d1   : > { %v2223_v58 = vunpack.c.l.bf16 %v2143_v49  ;;  %v2224_v6 = vunpack.c.h.bf16 %v2143_v49 }
 0x3d2   : > { %v4768_v27 = vpop.eup %4767  ;;  %3366 = vmatmul.bf16.gmra.mxu0 %v3157_v20  ;;  %3535 = vmatmul.bf16.gmra.mxu1 %v3158_v48  ;;  %v2809_v37 = vadd.f32 %v7917_v8, %v2667_v5 }
 0x3d3   : > { %v4770_v34 = vpop.eup %4769  ;;  %v2383_v25 = vmul.f32 1.442695, %v2223_v58  ;;  %v2385_v11 = vmul.f32 1.442695, %v2224_v6  ;;  %1874 = vmax.xlane.f32.xlu2 %v1873_v4  ;;  %v1860_v22 = vpop.xlane.xlu0 %1859  ;;  %v6468_v7 = vmul.f32 %v4768_v27, %v8004_v39  ;;  %v6472_v53 = vmul.f32 %v4768_v27, %v8005_v18  ;;  %v8006_v58 = vld [vmem:[#allocation36_spill] sm:$0xff] }
 0x3d4   : > { %v4772_v63 = vpop.eup %4771  ;;  %2810 = vadd.xlane.f32.xlu0 %v2809_v37  ;;  %v2033_v20 = vsub.f32 %v6235_v61, %v1860_v22  ;;  %v2034_v48 = vsub.f32 %v6239_v24, %v1860_v22  ;;  %v6482_v6 = vadd.f32 %v8006_v58, %v5879_v21  ;;  %v8007_v58 = vld [vmem:[#allocation37_spill] sm:$0xff] }
 0x3d5   : > { %4773 = vpow2.f32 %v2383_v25  ;;  %v6476_v49 = vpack.c.bf16 %v4772_v63, %v4770_v34  ;;  %3761 = vst [vmem:[%s6302_s21 + $0x80] sm:$0xff] %v6468_v7  ;;  %v6493_v27 = vpop.f32.mrf.mxu3 }
 0x3d6   : > { %4775 = vpow2.f32 %v2385_v11  ;;  %v2144_v4 = vpack.c.bf16 %v2034_v48, %v2033_v20  ;;  %1791 = vmatmul.bf16.gmra.mxu3 %v5856_v57  ;;  %3762 = vst [vmem:[%s6302_s21 + $0x88] sm:$0xff] %v6472_v53  ;;  %v1876_v57 = vmax.f32 %v6482_v6, %v6486_v50 }
 0x3d7   : > { %v7916_v61 = vunpack.c.l.bf16 %v6476_v49  ;;  %v7915_v24 = vunpack.c.h.bf16 %v6476_v49 }
 0x3d8   : > { %v2225_v37 = vunpack.c.l.bf16 %v2144_v4  ;;  %v2226_v34 = vunpack.c.h.bf16 %v2144_v4  ;;  %v6507_v4 = vadd.f32 %v8007_v58, %v5879_v21  ;;  %v8008_v58 = vld [vmem:[#allocation38_spill] sm:$0xff] }
 0x3d9   : > { %v2812_v31 = vadd.f32 %v7915_v24, %v7916_v61 }
 0x3da   : > { %v2387_v25 = vmul.f32 1.442695, %v2225_v37  ;;  %v2389_v11 = vmul.f32 1.442695, %v2226_v34  ;;  %v6511_v37 = vadd.f32 %v6248_v45, %v5882_v23 }
 0x3db   : > { %v4774_v22 = vpop.eup %4773  ;;  %2813 = vadd.xlane.f32.xlu1 %v2812_v31  ;;  %v1863_v39 = vpop.xlane.xlu0 %1862 }
 0x3dc   : > { %v4776_v18 = vpop.eup %4775  ;;  %4777 = vpow2.f32 %v2387_v25  ;;  %1877 = vmax.xlane.f32.xlu0 %v1876_v57  ;;  %v2035_v63 = vsub.f32 %v6252_v10, %v1863_v39  ;;  %v2036_v20 = vsub.f32 %v6256_v13, %v1863_v39  ;;  %v1879_v45 = vmax.f32 %v6507_v4, %v6511_v37 }
 0x3dd   : > { %4779 = vpow2.f32 %v2389_v11  ;;  %v6503_v48 = vpack.c.bf16 %v4776_v18, %v4774_v22  ;;  %v6519_v22 = vpop.f32.mrf.mxu3 }
 0x3de   : > { %v2145_v34 = vpack.c.bf16 %v2036_v20, %v2035_v63 }
 0x3df   : > { %v7912_v31 = vunpack.c.l.bf16 %v6503_v48  ;;  %v7909_v25 = vunpack.c.h.bf16 %v6503_v48 }
 0x3e0   : > { %v2227_v57 = vunpack.c.l.bf16 %v2145_v34  ;;  %v2228_v10 = vunpack.c.h.bf16 %v2145_v34  ;;  %v6527_v34 = vadd.f32 %v8008_v58, %v5879_v21 }
 0x3e1   : > { %v2815_v13 = vadd.f32 %v7909_v25, %v7912_v31  ;;  %v6531_v25 = vadd.f32 %v6268_v14, %v5882_v23  ;;  %v8009_v14 = vld [vmem:[#allocation39_spill] sm:$0xff] }
 0x3e2   : > { %v4778_v11 = vpop.eup %4777  ;;  %v2391_v39 = vmul.f32 1.442695, %v2227_v57  ;;  %v2393_v18 = vmul.f32 1.442695, %v2228_v10 }
 0x3e3   : > { %v4780_v63 = vpop.eup %4779  ;;  %2816 = vadd.xlane.f32.xlu1 %v2815_v13 }
 0x3e4   : > { %4781 = vpow2.f32 %v2391_v39  ;;  %1880 = vmax.xlane.f32.xlu0 %v1879_v45  ;;  %v6523_v20 = vpack.c.bf16 %v4780_v63, %v4778_v11  ;;  %v1882_v11 = vmax.f32 %v6527_v34, %v6531_v25 }
 0x3e5   : > { %4783 = vpow2.f32 %v2393_v18  ;;  %v6544_v18 = vadd.f32 %v8009_v14, %v5879_v21  ;;  %v6550_v63 = vpop.f32.mrf.mxu3 }
 0x3e6   : > { %1796 = vmatmul.bf16.gmra.mxu3 %v5866_v3  ;;  %v7911_v57 = vunpack.c.l.bf16 %v6523_v20  ;;  %v7910_v10 = vunpack.c.h.bf16 %v6523_v20  ;;  %v6548_v3 = vadd.f32 %v6276_v36, %v5882_v23  ;;  %v8010_v36 = vld [vmem:[#allocation40_spill] sm:$0xff] }
 0x3e8   : > { %v2818_v13 = vadd.f32 %v7910_v10, %v7911_v57 }
 0x3ea   : > { %v4782_v39 = vpop.eup %4781  ;;  %2819 = vadd.xlane.f32.xlu2 %v2818_v13  ;;  %v1885_v13 = vmax.f32 %v6544_v18, %v6548_v3 }
 0x3eb   : > { %v4784_v45 = vpop.eup %4783  ;;  %1883 = vmax.xlane.f32.xlu1 %v1882_v11  ;;  %v6564_v11 = vadd.f32 %v8010_v36, %v5879_v21  ;;  %v6581_v36 = vadd.f32 %v6291_v2, %v5882_v23 }
 0x3ec   : > { %v6552_v58 = vpack.c.bf16 %v4784_v45, %v4782_v39  ;;  %v6568_v39 = vadd.f32 %v6286_v59, %v5882_v23 }
 0x3ed   : > { %v6570_v45 = vpop.f32.mrf.mxu3 }
 0x3ee   : > { %v7914_v10 = vunpack.c.l.bf16 %v6552_v58  ;;  %v7913_v57 = vunpack.c.h.bf16 %v6552_v58  ;;  %v1888_v31 = vmax.f32 %v6564_v11, %v6568_v39 }
 0x3f0   : > { %v2821_v14 = vadd.f32 %v7913_v57, %v7914_v10  ;;  %v6577_v57 = vadd.f32 %v6024_v1, %v5879_v21 }
 0x3f2   : > { %2822 = vadd.xlane.f32.xlu2 %v2821_v14  ;;  %v1891_v59 = vmax.f32 %v6577_v57, %v6581_v36 }
 0x3f3   : > { %1886 = vmax.xlane.f32.xlu1 %v1885_v13 }
 0x3f6   : > { %1801 = vmatmul.bf16.gmra.mxu3 %v7980_v60 }
 0x3fa   : > { %1889 = vmax.xlane.f32.xlu2 %v1888_v31 }
 0x402   : > { %1892 = vmax.xlane.f32.xlu2 %v1891_v59 }
 0x41c   : > { %v3352_v13 = vpop.f32.mrf.mxu0 }
 0x41d   : > { %v3521_v14 = vpop.f32.mrf.mxu1  ;;  %v2796_v60 = vpop.xlane.xlu1 %2795 }
 0x41e   : > { %v3522_v10 = vadd.f32 %v3521_v14, %v3352_v13  ;;  %4785 = vrcp.f32 %v2796_v60 }
 0x420   : > { %3681 = vst [vmem:[%s6586_s27] sm:$0xff] %v3522_v10 }
 0x424   : > { %v4786_v1 = vpop.eup %4785  ;;  %v3354_v2 = vpop.f32.mrf.mxu0 }
 0x425   : > { %v3523_v31 = vpop.f32.mrf.mxu1  ;;  %v3041_v59 = vmul.f32 %v4786_v1, %v2657_v16  ;;  %v3042_v8 = vmul.f32 %v4786_v1, %v2658_v38 }
 0x426   : > { %v2799_v24 = vpop.xlane.xlu1 %2798  ;;  %v3524_v61 = vadd.f32 %v3523_v31, %v3354_v2 }
 0x427   : > { %4787 = vrcp.f32 %v2799_v24  ;;  %v3159_v13 = vpack.c.bf16 %v3041_v59, %v6468_v7  ;;  %v3160_v14 = vpack.c.bf16 %v3042_v8, %v6472_v53  ;;  %3763 = vst [vmem:[%s6302_s21 + $0x90] sm:$0xff] %v3041_v59 }
 0x428   : > { %3682 = vst [vmem:[%s6586_s27 + $0x8] sm:$0xff] %v3524_v61 }
 0x429   : > { %3371 = vmatmul.bf16.gmra.mxu0 %v3159_v13  ;;  %3540 = vmatmul.bf16.gmra.mxu1 %v3160_v14  ;;  %3764 = vst [vmem:[%s6302_s21 + $0x98] sm:$0xff] %v3042_v8 }
 0x42d   : > { %v4788_v10 = vpop.eup %4787 }
 0x42e   : > { %v2802_v60 = vpop.xlane.xlu2 %2801  ;;  %v1866_v2 = vpop.xlane.xlu1 %1865  ;;  %v3043_v44 = vmul.f32 %v4788_v10, %v2659_v33  ;;  %v3044_v16 = vmul.f32 %v4788_v10, %v2660_v19 }
 0x42f   : > { %v3357_v38 = vpop.f32.mrf.mxu0  ;;  %4789 = vrcp.f32 %v2802_v60  ;;  %v2037_v7 = vsub.f32 %v6356_v9, %v1866_v2  ;;  %v2038_v53 = vsub.f32 %v6360_v47, %v1866_v2  ;;  %v3526_v61 = vpop.f32.mrf.mxu1  ;;  %v8011_v47 = vunpack.c.h.bf16 %v6364_v62 }
 0x430   : > { %v3527_v24 = vadd.f32 %v3526_v61, %v3357_v38  ;;  %3765 = vst [vmem:[%s6302_s21 + $0xa0] sm:$0xff] %v3043_v44 }
 0x431   : > { %v2146_v1 = vpack.c.bf16 %v2038_v53, %v2037_v7  ;;  %3766 = vst [vmem:[%s6302_s21 + $0xa8] sm:$0xff] %v3044_v16 }
 0x432   : > { %3683 = vst [vmem:[%s6586_s27 + $0x10] sm:$0xff] %v3527_v24 }
 0x433   : > { %v2229_v8 = vunpack.c.l.bf16 %v2146_v1  ;;  %v2230_v31 = vunpack.c.h.bf16 %v2146_v1 }
 0x435   : > { %v4790_v59 = vpop.eup %4789  ;;  %v2395_v33 = vmul.f32 1.442695, %v2229_v8  ;;  %v2397_v13 = vmul.f32 1.442695, %v2230_v31 }
 0x436   : > { %v2805_v43 = vpop.xlane.xlu2 %2804  ;;  %v1869_v19 = vpop.xlane.xlu1 %1868  ;;  %v3045_v9 = vmul.f32 %v4790_v59, %v2661_v32  ;;  %v3046_v14 = vmul.f32 %v4790_v59, %v8011_v47 }
 0x437   : > { %4791 = vpow2.f32 %v2395_v33  ;;  %v3359_v10 = vpop.f32.mrf.mxu0  ;;  %v2039_v60 = vsub.f32 %v6385_v54, %v1869_v19  ;;  %v2040_v2 = vsub.f32 %v6389_v41, %v1869_v19  ;;  %v3528_v38 = vpop.f32.mrf.mxu1 }
 0x438   : > { %4793 = vpow2.f32 %v2397_v13  ;;  %v3529_v7 = vadd.f32 %v3528_v38, %v3359_v10  ;;  %v3161_v53 = vpack.c.bf16 %v3045_v9, %v3043_v44  ;;  %3767 = vst [vmem:[%s6302_s21 + $0xb0] sm:$0xff] %v3045_v9  ;;  %v3162_v61 = vpack.c.bf16 %v3046_v14, %v3044_v16 }
 0x439   : > { %4795 = vrcp.f32 %v2805_v43  ;;  %v2147_v24 = vpack.c.bf16 %v2040_v2, %v2039_v60  ;;  %3768 = vst [vmem:[%s6302_s21 + $0xb8] sm:$0xff] %v3046_v14 }
 0x43a   : > { %3684 = vst [vmem:[%s6586_s27 + $0x18] sm:$0xff] %v3529_v7  ;;  %3376 = vmatmul.bf16.gmra.mxu0 %v3161_v53  ;;  %3545 = vmatmul.bf16.gmra.mxu1 %v3162_v61 }
 0x43b   : > { %v2231_v62 = vunpack.c.l.bf16 %v2147_v24  ;;  %v2232_v32 = vunpack.c.h.bf16 %v2147_v24 }
 0x43d   : > { %v4792_v1 = vpop.eup %4791  ;;  %v2399_v8 = vmul.f32 1.442695, %v2231_v62  ;;  %v2401_v31 = vmul.f32 1.442695, %v2232_v32 }
 0x43e   : > { %v4794_v54 = vpop.eup %4793  ;;  %v2808_v59 = vpop.xlane.xlu0 %2807 }
 0x43f   : > { %v1872_v41 = vpop.xlane.xlu2 %1871  ;;  %v4796_v33 = vpop.eup %4795  ;;  %4797 = vpow2.f32 %v2399_v8  ;;  %v6618_v19 = vpack.c.bf16 %v4794_v54, %v4792_v1 }
 0x440   : > { %v3362_v44 = vpop.f32.mrf.mxu0  ;;  %v2041_v16 = vsub.f32 %v6411_v56, %v1872_v41  ;;  %v2042_v13 = vsub.f32 %v6415_v15, %v1872_v41  ;;  %v3531_v43 = vpop.f32.mrf.mxu1  ;;  %4799 = vpow2.f32 %v2401_v31  ;;  %v3047_v47 = vmul.f32 %v4796_v33, %v2663_v26 }
 0x441   : > { %v3532_v9 = vadd.f32 %v3531_v43, %v3362_v44  ;;  %v3048_v14 = vmul.f32 %v4796_v33, %v2664_v35  ;;  %4801 = vrcp.f32 %v2808_v59  ;;  %v2677_v60 = vunpack.c.l.bf16 %v6618_v19 }
 0x442   : > { %v2148_v10 = vpack.c.bf16 %v2042_v13, %v2041_v16  ;;  %v2678_v56 = vunpack.c.h.bf16 %v6618_v19  ;;  %3769 = vst [vmem:[%s6302_s21 + $0xc0] sm:$0xff] %v3047_v47 }
 0x443   : > { %3685 = vst [vmem:[%s6586_s27 + $0x20] sm:$0xff] %v3532_v9 }
 0x444   : > { %v2233_v15 = vunpack.c.l.bf16 %v2148_v10  ;;  %v2234_v2 = vunpack.c.h.bf16 %v2148_v10  ;;  %v2824_v38 = vadd.f32 %v2678_v56, %v2677_v60  ;;  %3770 = vst [vmem:[%s6302_s21 + $0xc8] sm:$0xff] %v3048_v14 }
 0x445   : > { %v4798_v26 = vpop.eup %4797 }
 0x446   : > { %v2403_v7 = vmul.f32 1.442695, %v2233_v15  ;;  %v2405_v55 = vmul.f32 1.442695, %v2234_v2  ;;  %2825 = vadd.xlane.f32.xlu0 %v2824_v38  ;;  %v4800_v35 = vpop.eup %4799  ;;  %v8012_v15 = vld [vmem:[#allocation41_spill] sm:$0xff]  ;;  %v8013_v38 = vld [vmem:[#allocation31_spill] sm:$0xff] }
 0x447   : > { %v1875_v53 = vpop.xlane.xlu2 %1874  ;;  %v4802_v61 = vpop.eup %4801  ;;  %v6635_v8 = vpack.c.bf16 %v4800_v35, %v4798_v26  ;;  %v6652_v2 = vadd.f32 %v8012_v15, %v5879_v21  ;;  %v6656_v26 = vadd.f32 %v8013_v38, %v5882_v23 }
 0x448   : > { %4803 = vpow2.f32 %v2403_v7  ;;  %v3364_v24 = vpop.f32.mrf.mxu0  ;;  %v2811_v62 = vpop.xlane.xlu0 %2810  ;;  %v2043_v32 = vsub.f32 %v6444_v40, %v1875_v53  ;;  %v2044_v1 = vsub.f32 %v6448_v12, %v1875_v53  ;;  %v3049_v54 = vmul.f32 %v4802_v61, %v2665_v17 }
 0x449   : > { %4805 = vpow2.f32 %v2405_v55  ;;  %v3533_v31 = vpop.f32.mrf.mxu1  ;;  %v3050_v59 = vmul.f32 %v4802_v61, %v2666_v52  ;;  %v2679_v44 = vunpack.c.l.bf16 %v6635_v8  ;;  %v2680_v16 = vunpack.c.h.bf16 %v6635_v8 }
 0x44a   : > { %4807 = vrcp.f32 %v2811_v62  ;;  %v2149_v41 = vpack.c.bf16 %v2044_v1, %v2043_v32  ;;  %v3534_v33 = vadd.f32 %v3533_v31, %v3364_v24  ;;  %v3163_v40 = vpack.c.bf16 %v3049_v54, %v3047_v47  ;;  %3771 = vst [vmem:[%s6302_s21 + $0xd0] sm:$0xff] %v3049_v54 }
 0x44b   : > { %v3164_v12 = vpack.c.bf16 %v3050_v59, %v3048_v14  ;;  %3772 = vst [vmem:[%s6302_s21 + $0xd8] sm:$0xff] %v3050_v59  ;;  %v2827_v29 = vadd.f32 %v2680_v16, %v2679_v44  ;;  %v8014_v59 = vunpack.c.h.bf16 %v6456_v51 }
 0x44c   : > { %v2235_v13 = vunpack.c.l.bf16 %v2149_v41  ;;  %v2236_v43 = vunpack.c.h.bf16 %v2149_v41  ;;  %3686 = vst [vmem:[%s6586_s27 + $0x28] sm:$0xff] %v3534_v33  ;;  %3381 = vmatmul.bf16.gmra.mxu0 %v3163_v40 }
 0x44d   : > { %3550 = vmatmul.bf16.gmra.mxu1 %v3164_v12 }
 0x44e   : > { %v4804_v17 = vpop.eup %4803  ;;  %v2407_v52 = vmul.f32 1.442695, %v2235_v13  ;;  %v2409_v9 = vmul.f32 1.442695, %v2236_v43  ;;  %2828 = vadd.xlane.f32.xlu0 %v2827_v29  ;;  %v2814_v47 = vpop.xlane.xlu1 %2813 }
 0x44f   : > { %v4806_v10 = vpop.eup %4805 }
 0x450   : > { %v4808_v14 = vpop.eup %4807  ;;  %4809 = vpow2.f32 %v2407_v52  ;;  %v3367_v7 = vpop.f32.mrf.mxu0  ;;  %v6658_v35 = vpack.c.bf16 %v4806_v10, %v4804_v17  ;;  %v8015_v17 = vld [vmem:[#allocation42_spill] sm:$0xff] }
 0x451   : > { %v1878_v55 = vpop.xlane.xlu0 %1877  ;;  %4811 = vpow2.f32 %v2409_v9  ;;  %v3536_v24 = vpop.f32.mrf.mxu1  ;;  %v3051_v62 = vmul.f32 %v4808_v14, %v2667_v5  ;;  %v3052_v41 = vmul.f32 %v4808_v14, %v8014_v59  ;;  %v1894_v5 = vmax.f32 %v6652_v2, %v6656_v26  ;;  %v8016_v9 = vld [vmem:[#allocation30_spill] sm:$0xff] }
 0x452   : > { %v2045_v53 = vsub.f32 %v6482_v6, %v1878_v55  ;;  %v2046_v61 = vsub.f32 %v6486_v50, %v1878_v55  ;;  %4813 = vrcp.f32 %v2814_v47  ;;  %v3537_v32 = vadd.f32 %v3536_v24, %v3367_v7 }
 0x453   : > { %v2681_v1 = vunpack.c.l.bf16 %v6658_v35  ;;  %v2682_v31 = vunpack.c.h.bf16 %v6658_v35  ;;  %3773 = vst [vmem:[%s6302_s21 + $0xe0] sm:$0xff] %v3051_v62  ;;  %v6679_v52 = vadd.f32 %v8015_v17, %v5879_v21  ;;  %v6683_v10 = vadd.f32 %v8016_v9, %v5882_v23 }
 0x454   : > { %v2150_v54 = vpack.c.bf16 %v2046_v61, %v2045_v53  ;;  %3687 = vst [vmem:[%s6586_s27 + $0x30] sm:$0xff] %v3537_v32  ;;  %v8017_v53 = vunpack.c.l.bf16 %v6476_v49  ;;  %v8018_v32 = vunpack.c.h.bf16 %v6476_v49 }
 0x455   : > { %v2830_v6 = vadd.f32 %v2682_v31, %v2681_v1  ;;  %3774 = vst [vmem:[%s6302_s21 + $0xe8] sm:$0xff] %v3052_v41  ;;  %v1897_v49 = vmax.f32 %v6679_v52, %v6683_v10 }
 0x456   : > { %v2237_v50 = vunpack.c.l.bf16 %v2150_v54  ;;  %v2238_v33 = vunpack.c.h.bf16 %v2150_v54  ;;  %v4810_v40 = vpop.eup %4809  ;;  %1895 = vmax.xlane.f32.xlu0 %v1894_v5  ;;  %v2817_v51 = vpop.xlane.xlu1 %2816 }
 0x457   : > { %2831 = vadd.xlane.f32.xlu1 %v2830_v6  ;;  %v4812_v12 = vpop.eup %4811  ;;  %4815 = vrcp.f32 %v2817_v51 }
 0x458   : > { %v2411_v13 = vmul.f32 1.442695, %v2237_v50  ;;  %v2413_v43 = vmul.f32 1.442695, %v2238_v33  ;;  %v4814_v29 = vpop.eup %4813  ;;  %v3369_v47 = vpop.f32.mrf.mxu0  ;;  %v6685_v15 = vpack.c.bf16 %v4812_v12, %v4810_v40 }
 0x459   : > { %v1881_v14 = vpop.xlane.xlu0 %1880  ;;  %v3538_v55 = vpop.f32.mrf.mxu1  ;;  %v3053_v61 = vmul.f32 %v4814_v29, %v8017_v53  ;;  %v3054_v54 = vmul.f32 %v4814_v29, %v8018_v32  ;;  %v8019_v29 = vunpack.c.l.bf16 %v6503_v48 }
 0x45a   : > { %4817 = vpow2.f32 %v2411_v13  ;;  %v2047_v38 = vsub.f32 %v6507_v4, %v1881_v14  ;;  %v2048_v7 = vsub.f32 %v6511_v37, %v1881_v14  ;;  %v3539_v24 = vadd.f32 %v3538_v55, %v3369_v47  ;;  %v8021_v55 = vld [vmem:[#allocation43_spill] sm:$0xff] }
 0x45b   : > { %4819 = vpow2.f32 %v2413_v43  ;;  %v2683_v59 = vunpack.c.l.bf16 %v6685_v15  ;;  %v3165_v50 = vpack.c.bf16 %v3053_v61, %v3051_v62  ;;  %3775 = vst [vmem:[%s6302_s21 + $0xf0] sm:$0xff] %v3053_v61  ;;  %v2684_v33 = vunpack.c.h.bf16 %v6685_v15 }
 0x45c   : > { %v2151_v6 = vpack.c.bf16 %v2048_v7, %v2047_v38  ;;  %3688 = vst [vmem:[%s6586_s27 + $0x38] sm:$0xff] %v3539_v24  ;;  %v3166_v4 = vpack.c.bf16 %v3054_v54, %v3052_v41  ;;  %v8020_v38 = vunpack.c.h.bf16 %v6503_v48  ;;  %v6712_v53 = vadd.f32 %v8021_v55, %v5879_v21  ;;  %v8024_v55 = vld [vmem:[#allocation44_spill] sm:$0xff] }
 0x45d   : > { %3386 = vmatmul.bf16.gmra.mxu0 %v3165_v50  ;;  %3776 = vst [vmem:[%s6302_s21 + $0xf8] sm:$0xff] %v3054_v54  ;;  %v2833_v40 = vadd.f32 %v2684_v33, %v2683_v59  ;;  %v4816_v12 = vpop.eup %4815  ;;  %v2820_v62 = vpop.xlane.xlu2 %2819  ;;  %v6716_v61 = vadd.f32 %v6321_v42, %v5882_v23 }
 0x45e   : > { %v2239_v37 = vunpack.c.l.bf16 %v2151_v6  ;;  %v2240_v5 = vunpack.c.h.bf16 %v2151_v6  ;;  %3555 = vmatmul.bf16.gmra.mxu1 %v3166_v4  ;;  %1898 = vmax.xlane.f32.xlu0 %v1897_v49  ;;  %4821 = vrcp.f32 %v2820_v62  ;;  %v1884_v41 = vpop.xlane.xlu1 %1883  ;;  %v3055_v17 = vmul.f32 %v4816_v12, %v8019_v29 }
 0x45f   : > { %2834 = vadd.xlane.f32.xlu1 %v2833_v40  ;;  %v2049_v47 = vsub.f32 %v6527_v34, %v1884_v41  ;;  %v2050_v14 = vsub.f32 %v6531_v25, %v1884_v41  ;;  %v3056_v7 = vmul.f32 %v4816_v12, %v8020_v38  ;;  %v1900_v50 = vmax.f32 %v6712_v53, %v6716_v61 }
 0x460   : > { %v4818_v13 = vpop.eup %4817  ;;  %v2415_v43 = vmul.f32 1.442695, %v2239_v37  ;;  %v2417_v51 = vmul.f32 1.442695, %v2240_v5  ;;  %3777 = vst [vmem:[%s6302_s21 + $0x100] sm:$0xff] %v3055_v17  ;;  %v8022_v40 = vunpack.c.l.bf16 %v6523_v20  ;;  %v8023_v12 = vunpack.c.h.bf16 %v6523_v20 }
 0x461   : > { %v4820_v9 = vpop.eup %4819  ;;  %v2152_v32 = vpack.c.bf16 %v2050_v14, %v2049_v47  ;;  %3778 = vst [vmem:[%s6302_s21 + $0x108] sm:$0xff] %v3056_v7 }
 0x462   : > { %4823 = vpow2.f32 %v2415_v43  ;;  %v6718_v24 = vpack.c.bf16 %v4820_v9, %v4818_v13  ;;  %v6739_v9 = vadd.f32 %v6346_v0, %v5882_v23 }
 0x463   : > { %4825 = vpow2.f32 %v2417_v51  ;;  %v2241_v34 = vunpack.c.l.bf16 %v2152_v32  ;;  %v2242_v54 = vunpack.c.h.bf16 %v2152_v32  ;;  %v6746_v32 = vadd.f32 %v8024_v55, %v5879_v21 }
 0x464   : > { %v2685_v25 = vunpack.c.l.bf16 %v6718_v24  ;;  %v2686_v48 = vunpack.c.h.bf16 %v6718_v24  ;;  %v4822_v6 = vpop.eup %4821 }
 0x465   : > { %v2419_v4 = vmul.f32 1.442695, %v2241_v34  ;;  %v2421_v37 = vmul.f32 1.442695, %v2242_v54  ;;  %v2823_v5 = vpop.xlane.xlu2 %2822  ;;  %v3057_v49 = vmul.f32 %v4822_v6, %v8022_v40  ;;  %v3058_v62 = vmul.f32 %v4822_v6, %v8023_v12 }
 0x466   : > { %v2836_v42 = vadd.f32 %v2686_v48, %v2685_v25  ;;  %4827 = vrcp.f32 %v2823_v5  ;;  %v1887_v43 = vpop.xlane.xlu1 %1886  ;;  %v8026_v40 = vunpack.c.h.bf16 %v6552_v58 }
 0x467   : > { %1901 = vmax.xlane.f32.xlu1 %v1900_v50  ;;  %4829 = vpow2.f32 %v2419_v4  ;;  %v2051_v41 = vsub.f32 %v6544_v18, %v1887_v43  ;;  %v2052_v29 = vsub.f32 %v6548_v3, %v1887_v43  ;;  %3779 = vst [vmem:[%s6302_s21 + $0x110] sm:$0xff] %v3057_v49  ;;  %v3167_v47 = vpack.c.bf16 %v3057_v49, %v3055_v17 }
 0x468   : > { %v4824_v13 = vpop.eup %4823  ;;  %2837 = vadd.xlane.f32.xlu2 %v2836_v42  ;;  %4831 = vpow2.f32 %v2421_v37  ;;  %3780 = vst [vmem:[%s6302_s21 + $0x118] sm:$0xff] %v3058_v62  ;;  %v3168_v38 = vpack.c.bf16 %v3058_v62, %v3056_v7  ;;  %v1903_v17 = vmax.f32 %v6746_v32, %v6739_v9  ;;  %v8025_v37 = vunpack.c.l.bf16 %v6552_v58 }
 0x469   : > { %v4826_v51 = vpop.eup %4825  ;;  %v2153_v14 = vpack.c.bf16 %v2052_v29, %v2051_v41 }
 0x46a   : > { %v6742_v20 = vpack.c.bf16 %v4826_v51, %v4824_v13  ;;  %v6772_v51 = vadd.f32 %v6381_v28, %v5882_v23 }
 0x46b   : > { %v2243_v34 = vunpack.c.l.bf16 %v2153_v14  ;;  %v2244_v54 = vunpack.c.h.bf16 %v2153_v14 }
 0x46c   : > { %v2687_v18 = vunpack.c.l.bf16 %v6742_v20  ;;  %v2688_v3 = vunpack.c.h.bf16 %v6742_v20  ;;  %v4828_v6 = vpop.eup %4827 }
 0x46d   : > { %3391 = vmatmul.bf16.gmra.mxu0 %v3167_v47  ;;  %v4830_v7 = vpop.eup %4829  ;;  %v2423_v42 = vmul.f32 1.442695, %v2243_v34  ;;  %v2425_v50 = vmul.f32 1.442695, %v2244_v54  ;;  %v1890_v4 = vpop.xlane.xlu2 %1889  ;;  %v6758_v5 = vmul.f32 %v4828_v6, %v8025_v37  ;;  %v6762_v49 = vmul.f32 %v4828_v6, %v8026_v40 }
 0x46e   : > { %v2839_v0 = vadd.f32 %v2688_v3, %v2687_v18  ;;  %3560 = vmatmul.bf16.gmra.mxu1 %v3168_v38  ;;  %v4832_v12 = vpop.eup %4831  ;;  %v2053_v62 = vsub.f32 %v6564_v11, %v1890_v4  ;;  %v2054_v13 = vsub.f32 %v6568_v39, %v1890_v4  ;;  %v8027_v11 = vld [vmem:[#allocation45_spill] sm:$0xff] }
 0x46f   : > { %1904 = vmax.xlane.f32.xlu1 %v1903_v17  ;;  %4833 = vpow2.f32 %v2423_v42  ;;  %v6766_v43 = vpack.c.bf16 %v4832_v12, %v4830_v7  ;;  %3781 = vst [vmem:[%s6302_s21 + $0x120] sm:$0xff] %v6758_v5  ;;  %v6780_v39 = vadd.f32 %v8027_v11, %v5879_v21  ;;  %v8028_v12 = vld [vmem:[#allocation46_spill] sm:$0xff] }
 0x470   : > { %2840 = vadd.xlane.f32.xlu2 %v2839_v0  ;;  %4835 = vpow2.f32 %v2425_v50  ;;  %v2154_v58 = vpack.c.bf16 %v2054_v13, %v2053_v62  ;;  %3782 = vst [vmem:[%s6302_s21 + $0x128] sm:$0xff] %v6762_v49  ;;  %v6794_v50 = vadd.f32 %v6417_v30, %v5882_v23  ;;  %v6800_v62 = vadd.f32 %v8028_v12, %v5879_v21 }
 0x471   : > { %v2689_v41 = vunpack.c.l.bf16 %v6766_v43  ;;  %v2690_v29 = vunpack.c.h.bf16 %v6766_v43  ;;  %v1906_v34 = vmax.f32 %v6780_v39, %v6772_v51  ;;  %v6830_v12 = vadd.f32 %v6493_v27, %v5882_v23 }
 0x472   : > { %v2245_v47 = vunpack.c.l.bf16 %v2154_v58  ;;  %v2246_v14 = vunpack.c.h.bf16 %v2154_v58  ;;  %v6846_v27 = vadd.f32 %v6519_v22, %v5882_v23 }
 0x473   : > { %v2842_v28 = vadd.f32 %v2690_v29, %v2689_v41 }
 0x474   : > { %v2427_v38 = vmul.f32 1.442695, %v2245_v47  ;;  %v2429_v55 = vmul.f32 1.442695, %v2246_v14  ;;  %v1909_v47 = vmax.f32 %v6800_v62, %v6794_v50 }
 0x475   : > { %v4834_v54 = vpop.eup %4833  ;;  %2843 = vadd.xlane.f32.xlu0 %v2842_v28  ;;  %v1893_v6 = vpop.xlane.xlu2 %1892 }
 0x476   : > { %v4836_v0 = vpop.eup %4835  ;;  %4837 = vpow2.f32 %v2427_v38  ;;  %v2055_v17 = vsub.f32 %v6577_v57, %v1893_v6  ;;  %v2056_v7 = vsub.f32 %v6581_v36, %v1893_v6  ;;  %v6812_v38 = vadd.f32 %v6453_v46, %v5882_v23 }
 0x477   : > { %4839 = vpow2.f32 %v2429_v55  ;;  %v6790_v42 = vpack.c.bf16 %v4836_v0, %v4834_v54  ;;  %v8029_v54 = vld [vmem:[#allocation47_spill] sm:$0xff] }
 0x478   : > { %1907 = vmax.xlane.f32.xlu2 %v1906_v34  ;;  %v2155_v4 = vpack.c.bf16 %v2056_v7, %v2055_v17  ;;  %v6818_v6 = vadd.f32 %v8029_v54, %v5879_v21 }
 0x479   : > { %v2691_v37 = vunpack.c.l.bf16 %v6790_v42  ;;  %v7922_v40 = vunpack.c.h.bf16 %v6790_v42 }
 0x47a   : > { %v2247_v13 = vunpack.c.l.bf16 %v2155_v4  ;;  %v2248_v57 = vunpack.c.h.bf16 %v2155_v4  ;;  %v1912_v17 = vmax.f32 %v6818_v6, %v6812_v38 }
 0x47b   : > { %v2845_v36 = vadd.f32 %v7922_v40, %v2691_v37 }
 0x47c   : > { %v4838_v58 = vpop.eup %4837  ;;  %v2431_v11 = vmul.f32 1.442695, %v2247_v13  ;;  %v2433_v30 = vmul.f32 1.442695, %v2248_v57 }
 0x47d   : > { %v4840_v14 = vpop.eup %4839  ;;  %2846 = vadd.xlane.f32.xlu0 %v2845_v36  ;;  %v8030_v36 = vld [vmem:[#allocation48_spill] sm:$0xff] }
 0x47e   : > { %4841 = vpow2.f32 %v2431_v11  ;;  %v6808_v28 = vpack.c.bf16 %v4840_v14, %v4838_v58  ;;  %v6836_v58 = vadd.f32 %v8030_v36, %v5879_v21 }
 0x47f   : > { %4843 = vpow2.f32 %v2433_v30 }
 0x480   : > { %1910 = vmax.xlane.f32.xlu2 %v1909_v47  ;;  %v7921_v55 = vunpack.c.l.bf16 %v6808_v28  ;;  %v7920_v34 = vunpack.c.h.bf16 %v6808_v28  ;;  %v1915_v30 = vmax.f32 %v6836_v58, %v6830_v12  ;;  %v8031_v47 = vld [vmem:[#allocation49_spill] sm:$0xff] }
 0x481   : > { %v6850_v14 = vadd.f32 %v8031_v47, %v5879_v21 }
 0x482   : > { %v2848_v0 = vadd.f32 %v7920_v34, %v7921_v55 }
 0x483   : > { %v1918_v54 = vmax.f32 %v6850_v14, %v6846_v27 }
 0x484   : > { %v4842_v7 = vpop.eup %4841  ;;  %2849 = vadd.xlane.f32.xlu1 %v2848_v0  ;;  %v6856_v0 = vadd.f32 %v6550_v63, %v5882_v23 }
 0x485   : > { %v4844_v46 = vpop.eup %4843  ;;  %1913 = vmax.xlane.f32.xlu0 %v1912_v17  ;;  %v8032_v17 = vld [vmem:[#allocation50_spill] sm:$0xff] }
 0x486   : > { %v6826_v4 = vpack.c.bf16 %v4844_v46, %v4842_v7  ;;  %v6860_v7 = vadd.f32 %v8032_v17, %v5879_v21 }
 0x488   : > { %v7919_v13 = vunpack.c.l.bf16 %v6826_v4  ;;  %v7918_v57 = vunpack.c.h.bf16 %v6826_v4  ;;  %v1921_v22 = vmax.f32 %v6860_v7, %v6856_v0 }
 0x48a   : > { %v2851_v11 = vadd.f32 %v7918_v57, %v7919_v13 }
 0x48c   : > { %2852 = vadd.xlane.f32.xlu1 %v2851_v11 }
 0x48d   : > { %1916 = vmax.xlane.f32.xlu0 %v1915_v30 }
 0x494   : > { %1919 = vmax.xlane.f32.xlu1 %v1918_v54 }
 0x49c   : > { %1922 = vmax.xlane.f32.xlu1 %v1921_v22 }
 0x4a6   : > { %v3372_v46 = vpop.f32.mrf.mxu0  ;;  %v3541_v36 = vpop.f32.mrf.mxu1 }
 0x4a7   : > { %v3542_v11 = vadd.f32 %v3541_v36, %v3372_v46 }
 0x4a9   : > { %3689 = vst [vmem:[%s6586_s27 + $0x40] sm:$0xff] %v3542_v11 }
 0x4ae   : > { %v3374_v30 = vpop.f32.mrf.mxu0  ;;  %v3543_v47 = vpop.f32.mrf.mxu1 }
 0x4af   : > { %v3544_v54 = vadd.f32 %v3543_v47, %v3374_v30 }
 0x4b1   : > { %3690 = vst [vmem:[%s6586_s27 + $0x48] sm:$0xff] %v3544_v54 }
 0x4b7   : > { %v3377_v63 = vpop.f32.mrf.mxu0  ;;  %v3546_v57 = vpop.f32.mrf.mxu1 }
 0x4b8   : > { %v3547_v17 = vadd.f32 %v3546_v57, %v3377_v63 }
 0x4b9   : > { %v2826_v13 = vpop.xlane.xlu0 %2825 }
 0x4ba   : > { %4845 = vrcp.f32 %v2826_v13  ;;  %3691 = vst [vmem:[%s6586_s27 + $0x50] sm:$0xff] %v3547_v17 }
 0x4bf   : > { %v3379_v55 = vpop.f32.mrf.mxu0  ;;  %v3548_v22 = vpop.f32.mrf.mxu1 }
 0x4c0   : > { %v4846_v34 = vpop.eup %4845  ;;  %v3549_v40 = vadd.f32 %v3548_v22, %v3379_v55 }
 0x4c1   : > { %v3061_v46 = vmul.f32 %v4846_v34, %v2677_v60  ;;  %v3062_v36 = vmul.f32 %v4846_v34, %v2678_v56  ;;  %v2829_v11 = vpop.xlane.xlu0 %2828 }
 0x4c2   : > { %4847 = vrcp.f32 %v2829_v11  ;;  %3692 = vst [vmem:[%s6586_s27 + $0x58] sm:$0xff] %v3549_v40 }
 0x4c3   : > { %v3169_v30 = vpack.c.bf16 %v3061_v46, %v6758_v5  ;;  %v3170_v57 = vpack.c.bf16 %v3062_v36, %v6762_v49  ;;  %3783 = vst [vmem:[%s6302_s21 + $0x130] sm:$0xff] %v3061_v46 }
 0x4c4   : > { %3784 = vst [vmem:[%s6302_s21 + $0x138] sm:$0xff] %v3062_v36 }
 0x4c5   : > { %3396 = vmatmul.bf16.gmra.mxu0 %v3169_v30  ;;  %3565 = vmatmul.bf16.gmra.mxu1 %v3170_v57 }
 0x4c8   : > { %v4848_v55 = vpop.eup %4847 }
 0x4c9   : > { %v3382_v60 = vpop.f32.mrf.mxu0  ;;  %v1896_v19 = vpop.xlane.xlu0 %1895  ;;  %v3063_v56 = vmul.f32 %v4848_v55, %v2679_v44  ;;  %v3064_v5 = vmul.f32 %v4848_v55, %v2680_v16 }
 0x4ca   : > { %v2832_v13 = vpop.xlane.xlu1 %2831  ;;  %v2057_v49 = vsub.f32 %v6652_v2, %v1896_v19  ;;  %v2058_v40 = vsub.f32 %v6656_v26, %v1896_v19  ;;  %v3551_v34 = vpop.f32.mrf.mxu1 }
 0x4cb   : > { %4849 = vrcp.f32 %v2832_v13  ;;  %v3552_v47 = vadd.f32 %v3551_v34, %v3382_v60  ;;  %3785 = vst [vmem:[%s6302_s21 + $0x140] sm:$0xff] %v3063_v56 }
 0x4cc   : > { %v2156_v54 = vpack.c.bf16 %v2058_v40, %v2057_v49  ;;  %3786 = vst [vmem:[%s6302_s21 + $0x148] sm:$0xff] %v3064_v5 }
 0x4cd   : > { %3693 = vst [vmem:[%s6586_s27 + $0x60] sm:$0xff] %v3552_v47 }
 0x4ce   : > { %v2249_v63 = vunpack.c.l.bf16 %v2156_v54  ;;  %v2250_v17 = vunpack.c.h.bf16 %v2156_v54 }
 0x4d0   : > { %v2435_v46 = vmul.f32 1.442695, %v2249_v63  ;;  %v2437_v44 = vmul.f32 1.442695, %v2250_v17 }
 0x4d1   : > { %v4850_v22 = vpop.eup %4849  ;;  %v3384_v2 = vpop.f32.mrf.mxu0 }
 0x4d2   : > { %v3065_v8 = vmul.f32 %v4850_v22, %v2681_v1  ;;  %v3066_v16 = vmul.f32 %v4850_v22, %v2682_v31  ;;  %v2835_v26 = vpop.xlane.xlu1 %2834  ;;  %4851 = vpow2.f32 %v2435_v46  ;;  %v3553_v36 = vpop.f32.mrf.mxu1 }
 0x4d3   : > { %v1899_v11 = vpop.xlane.xlu0 %1898  ;;  %4853 = vpow2.f32 %v2437_v44  ;;  %v3554_v55 = vadd.f32 %v3553_v36, %v3384_v2  ;;  %v6898_v46 = vpop.f32.mrf.mxu3 }
 0x4d4   : > { %v3171_v30 = vpack.c.bf16 %v3065_v8, %v3063_v56  ;;  %3787 = vst [vmem:[%s6302_s21 + $0x150] sm:$0xff] %v3065_v8  ;;  %v3172_v57 = vpack.c.bf16 %v3066_v16, %v3064_v5  ;;  %v2059_v13 = vsub.f32 %v6679_v52, %v1899_v11  ;;  %v2060_v60 = vsub.f32 %v6683_v10, %v1899_v11  ;;  %v6907_v36 = vpop.f32.mrf.mxu2 }
 0x4d5   : > { %3788 = vst [vmem:[%s6302_s21 + $0x158] sm:$0xff] %v3066_v16  ;;  %4855 = vrcp.f32 %v2835_v26 }
 0x4d6   : > { %3401 = vmatmul.bf16.gmra.mxu0 %v3171_v30  ;;  %3570 = vmatmul.bf16.gmra.mxu1 %v3172_v57  ;;  %3694 = vst [vmem:[%s6586_s27 + $0x68] sm:$0xff] %v3554_v55  ;;  %v2157_v35 = vpack.c.bf16 %v2060_v60, %v2059_v13 }
 0x4d8   : > { %v2251_v1 = vunpack.c.l.bf16 %v2157_v35  ;;  %v2252_v31 = vunpack.c.h.bf16 %v2157_v35  ;;  %v4852_v19 = vpop.eup %4851 }
 0x4d9   : > { %v4854_v49 = vpop.eup %4853 }
 0x4da   : > { %v2439_v40 = vmul.f32 1.442695, %v2251_v1  ;;  %v2441_v56 = vmul.f32 1.442695, %v2252_v31  ;;  %v3387_v34 = vpop.f32.mrf.mxu0  ;;  %v1902_v54 = vpop.xlane.xlu1 %1901  ;;  %v6894_v10 = vpack.c.bf16 %v4854_v49, %v4852_v19 }
 0x4db   : > { %v2838_v5 = vpop.xlane.xlu2 %2837  ;;  %v4856_v47 = vpop.eup %4855  ;;  %v2061_v17 = vsub.f32 %v6712_v53, %v1902_v54  ;;  %v2062_v22 = vsub.f32 %v6716_v61, %v1902_v54 }
 0x4dc   : > { %4857 = vrcp.f32 %v2838_v5  ;;  %v3556_v52 = vpop.f32.mrf.mxu1  ;;  %v2697_v44 = vunpack.c.l.bf16 %v6894_v10  ;;  %v2698_v8 = vunpack.c.h.bf16 %v6894_v10  ;;  %v3067_v16 = vmul.f32 %v4856_v47, %v2683_v59  ;;  %v6930_v54 = vpop.f32.mrf.mxu2 }
 0x4dd   : > { %4859 = vpow2.f32 %v2439_v40  ;;  %v3557_v63 = vadd.f32 %v3556_v52, %v3387_v34  ;;  %v2158_v2 = vpack.c.bf16 %v2062_v22, %v2061_v17  ;;  %v3068_v26 = vmul.f32 %v4856_v47, %v2684_v33 }
 0x4de   : > { %4861 = vpow2.f32 %v2441_v56  ;;  %v2854_v53 = vadd.f32 %v2698_v8, %v2697_v44  ;;  %3789 = vst [vmem:[%s6302_s21 + $0x160] sm:$0xff] %v3067_v16 }
 0x4df   : > { %3695 = vst [vmem:[%s6586_s27 + $0x70] sm:$0xff] %v3557_v63  ;;  %v2253_v61 = vunpack.c.l.bf16 %v2158_v2  ;;  %v2254_v11 = vunpack.c.h.bf16 %v2158_v2 }
 0x4e0   : > { %3790 = vst [vmem:[%s6302_s21 + $0x168] sm:$0xff] %v3068_v26  ;;  %2855 = vadd.xlane.f32.xlu2 %v2854_v53 }
 0x4e1   : > { %v2443_v57 = vmul.f32 1.442695, %v2253_v61  ;;  %v2445_v55 = vmul.f32 1.442695, %v2254_v11 }
 0x4e2   : > { %v4858_v30 = vpop.eup %4857  ;;  %v3389_v13 = vpop.f32.mrf.mxu0 }
 0x4e3   : > { %v4860_v59 = vpop.eup %4859  ;;  %v2841_v15 = vpop.xlane.xlu2 %2840  ;;  %v3069_v33 = vmul.f32 %v4858_v30, %v2685_v25  ;;  %v3070_v60 = vmul.f32 %v4858_v30, %v2686_v48 }
 0x4e4   : > { %v4862_v35 = vpop.eup %4861  ;;  %4863 = vrcp.f32 %v2841_v15  ;;  %v3558_v1 = vpop.f32.mrf.mxu1 }
 0x4e5   : > { %v1905_v31 = vpop.xlane.xlu1 %1904  ;;  %4865 = vpow2.f32 %v2443_v57  ;;  %v3559_v19 = vadd.f32 %v3558_v1, %v3389_v13  ;;  %3791 = vst [vmem:[%s6302_s21 + $0x170] sm:$0xff] %v3069_v33  ;;  %v3173_v56 = vpack.c.bf16 %v3069_v33, %v3067_v16  ;;  %v3174_v34 = vpack.c.bf16 %v3070_v60, %v3068_v26  ;;  %v6926_v48 = vpop.f32.mrf.mxu3 }
 0x4e6   : > { %v2063_v49 = vsub.f32 %v6746_v32, %v1905_v31  ;;  %v2064_v40 = vsub.f32 %v6739_v9, %v1905_v31  ;;  %4867 = vpow2.f32 %v2445_v55  ;;  %3792 = vst [vmem:[%s6302_s21 + $0x178] sm:$0xff] %v3070_v60  ;;  %v6923_v25 = vpack.c.bf16 %v4862_v35, %v4860_v59  ;;  %v8033_v60 = vld [vmem:[#allocation51_spill] sm:$0xff] }
 0x4e7   : > { %3696 = vst [vmem:[%s6586_s27 + $0x78] sm:$0xff] %v3559_v19  ;;  %3406 = vmatmul.bf16.gmra.mxu0 %v3173_v56  ;;  %3575 = vmatmul.bf16.gmra.mxu1 %v3174_v34  ;;  %v6944_v13 = vadd.f32 %v6570_v45, %v5882_v23 }
 0x4e8   : > { %v2159_v24 = vpack.c.bf16 %v2064_v40, %v2063_v49  ;;  %v2699_v5 = vunpack.c.l.bf16 %v6923_v25  ;;  %v2700_v47 = vunpack.c.h.bf16 %v6923_v25  ;;  %v2844_v17 = vpop.xlane.xlu0 %2843 }
 0x4e9   : > { %4869 = vrcp.f32 %v2844_v17 }
 0x4ea   : > { %v2255_v32 = vunpack.c.l.bf16 %v2159_v24  ;;  %v2256_v52 = vunpack.c.h.bf16 %v2159_v24  ;;  %v4864_v9 = vpop.eup %4863  ;;  %v2857_v63 = vadd.f32 %v2700_v47, %v2699_v5  ;;  %v3392_v26 = vpop.f32.mrf.mxu0 }
 0x4eb   : > { %v4866_v22 = vpop.eup %4865  ;;  %v1908_v53 = vpop.xlane.xlu2 %1907  ;;  %v3071_v61 = vmul.f32 %v4864_v9, %v2687_v18  ;;  %v3072_v55 = vmul.f32 %v4864_v9, %v2688_v3 }
 0x4ec   : > { %v2447_v16 = vmul.f32 1.442695, %v2255_v32  ;;  %v2449_v2 = vmul.f32 1.442695, %v2256_v52  ;;  %v4868_v11 = vpop.eup %4867  ;;  %2858 = vadd.xlane.f32.xlu2 %v2857_v63  ;;  %v3561_v30 = vpop.f32.mrf.mxu1  ;;  %v2065_v59 = vsub.f32 %v6780_v39, %v1908_v53  ;;  %v2066_v57 = vsub.f32 %v6772_v51, %v1908_v53 }
 0x4ed   : > { %v3562_v15 = vadd.f32 %v3561_v30, %v3392_v26  ;;  %v6946_v33 = vpack.c.bf16 %v4868_v11, %v4866_v22  ;;  %3793 = vst [vmem:[%s6302_s21 + $0x180] sm:$0xff] %v3071_v61  ;;  %v6952_v39 = vadd.f32 %v8033_v60, %v5879_v21  ;;  %v6963_v19 = vpop.f32.mrf.mxu3  ;;  %v6971_v52 = vadd.f32 %v6898_v46, %v5882_v23 }
 0x4ee   : > { %4871 = vpow2.f32 %v2447_v16  ;;  %v2160_v18 = vpack.c.bf16 %v2066_v57, %v2065_v59  ;;  %3794 = vst [vmem:[%s6302_s21 + $0x188] sm:$0xff] %v3072_v55  ;;  %v6976_v16 = vpop.f32.mrf.mxu2  ;;  %v6983_v11 = vadd.f32 %v6907_v36, %v5879_v21 }
 0x4ef   : > { %4873 = vpow2.f32 %v2449_v2  ;;  %3697 = vst [vmem:[%s6586_s27 + $0x80] sm:$0xff] %v3562_v15  ;;  %v2701_v20 = vunpack.c.l.bf16 %v6946_v33  ;;  %v2702_v3 = vunpack.c.h.bf16 %v6946_v33  ;;  %v4870_v35 = vpop.eup %4869  ;;  %v1924_v31 = vmax.f32 %v6952_v39, %v6944_v13 }
 0x4f0   : > { %v2257_v51 = vunpack.c.l.bf16 %v2160_v18  ;;  %v2258_v45 = vunpack.c.h.bf16 %v2160_v18  ;;  %v2847_v56 = vpop.xlane.xlu0 %2846  ;;  %v3073_v34 = vmul.f32 %v4870_v35, %v2689_v41  ;;  %v3074_v24 = vmul.f32 %v4870_v35, %v2690_v29 }
 0x4f1   : > { %v2860_v1 = vadd.f32 %v2702_v3, %v2701_v20  ;;  %4875 = vrcp.f32 %v2847_v56  ;;  %v7002_v56 = vadd.f32 %v6926_v48, %v5882_v23 }
 0x4f2   : > { %v2451_v49 = vmul.f32 1.442695, %v2257_v51  ;;  %v2453_v40 = vmul.f32 1.442695, %v2258_v45  ;;  %v3394_v9 = vpop.f32.mrf.mxu0  ;;  %v3175_v29 = vpack.c.bf16 %v3073_v34, %v3071_v61  ;;  %3795 = vst [vmem:[%s6302_s21 + $0x190] sm:$0xff] %v3073_v34  ;;  %v3176_v2 = vpack.c.bf16 %v3074_v24, %v3072_v55 }
 0x4f3   : > { %2861 = vadd.xlane.f32.xlu0 %v2860_v1  ;;  %v1911_v63 = vpop.xlane.xlu2 %1910  ;;  %3796 = vst [vmem:[%s6302_s21 + $0x198] sm:$0xff] %v3074_v24  ;;  %v1927_v55 = vmax.f32 %v6983_v11, %v6971_v52 }
 0x4f4   : > { %v4872_v32 = vpop.eup %4871  ;;  %4877 = vpow2.f32 %v2451_v49  ;;  %1925 = vmax.xlane.f32.xlu2 %v1924_v31  ;;  %v3563_v22 = vpop.f32.mrf.mxu1  ;;  %v2067_v41 = vsub.f32 %v6800_v62, %v1911_v63  ;;  %v2068_v43 = vsub.f32 %v6794_v50, %v1911_v63  ;;  %v8034_v49 = vunpack.c.h.bf16 %v6790_v42 }
 0x4f5   : > { %v4874_v17 = vpop.eup %4873  ;;  %4879 = vpow2.f32 %v2453_v40  ;;  %v3564_v46 = vadd.f32 %v3563_v22, %v3394_v9  ;;  %v1754_v24 = vpop.f32.mrf.mxu3 }
 0x4f6   : > { %v6979_v26 = vpack.c.bf16 %v4874_v17, %v4872_v32  ;;  %v2161_v53 = vpack.c.bf16 %v2068_v43, %v2067_v41  ;;  %v1585_v32 = vpop.f32.mrf.mxu2 }
 0x4f7   : > { %3698 = vst [vmem:[%s6586_s27 + $0x88] sm:$0xff] %v3564_v46  ;;  %3411 = vmatmul.bf16.gmra.mxu0 %v3175_v29  ;;  %3580 = vmatmul.bf16.gmra.mxu1 %v3176_v2  ;;  %v4876_v59 = vpop.eup %4875  ;;  %v2850_v36 = vpop.xlane.xlu1 %2849  ;;  %v8035_v29 = vunpack.c.l.bf16 %v6808_v28  ;;  %v8036_v2 = vunpack.c.h.bf16 %v6808_v28 }
 0x4f8   : > { %v2703_v62 = vunpack.c.l.bf16 %v6979_v26  ;;  %v2704_v50 = vunpack.c.h.bf16 %v6979_v26  ;;  %v2259_v61 = vunpack.c.l.bf16 %v2161_v53  ;;  %v2260_v30 = vunpack.c.h.bf16 %v2161_v53  ;;  %v1914_v51 = vpop.xlane.xlu0 %1913 }
 0x4f9   : > { %4881 = vrcp.f32 %v2850_v36  ;;  %v3075_v45 = vmul.f32 %v4876_v59, %v2691_v37  ;;  %v2069_v1 = vsub.f32 %v6818_v6, %v1914_v51  ;;  %v2070_v31 = vsub.f32 %v6812_v38, %v1914_v51 }
 0x4fa   : > { %v2863_v57 = vadd.f32 %v2704_v50, %v2703_v62  ;;  %v4878_v15 = vpop.eup %4877  ;;  %v2455_v18 = vmul.f32 1.442695, %v2259_v61  ;;  %v2457_v60 = vmul.f32 1.442695, %v2260_v30  ;;  %v3076_v40 = vmul.f32 %v4876_v59, %v8034_v49 }
 0x4fb   : > { %v4880_v35 = vpop.eup %4879  ;;  %3797 = vst [vmem:[%s6302_s21 + $0x1a0] sm:$0xff] %v3075_v45  ;;  %v2162_v37 = vpack.c.bf16 %v2070_v31, %v2069_v1  ;;  %v7010_v6 = vadd.f32 %v6930_v54, %v5879_v21  ;;  %v7036_v51 = vadd.f32 %v6976_v16, %v5879_v21 }
 0x4fc   : > { %2864 = vadd.xlane.f32.xlu0 %v2863_v57  ;;  %4883 = vpow2.f32 %v2455_v18  ;;  %1928 = vmax.xlane.f32.xlu2 %v1927_v55  ;;  %v7004_v34 = vpack.c.bf16 %v4880_v35, %v4878_v15  ;;  %3798 = vst [vmem:[%s6302_s21 + $0x1a8] sm:$0xff] %v3076_v40  ;;  %v7026_v57 = vadd.f32 %v6963_v19, %v5882_v23 }
 0x4fd   : > { %4885 = vpow2.f32 %v2457_v60  ;;  %v2261_v48 = vunpack.c.l.bf16 %v2162_v37  ;;  %v2262_v9 = vunpack.c.h.bf16 %v2162_v37  ;;  %v1930_v22 = vmax.f32 %v7010_v6, %v7002_v56  ;;  %v1757_v1 = vpop.f32.mrf.mxu3 }
 0x4fe   : > { %v2705_v42 = vunpack.c.l.bf16 %v7004_v34  ;;  %v2706_v38 = vunpack.c.h.bf16 %v7004_v34  ;;  %v1933_v16 = vmax.f32 %v7036_v51, %v7026_v57 }
 0x4ff   : > { %v4882_v63 = vpop.eup %4881  ;;  %v2459_v41 = vmul.f32 1.442695, %v2261_v48  ;;  %v2461_v54 = vmul.f32 1.442695, %v2262_v9  ;;  %v2853_v43 = vpop.xlane.xlu1 %2852 }
 0x500   : > { %v2866_v17 = vadd.f32 %v2706_v38, %v2705_v42  ;;  %v3077_v46 = vmul.f32 %v4882_v63, %v8035_v29  ;;  %v3078_v53 = vmul.f32 %v4882_v63, %v8036_v2  ;;  %4887 = vrcp.f32 %v2853_v43  ;;  %v1917_v30 = vpop.xlane.xlu0 %1916 }
 0x501   : > { %4889 = vpow2.f32 %v2459_v41  ;;  %v2071_v55 = vsub.f32 %v6836_v58, %v1917_v30  ;;  %v2072_v36 = vsub.f32 %v6830_v12, %v1917_v30  ;;  %v8037_v63 = vunpack.c.l.bf16 %v6826_v4 }
 0x502   : > { %v4884_v61 = vpop.eup %4883  ;;  %2867 = vadd.xlane.f32.xlu1 %v2866_v17  ;;  %3799 = vst [vmem:[%s6302_s21 + $0x1b0] sm:$0xff] %v3077_v46  ;;  %4891 = vpow2.f32 %v2461_v54  ;;  %v3177_v28 = vpack.c.bf16 %v3077_v46, %v3075_v45  ;;  %v3178_v15 = vpack.c.bf16 %v3078_v53, %v3076_v40  ;;  %v1588_v40 = vpop.f32.mrf.mxu2  ;;  %v7061_v2 = vadd.f32 %v1754_v24, %v5882_v23 }
 0x503   : > { %v4886_v59 = vpop.eup %4885  ;;  %3800 = vst [vmem:[%s6302_s21 + $0x1b8] sm:$0xff] %v3078_v53  ;;  %v2163_v60 = vpack.c.bf16 %v2072_v36, %v2071_v55 }
 0x504   : > { %1931 = vmax.xlane.f32.xlu0 %v1930_v22  ;;  %v7032_v18 = vpack.c.bf16 %v4886_v59, %v4884_v61  ;;  %v8038_v22 = vunpack.c.h.bf16 %v6826_v4 }
 0x505   : > { %v2263_v58 = vunpack.c.l.bf16 %v2163_v60  ;;  %v2264_v31 = vunpack.c.h.bf16 %v2163_v60 }
 0x506   : > { %v2707_v19 = vunpack.c.l.bf16 %v7032_v18  ;;  %v2708_v35 = vunpack.c.h.bf16 %v7032_v18  ;;  %v4888_v12 = vpop.eup %4887 }
 0x507   : > { %3416 = vmatmul.bf16.gmra.mxu0 %v3177_v28  ;;  %3585 = vmatmul.bf16.gmra.mxu1 %v3178_v15  ;;  %v4890_v49 = vpop.eup %4889  ;;  %v2463_v37 = vmul.f32 1.442695, %v2263_v58  ;;  %v2465_v48 = vmul.f32 1.442695, %v2264_v31  ;;  %v1920_v9 = vpop.xlane.xlu1 %1919  ;;  %v7048_v17 = vmul.f32 %v4888_v12, %v8037_v63  ;;  %v7052_v41 = vmul.f32 %v4888_v12, %v8038_v22 }
 0x508   : > { %v2869_v45 = vadd.f32 %v2708_v35, %v2707_v19  ;;  %v4892_v54 = vpop.eup %4891  ;;  %v2073_v43 = vsub.f32 %v6850_v14, %v1920_v9  ;;  %v2074_v29 = vsub.f32 %v6846_v27, %v1920_v9  ;;  %v7068_v14 = vadd.f32 %v1585_v32, %v5879_v21  ;;  %v1759_v15 = vpop.f32.mrf.mxu3 }
 0x509   : > { %4893 = vpow2.f32 %v2463_v37  ;;  %v7056_v46 = vpack.c.bf16 %v4892_v54, %v4890_v49  ;;  %3801 = vst [vmem:[%s6302_s21 + $0x1c0] sm:$0xff] %v7048_v17  ;;  %v7086_v9 = vadd.f32 %v1588_v40, %v5879_v21  ;;  %v7097_v40 = vadd.f32 %v1759_v15, %v5882_v23 }
 0x50a   : > { %2870 = vadd.xlane.f32.xlu1 %v2869_v45  ;;  %4895 = vpow2.f32 %v2465_v48  ;;  %v2164_v53 = vpack.c.bf16 %v2074_v29, %v2073_v43  ;;  %3802 = vst [vmem:[%s6302_s21 + $0x1c8] sm:$0xff] %v7052_v41  ;;  %v1936_v36 = vmax.f32 %v7068_v14, %v7061_v2  ;;  %v1590_v12 = vpop.f32.mrf.mxu2 }
 0x50b   : > { %v2709_v4 = vunpack.c.l.bf16 %v7056_v46  ;;  %v2710_v61 = vunpack.c.h.bf16 %v7056_v46 }
 0x50c   : > { %1934 = vmax.xlane.f32.xlu0 %v1933_v16  ;;  %v2265_v27 = vunpack.c.l.bf16 %v2164_v53  ;;  %v2266_v30 = vunpack.c.h.bf16 %v2164_v53  ;;  %v7081_v16 = vadd.f32 %v1757_v1, %v5882_v23 }
 0x50d   : > { %v2872_v59 = vadd.f32 %v2710_v61, %v2709_v4 }
 0x50e   : > { %v2467_v24 = vmul.f32 1.442695, %v2265_v27  ;;  %v2469_v55 = vmul.f32 1.442695, %v2266_v30  ;;  %v1939_v1 = vmax.f32 %v7086_v9, %v7081_v16 }
 0x50f   : > { %v4894_v28 = vpop.eup %4893  ;;  %2873 = vadd.xlane.f32.xlu2 %v2872_v59  ;;  %v1923_v60 = vpop.xlane.xlu1 %1922 }
 0x510   : > { %v4896_v58 = vpop.eup %4895  ;;  %4897 = vpow2.f32 %v2467_v24  ;;  %v2075_v32 = vsub.f32 %v6860_v7, %v1923_v60  ;;  %v2076_v31 = vsub.f32 %v6856_v0, %v1923_v60  ;;  %v1762_v27 = vpop.f32.mrf.mxu3  ;;  %v7102_v24 = vadd.f32 %v1590_v12, %v5879_v21 }
 0x511   : > { %4899 = vpow2.f32 %v2469_v55  ;;  %v7078_v45 = vpack.c.bf16 %v4896_v58, %v4894_v28 }
 0x512   : > { %1937 = vmax.xlane.f32.xlu1 %v1936_v36  ;;  %v2165_v49 = vpack.c.bf16 %v2076_v31, %v2075_v32  ;;  %v1593_v55 = vpop.f32.mrf.mxu2  ;;  %v1942_v28 = vmax.f32 %v7102_v24, %v7097_v40  ;;  %v7113_v32 = vadd.f32 %v1762_v27, %v5882_v23 }
 0x513   : > { %v2711_v37 = vunpack.c.l.bf16 %v7078_v45  ;;  %v2712_v48 = vunpack.c.h.bf16 %v7078_v45 }
 0x514   : > { %v2267_v63 = vunpack.c.l.bf16 %v2165_v49  ;;  %v2268_v22 = vunpack.c.h.bf16 %v2165_v49  ;;  %v7118_v49 = vadd.f32 %v1593_v55, %v5879_v21 }
 0x515   : > { %v2875_v0 = vadd.f32 %v2712_v48, %v2711_v37 }
 0x516   : > { %v4898_v7 = vpop.eup %4897  ;;  %v2471_v54 = vmul.f32 1.442695, %v2267_v63  ;;  %v2473_v43 = vmul.f32 1.442695, %v2268_v22 }
 0x517   : > { %v4900_v29 = vpop.eup %4899  ;;  %2876 = vadd.xlane.f32.xlu2 %v2875_v0 }
 0x518   : > { %4901 = vpow2.f32 %v2471_v54  ;;  %v7094_v53 = vpack.c.bf16 %v4900_v29, %v4898_v7  ;;  %v1764_v63 = vpop.f32.mrf.mxu3  ;;  %v1945_v7 = vmax.f32 %v7118_v49, %v7113_v32 }
 0x519   : > { %4903 = vpow2.f32 %v2473_v43  ;;  %v7127_v54 = vadd.f32 %v1764_v63, %v5882_v23 }
 0x51a   : > { %1940 = vmax.xlane.f32.xlu1 %v1939_v1  ;;  %v7926_v30 = vunpack.c.l.bf16 %v7094_v53  ;;  %v7925_v59 = vunpack.c.h.bf16 %v7094_v53  ;;  %v1595_v0 = vpop.f32.mrf.mxu2 }
 0x51b   : > { %v7130_v43 = vadd.f32 %v1595_v0, %v5879_v21 }
 0x51c   : > { %v2878_v36 = vadd.f32 %v7925_v59, %v7926_v30 }
 0x51d   : > { %v1948_v1 = vmax.f32 %v7130_v43, %v7127_v54 }
 0x51e   : > { %v4902_v15 = vpop.eup %4901  ;;  %2879 = vadd.xlane.f32.xlu0 %v2878_v36 }
 0x51f   : > { %v4904_v60 = vpop.eup %4903  ;;  %1943 = vmax.xlane.f32.xlu2 %v1942_v28 }
 0x520   : > { %v7110_v58 = vpack.c.bf16 %v4904_v60, %v4902_v15  ;;  %v1767_v29 = vpop.f32.mrf.mxu3 }
 0x521   : > { %v7135_v55 = vadd.f32 %v1767_v29, %v5882_v23 }
 0x522   : > { %v7924_v31 = vunpack.c.l.bf16 %v7110_v58  ;;  %v7923_v12 = vunpack.c.h.bf16 %v7110_v58  ;;  %v1598_v27 = vpop.f32.mrf.mxu2 }
 0x523   : > { %v7138_v36 = vadd.f32 %v1598_v27, %v5879_v21 }
 0x524   : > { %v2881_v22 = vadd.f32 %v7923_v12, %v7924_v31 }
 0x525   : > { %v1951_v28 = vmax.f32 %v7138_v36, %v7135_v55 }
 0x526   : > { %2882 = vadd.xlane.f32.xlu0 %v2881_v22 }
 0x527   : > { %1946 = vmax.xlane.f32.xlu2 %v1945_v7 }
 0x52e   : > { %1949 = vmax.xlane.f32.xlu0 %v1948_v1 }
 0x536   : > { %1952 = vmax.xlane.f32.xlu0 %v1951_v28 }
 0x542   : > { %v3397_v15 = vpop.f32.mrf.mxu0  ;;  %v3566_v60 = vpop.f32.mrf.mxu1 }
 0x543   : > { %v3567_v63 = vadd.f32 %v3566_v60, %v3397_v15 }
 0x545   : > { %3699 = vst [vmem:[%s6586_s27 + $0x90] sm:$0xff] %v3567_v63 }
 0x54a   : > { %v3399_v22 = vpop.f32.mrf.mxu0  ;;  %v3568_v0 = vpop.f32.mrf.mxu1 }
 0x54b   : > { %v3569_v7 = vadd.f32 %v3568_v0, %v3399_v22 }
 0x54d   : > { %3700 = vst [vmem:[%s6586_s27 + $0x98] sm:$0xff] %v3569_v7 }
 0x553   : > { %v3402_v1 = vpop.f32.mrf.mxu0  ;;  %v3571_v29 = vpop.f32.mrf.mxu1 }
 0x554   : > { %v3572_v12 = vadd.f32 %v3571_v29, %v3402_v1  ;;  %v2856_v27 = vpop.xlane.xlu2 %2855 }
 0x555   : > { %4905 = vrcp.f32 %v2856_v27 }
 0x556   : > { %3701 = vst [vmem:[%s6586_s27 + $0xa0] sm:$0xff] %v3572_v12 }
 0x55b   : > { %v3404_v31 = vpop.f32.mrf.mxu0  ;;  %v3573_v59 = vpop.f32.mrf.mxu1 }
 0x55c   : > { %v4906_v28 = vpop.eup %4905  ;;  %v3574_v30 = vadd.f32 %v3573_v59, %v3404_v31 }
 0x55d   : > { %v3081_v15 = vmul.f32 %v4906_v28, %v2697_v44  ;;  %v3082_v60 = vmul.f32 %v4906_v28, %v2698_v8 }
 0x55e   : > { %3702 = vst [vmem:[%s6586_s27 + $0xa8] sm:$0xff] %v3574_v30 }
 0x55f   : > { %v2859_v63 = vpop.xlane.xlu2 %2858  ;;  %v3179_v22 = vpack.c.bf16 %v3081_v15, %v7048_v17  ;;  %3803 = vst [vmem:[%s6302_s21 + $0x1d0] sm:$0xff] %v3081_v15  ;;  %v3180_v0 = vpack.c.bf16 %v3082_v60, %v7052_v41 }
 0x560   : > { %4907 = vrcp.f32 %v2859_v63  ;;  %3804 = vst [vmem:[%s6302_s21 + $0x1d8] sm:$0xff] %v3082_v60  ;;  %v7163_v63 = vpop.f32.mrf.mxu3 }
 0x561   : > { %3421 = vmatmul.bf16.gmra.mxu0 %v3179_v22  ;;  %3590 = vmatmul.bf16.gmra.mxu1 %v3180_v0 }
 0x564   : > { %v3407_v59 = vpop.f32.mrf.mxu0  ;;  %v3576_v31 = vpop.f32.mrf.mxu1 }
 0x565   : > { %v3577_v12 = vadd.f32 %v3576_v31, %v3407_v59  ;;  %v7169_v59 = vpop.f32.mrf.mxu2 }
 0x566   : > { %v4908_v44 = vpop.eup %4907  ;;  %v2862_v10 = vpop.xlane.xlu0 %2861 }
 0x567   : > { %v1926_v8 = vpop.xlane.xlu2 %1925  ;;  %4909 = vrcp.f32 %v2862_v10  ;;  %v3083_v17 = vmul.f32 %v4908_v44, %v2699_v5  ;;  %v3084_v30 = vmul.f32 %v4908_v44, %v2700_v47  ;;  %3703 = vst [vmem:[%s6586_s27 + $0xb0] sm:$0xff] %v3577_v12 }
 0x568   : > { %v2077_v41 = vsub.f32 %v6952_v39, %v1926_v8  ;;  %v2078_v7 = vsub.f32 %v6944_v13, %v1926_v8 }
 0x569   : > { %3805 = vst [vmem:[%s6302_s21 + $0x1e0] sm:$0xff] %v3083_v17 }
 0x56a   : > { %v2166_v1 = vpack.c.bf16 %v2078_v7, %v2077_v41  ;;  %3806 = vst [vmem:[%s6302_s21 + $0x1e8] sm:$0xff] %v3084_v30 }
 0x56c   : > { %v2269_v29 = vunpack.c.l.bf16 %v2166_v1  ;;  %v2270_v27 = vunpack.c.h.bf16 %v2166_v1  ;;  %v3409_v15 = vpop.f32.mrf.mxu0  ;;  %v3578_v60 = vpop.f32.mrf.mxu1 }
 0x56d   : > { %v4910_v28 = vpop.eup %4909  ;;  %v3579_v47 = vadd.f32 %v3578_v60, %v3409_v15 }
 0x56e   : > { %v2475_v5 = vmul.f32 1.442695, %v2269_v29  ;;  %v2477_v25 = vmul.f32 1.442695, %v2270_v27  ;;  %v3085_v13 = vmul.f32 %v4910_v28, %v2701_v20  ;;  %v3086_v0 = vmul.f32 %v4910_v28, %v2702_v3 }
 0x56f   : > { %v2865_v22 = vpop.xlane.xlu0 %2864  ;;  %v1929_v39 = vpop.xlane.xlu2 %1928  ;;  %3704 = vst [vmem:[%s6586_s27 + $0xb8] sm:$0xff] %v3579_v47 }
 0x570   : > { %4911 = vrcp.f32 %v2865_v22  ;;  %v2079_v31 = vsub.f32 %v6983_v11, %v1929_v39  ;;  %v2080_v44 = vsub.f32 %v6971_v52, %v1929_v39  ;;  %v3181_v12 = vpack.c.bf16 %v3085_v13, %v3083_v17  ;;  %3807 = vst [vmem:[%s6302_s21 + $0x1f0] sm:$0xff] %v3085_v13 }
 0x571   : > { %4913 = vpow2.f32 %v2475_v5  ;;  %v3182_v10 = vpack.c.bf16 %v3086_v0, %v3084_v30  ;;  %3808 = vst [vmem:[%s6302_s21 + $0x1f8] sm:$0xff] %v3086_v0 }
 0x572   : > { %4915 = vpow2.f32 %v2477_v25  ;;  %v2167_v8 = vpack.c.bf16 %v2080_v44, %v2079_v31  ;;  %3426 = vmatmul.bf16.gmra.mxu0 %v3181_v12  ;;  %v7182_v25 = vpop.f32.mrf.mxu3 }
 0x573   : > { %3595 = vmatmul.bf16.gmra.mxu1 %v3182_v10 }
 0x574   : > { %v2271_v20 = vunpack.c.l.bf16 %v2167_v8  ;;  %v2272_v41 = vunpack.c.h.bf16 %v2167_v8  ;;  %v3412_v7 = vpop.f32.mrf.mxu0  ;;  %v3581_v52 = vpop.f32.mrf.mxu1 }
 0x575   : > { %v2868_v3 = vpop.xlane.xlu1 %2867  ;;  %v3582_v28 = vadd.f32 %v3581_v52, %v3412_v7 }
 0x576   : > { %v4912_v33 = vpop.eup %4911  ;;  %v2479_v29 = vmul.f32 1.442695, %v2271_v20  ;;  %v2481_v11 = vmul.f32 1.442695, %v2272_v41  ;;  %4917 = vrcp.f32 %v2868_v3 }
 0x577   : > { %v4914_v1 = vpop.eup %4913  ;;  %v1932_v17 = vpop.xlane.xlu0 %1931  ;;  %v3087_v30 = vmul.f32 %v4912_v33, %v2703_v62  ;;  %v3088_v5 = vmul.f32 %v4912_v33, %v2704_v50  ;;  %3705 = vst [vmem:[%s6586_s27 + $0xc0] sm:$0xff] %v3582_v28 }
 0x578   : > { %v4916_v27 = vpop.eup %4915  ;;  %v2081_v15 = vsub.f32 %v7010_v6, %v1932_v17  ;;  %v2082_v60 = vsub.f32 %v7002_v56, %v1932_v17  ;;  %4919 = vpow2.f32 %v2479_v29  ;;  %v7188_v62 = vpop.f32.mrf.mxu2 }
 0x579   : > { %v7184_v47 = vpack.c.bf16 %v4916_v27, %v4914_v1  ;;  %3809 = vst [vmem:[%s6302_s21 + $0x200] sm:$0xff] %v3087_v30  ;;  %4921 = vpow2.f32 %v2481_v11 }
 0x57a   : > { %v2168_v22 = vpack.c.bf16 %v2082_v60, %v2081_v15  ;;  %3810 = vst [vmem:[%s6302_s21 + $0x208] sm:$0xff] %v3088_v5  ;;  %v7208_v52 = vpop.f32.mrf.mxu3 }
 0x57b   : > { %v2717_v13 = vunpack.c.l.bf16 %v7184_v47  ;;  %v2718_v6 = vunpack.c.h.bf16 %v7184_v47 }
 0x57c   : > { %v2273_v56 = vunpack.c.l.bf16 %v2168_v22  ;;  %v2274_v39 = vunpack.c.h.bf16 %v2168_v22  ;;  %v4918_v26 = vpop.eup %4917  ;;  %v3414_v12 = vpop.f32.mrf.mxu0 }
 0x57d   : > { %v2884_v50 = vadd.f32 %v2718_v6, %v2717_v13  ;;  %v2871_v44 = vpop.xlane.xlu1 %2870  ;;  %v3089_v10 = vmul.f32 %v4918_v26, %v2705_v42  ;;  %v3090_v8 = vmul.f32 %v4918_v26, %v2706_v38  ;;  %v3583_v41 = vpop.f32.mrf.mxu1 }
 0x57e   : > { %v2483_v0 = vmul.f32 1.442695, %v2273_v56  ;;  %v2485_v31 = vmul.f32 1.442695, %v2274_v39  ;;  %v4920_v20 = vpop.eup %4919  ;;  %4923 = vrcp.f32 %v2871_v44  ;;  %v3584_v7 = vadd.f32 %v3583_v41, %v3414_v12 }
 0x57f   : > { %2885 = vadd.xlane.f32.xlu1 %v2884_v50  ;;  %v1935_v33 = vpop.xlane.xlu0 %1934  ;;  %v4922_v3 = vpop.eup %4921  ;;  %3811 = vst [vmem:[%s6302_s21 + $0x210] sm:$0xff] %v3089_v10  ;;  %v3183_v42 = vpack.c.bf16 %v3089_v10, %v3087_v30  ;;  %v3184_v11 = vpack.c.bf16 %v3090_v8, %v3088_v5 }
 0x580   : > { %4925 = vpow2.f32 %v2483_v0  ;;  %v2083_v1 = vsub.f32 %v7036_v51, %v1935_v33  ;;  %v2084_v29 = vsub.f32 %v7026_v57, %v1935_v33  ;;  %3812 = vst [vmem:[%s6302_s21 + $0x218] sm:$0xff] %v3090_v8  ;;  %v7205_v34 = vpack.c.bf16 %v4922_v3, %v4920_v20  ;;  %v7212_v15 = vpop.f32.mrf.mxu2 }
 0x581   : > { %4927 = vpow2.f32 %v2485_v31  ;;  %3706 = vst [vmem:[%s6586_s27 + $0xc8] sm:$0xff] %v3584_v7  ;;  %v7226_v8 = vadd.f32 %v7163_v63, %v5882_v23 }
 0x582   : > { %v2169_v38 = vpack.c.bf16 %v2084_v29, %v2083_v1  ;;  %3431 = vmatmul.bf16.gmra.mxu0 %v3183_v42  ;;  %v2719_v17 = vunpack.c.l.bf16 %v7205_v34  ;;  %v2720_v27 = vunpack.c.h.bf16 %v7205_v34  ;;  %v2874_v60 = vpop.xlane.xlu2 %2873  ;;  %v7245_v1 = vpop.f32.mrf.mxu3 }
 0x583   : > { %3600 = vmatmul.bf16.gmra.mxu1 %v3184_v11  ;;  %4929 = vrcp.f32 %v2874_v60 }
 0x584   : > { %v2275_v28 = vunpack.c.l.bf16 %v2169_v38  ;;  %v2276_v51 = vunpack.c.h.bf16 %v2169_v38  ;;  %v4924_v57 = vpop.eup %4923  ;;  %v2887_v30 = vadd.f32 %v2720_v27, %v2719_v17  ;;  %v3417_v26 = vpop.f32.mrf.mxu0 }
 0x585   : > { %v1938_v39 = vpop.xlane.xlu1 %1937  ;;  %v3091_v50 = vmul.f32 %v4924_v57, %v2707_v19  ;;  %v3586_v12 = vpop.f32.mrf.mxu1  ;;  %v3092_v10 = vmul.f32 %v4924_v57, %v2708_v35 }
 0x586   : > { %v4926_v5 = vpop.eup %4925  ;;  %v2487_v22 = vmul.f32 1.442695, %v2275_v28  ;;  %v2489_v56 = vmul.f32 1.442695, %v2276_v51  ;;  %v2085_v31 = vsub.f32 %v7068_v14, %v1938_v39  ;;  %v2086_v44 = vsub.f32 %v7061_v2, %v1938_v39 }
 0x587   : > { %v4928_v0 = vpop.eup %4927  ;;  %2888 = vadd.xlane.f32.xlu1 %v2887_v30  ;;  %v3587_v20 = vadd.f32 %v3586_v12, %v3417_v26  ;;  %3813 = vst [vmem:[%s6302_s21 + $0x220] sm:$0xff] %v3091_v50  ;;  %v7234_v14 = vadd.f32 %v7169_v59, %v5879_v21  ;;  %v7253_v51 = vadd.f32 %v7182_v25, %v5882_v23 }
 0x588   : > { %4931 = vpow2.f32 %v2487_v22  ;;  %v7228_v41 = vpack.c.bf16 %v4928_v0, %v4926_v5  ;;  %v2170_v19 = vpack.c.bf16 %v2086_v44, %v2085_v31  ;;  %3814 = vst [vmem:[%s6302_s21 + $0x228] sm:$0xff] %v3092_v10  ;;  %v7258_v22 = vpop.f32.mrf.mxu2  ;;  %v7265_v0 = vadd.f32 %v7188_v62, %v5879_v21 }
 0x589   : > { %4933 = vpow2.f32 %v2489_v56  ;;  %3707 = vst [vmem:[%s6586_s27 + $0xd0] sm:$0xff] %v3587_v20  ;;  %v4930_v33 = vpop.eup %4929  ;;  %v1954_v3 = vmax.f32 %v7234_v14, %v7226_v8 }
 0x58a   : > { %v2721_v18 = vunpack.c.l.bf16 %v7228_v41  ;;  %v2722_v35 = vunpack.c.h.bf16 %v7228_v41  ;;  %v2277_v2 = vunpack.c.l.bf16 %v2170_v19  ;;  %v2278_v63 = vunpack.c.h.bf16 %v2170_v19  ;;  %v2877_v42 = vpop.xlane.xlu2 %2876 }
 0x58b   : > { %v3093_v11 = vmul.f32 %v4930_v33, %v2709_v4  ;;  %v3094_v38 = vmul.f32 %v4930_v33, %v2710_v61  ;;  %4935 = vrcp.f32 %v2877_v42  ;;  %v1957_v12 = vmax.f32 %v7265_v0, %v7253_v51 }
 0x58c   : > { %v2890_v7 = vadd.f32 %v2722_v35, %v2721_v18  ;;  %v2491_v59 = vmul.f32 1.442695, %v2277_v2  ;;  %v2493_v29 = vmul.f32 1.442695, %v2278_v63  ;;  %v3419_v30 = vpop.f32.mrf.mxu0  ;;  %v7284_v42 = vadd.f32 %v7208_v52, %v5882_v23 }
 0x58d   : > { %v1941_v57 = vpop.xlane.xlu1 %1940  ;;  %v3588_v46 = vpop.f32.mrf.mxu1  ;;  %v3185_v61 = vpack.c.bf16 %v3093_v11, %v3091_v50  ;;  %3815 = vst [vmem:[%s6302_s21 + $0x230] sm:$0xff] %v3093_v11  ;;  %v3186_v56 = vpack.c.bf16 %v3094_v38, %v3092_v10 }
 0x58e   : > { %v4932_v28 = vpop.eup %4931  ;;  %2891 = vadd.xlane.f32.xlu2 %v2890_v7  ;;  %4937 = vpow2.f32 %v2491_v59  ;;  %v2087_v5 = vsub.f32 %v7086_v9, %v1941_v57  ;;  %v2088_v4 = vsub.f32 %v7081_v16, %v1941_v57  ;;  %v3589_v25 = vadd.f32 %v3588_v46, %v3419_v30  ;;  %3816 = vst [vmem:[%s6302_s21 + $0x238] sm:$0xff] %v3094_v38  ;;  %v1779_v38 = vpop.f32.mrf.mxu3 }
 0x58f   : > { %v4934_v60 = vpop.eup %4933  ;;  %1955 = vmax.xlane.f32.xlu1 %v1954_v3  ;;  %4939 = vpow2.f32 %v2493_v29  ;;  %v8039_v46 = vunpack.c.l.bf16 %v7094_v53 }
 0x590   : > { %v7261_v39 = vpack.c.bf16 %v4934_v60, %v4932_v28  ;;  %v2171_v26 = vpack.c.bf16 %v2088_v4, %v2087_v5  ;;  %3708 = vst [vmem:[%s6586_s27 + $0xd8] sm:$0xff] %v3589_v25  ;;  %v8040_v25 = vunpack.c.h.bf16 %v7094_v53 }
 0x591   : > { %v4936_v44 = vpop.eup %4935  ;;  %v2880_v62 = vpop.xlane.xlu0 %2879 }
 0x592   : > { %v2723_v9 = vunpack.c.l.bf16 %v7261_v39  ;;  %v2724_v16 = vunpack.c.h.bf16 %v7261_v39  ;;  %v2279_v50 = vunpack.c.l.bf16 %v2171_v26  ;;  %v2280_v31 = vunpack.c.h.bf16 %v2171_v26  ;;  %3436 = vmatmul.bf16.gmra.mxu0 %v3185_v61  ;;  %v1944_v63 = vpop.xlane.xlu2 %1943 }
 0x593   : > { %3605 = vmatmul.bf16.gmra.mxu1 %v3186_v56  ;;  %4941 = vrcp.f32 %v2880_v62  ;;  %v3095_v33 = vmul.f32 %v4936_v44, %v2711_v37  ;;  %v2089_v7 = vsub.f32 %v7102_v24, %v1944_v63  ;;  %v2090_v59 = vsub.f32 %v7097_v40, %v1944_v63  ;;  %v1610_v40 = vpop.f32.mrf.mxu2 }
 0x594   : > { %v2893_v10 = vadd.f32 %v2724_v16, %v2723_v9  ;;  %v4938_v20 = vpop.eup %4937  ;;  %v2495_v19 = vmul.f32 1.442695, %v2279_v50  ;;  %v2497_v2 = vmul.f32 1.442695, %v2280_v31  ;;  %v3096_v29 = vmul.f32 %v4936_v44, %v2712_v48 }
 0x595   : > { %v4940_v3 = vpop.eup %4939  ;;  %3817 = vst [vmem:[%s6302_s21 + $0x240] sm:$0xff] %v3095_v33  ;;  %v2172_v37 = vpack.c.bf16 %v2090_v59, %v2089_v7  ;;  %v7292_v24 = vadd.f32 %v7212_v15, %v5879_v21 }
 0x596   : > { %2894 = vadd.xlane.f32.xlu2 %v2893_v10  ;;  %4943 = vpow2.f32 %v2495_v19  ;;  %v7286_v11 = vpack.c.bf16 %v4940_v3, %v4938_v20  ;;  %3818 = vst [vmem:[%s6302_s21 + $0x248] sm:$0xff] %v3096_v29  ;;  %v7311_v10 = vadd.f32 %v7245_v1, %v5882_v23  ;;  %v1782_v63 = vpop.f32.mrf.mxu3 }
 0x597   : > { %1958 = vmax.xlane.f32.xlu1 %v1957_v12  ;;  %4945 = vpow2.f32 %v2497_v2  ;;  %v2281_v52 = vunpack.c.l.bf16 %v2172_v37  ;;  %v2282_v28 = vunpack.c.h.bf16 %v2172_v37  ;;  %v1960_v60 = vmax.f32 %v7292_v24, %v7284_v42 }
 0x598   : > { %v2725_v45 = vunpack.c.l.bf16 %v7286_v11  ;;  %v2726_v48 = vunpack.c.h.bf16 %v7286_v11  ;;  %v7318_v2 = vadd.f32 %v7258_v22, %v5879_v21 }
 0x599   : > { %v4942_v57 = vpop.eup %4941  ;;  %v2499_v5 = vmul.f32 1.442695, %v2281_v52  ;;  %v2501_v15 = vmul.f32 1.442695, %v2282_v28  ;;  %v2883_v4 = vpop.xlane.xlu0 %2882 }
 0x59a   : > { %v2896_v30 = vadd.f32 %v2726_v48, %v2725_v45  ;;  %v3097_v61 = vmul.f32 %v4942_v57, %v8039_v46  ;;  %v3098_v56 = vmul.f32 %v4942_v57, %v8040_v25  ;;  %v1947_v50 = vpop.xlane.xlu2 %1946  ;;  %4947 = vrcp.f32 %v2883_v4 }
 0x59b   : > { %4949 = vpow2.f32 %v2499_v5  ;;  %v2091_v44 = vsub.f32 %v7118_v49, %v1947_v50  ;;  %v2092_v12 = vsub.f32 %v7113_v32, %v1947_v50  ;;  %v1963_v59 = vmax.f32 %v7318_v2, %v7311_v10 }
 0x59c   : > { %v4944_v26 = vpop.eup %4943  ;;  %2897 = vadd.xlane.f32.xlu0 %v2896_v30  ;;  %3819 = vst [vmem:[%s6302_s21 + $0x250] sm:$0xff] %v3097_v61  ;;  %4951 = vpow2.f32 %v2501_v15  ;;  %v3187_v62 = vpack.c.bf16 %v3097_v61, %v3095_v33  ;;  %v3188_v19 = vpack.c.bf16 %v3098_v56, %v3096_v29  ;;  %v1613_v29 = vpop.f32.mrf.mxu2  ;;  %v8041_v57 = vunpack.c.l.bf16 %v7110_v58 }
 0x59d   : > { %v4946_v31 = vpop.eup %4945  ;;  %3820 = vst [vmem:[%s6302_s21 + $0x258] sm:$0xff] %v3098_v56  ;;  %v2173_v20 = vpack.c.bf16 %v2092_v12, %v2091_v44  ;;  %v7343_v25 = vadd.f32 %v1779_v38, %v5882_v23 }
 0x59e   : > { %1961 = vmax.xlane.f32.xlu2 %v1960_v60  ;;  %v7314_v53 = vpack.c.bf16 %v4946_v31, %v4944_v26  ;;  %v8042_v60 = vunpack.c.h.bf16 %v7110_v58 }
 0x59f   : > { %v2283_v3 = vunpack.c.l.bf16 %v2173_v20  ;;  %v2284_v7 = vunpack.c.h.bf16 %v2173_v20  ;;  %v1784_v20 = vpop.f32.mrf.mxu3 }
 0x5a0   : > { %v2727_v49 = vunpack.c.l.bf16 %v7314_v53  ;;  %v2728_v32 = vunpack.c.h.bf16 %v7314_v53  ;;  %v4948_v1 = vpop.eup %4947 }
 0x5a1   : > { %v4950_v22 = vpop.eup %4949  ;;  %v2503_v37 = vmul.f32 1.442695, %v2283_v3  ;;  %v2505_v52 = vmul.f32 1.442695, %v2284_v7  ;;  %v1950_v28 = vpop.xlane.xlu0 %1949  ;;  %v7330_v30 = vmul.f32 %v4948_v1, %v8041_v57  ;;  %v7334_v5 = vmul.f32 %v4948_v1, %v8042_v60 }
 0x5a2   : > { %3441 = vmatmul.bf16.gmra.mxu0 %v3187_v62  ;;  %v2899_v33 = vadd.f32 %v2728_v32, %v2727_v49  ;;  %v4952_v15 = vpop.eup %4951  ;;  %v2093_v4 = vsub.f32 %v7130_v43, %v1950_v28  ;;  %v2094_v46 = vsub.f32 %v7127_v54, %v1950_v28  ;;  %v7350_v43 = vadd.f32 %v1610_v40, %v5879_v21 }
 0x5a3   : > { %3610 = vmatmul.bf16.gmra.mxu1 %v3188_v19  ;;  %4953 = vpow2.f32 %v2503_v37  ;;  %v7338_v61 = vpack.c.bf16 %v4952_v15, %v4950_v22  ;;  %3821 = vst [vmem:[%s6302_s21 + $0x260] sm:$0xff] %v7330_v30  ;;  %v7368_v28 = vadd.f32 %v1613_v29, %v5879_v21  ;;  %v7379_v29 = vadd.f32 %v1784_v20, %v5882_v23 }
 0x5a4   : > { %2900 = vadd.xlane.f32.xlu0 %v2899_v33  ;;  %4955 = vpow2.f32 %v2505_v52  ;;  %v2174_v56 = vpack.c.bf16 %v2094_v46, %v2093_v4  ;;  %3822 = vst [vmem:[%s6302_s21 + $0x268] sm:$0xff] %v7334_v5  ;;  %v1966_v12 = vmax.f32 %v7350_v43, %v7343_v25  ;;  %v1615_v1 = vpop.f32.mrf.mxu2 }
 0x5a5   : > { %v2729_v58 = vunpack.c.l.bf16 %v7338_v61  ;;  %v2730_v26 = vunpack.c.h.bf16 %v7338_v61 }
 0x5a6   : > { %1964 = vmax.xlane.f32.xlu2 %v1963_v59  ;;  %v2285_v54 = vunpack.c.l.bf16 %v2174_v56  ;;  %v2286_v50 = vunpack.c.h.bf16 %v2174_v56  ;;  %v7363_v59 = vadd.f32 %v1782_v63, %v5882_v23 }
 0x5a7   : > { %v2902_v31 = vadd.f32 %v2730_v26, %v2729_v58 }
 0x5a8   : > { %v2507_v38 = vmul.f32 1.442695, %v2285_v54  ;;  %v2509_v44 = vmul.f32 1.442695, %v2286_v50  ;;  %v1969_v63 = vmax.f32 %v7368_v28, %v7363_v59  ;;  %v1787_v54 = vpop.f32.mrf.mxu3 }
 0x5a9   : > { %v4954_v62 = vpop.eup %4953  ;;  %2903 = vadd.xlane.f32.xlu1 %v2902_v31  ;;  %v1953_v19 = vpop.xlane.xlu0 %1952 }
 0x5aa   : > { %v4956_v3 = vpop.eup %4955  ;;  %4957 = vpow2.f32 %v2507_v38  ;;  %v2095_v40 = vsub.f32 %v7138_v36, %v1953_v19  ;;  %v2096_v7 = vsub.f32 %v7135_v55, %v1953_v19  ;;  %v7384_v38 = vadd.f32 %v1615_v1, %v5879_v21 }
 0x5ab   : > { %4959 = vpow2.f32 %v2509_v44  ;;  %v7360_v33 = vpack.c.bf16 %v4956_v3, %v4954_v62 }
 0x5ac   : > { %1967 = vmax.xlane.f32.xlu0 %v1966_v12  ;;  %v2175_v22 = vpack.c.bf16 %v2096_v7, %v2095_v40  ;;  %v1618_v44 = vpop.f32.mrf.mxu2  ;;  %v1972_v62 = vmax.f32 %v7384_v38, %v7379_v29  ;;  %v7395_v40 = vadd.f32 %v1787_v54, %v5882_v23 }
 0x5ad   : > { %v2731_v37 = vunpack.c.l.bf16 %v7360_v33  ;;  %v7931_v52 = vunpack.c.h.bf16 %v7360_v33 }
 0x5ae   : > { %v2287_v57 = vunpack.c.l.bf16 %v2175_v22  ;;  %v2288_v60 = vunpack.c.h.bf16 %v2175_v22  ;;  %v7400_v22 = vadd.f32 %v1618_v44, %v5879_v21 }
 0x5af   : > { %v2905_v55 = vadd.f32 %v7931_v52, %v2731_v37 }
 0x5b0   : > { %v4958_v36 = vpop.eup %4957  ;;  %v2511_v15 = vmul.f32 1.442695, %v2287_v57  ;;  %v2513_v4 = vmul.f32 1.442695, %v2288_v60  ;;  %v1789_v57 = vpop.f32.mrf.mxu3 }
 0x5b1   : > { %v4960_v46 = vpop.eup %4959  ;;  %2906 = vadd.xlane.f32.xlu1 %v2905_v55 }
 0x5b2   : > { %4961 = vpow2.f32 %v2511_v15  ;;  %v7376_v56 = vpack.c.bf16 %v4960_v46, %v4958_v36  ;;  %v1975_v36 = vmax.f32 %v7400_v22, %v7395_v40  ;;  %v7409_v15 = vadd.f32 %v1789_v57, %v5882_v23 }
 0x5b3   : > { %4963 = vpow2.f32 %v2513_v4 }
 0x5b4   : > { %1970 = vmax.xlane.f32.xlu0 %v1969_v63  ;;  %v7930_v50 = vunpack.c.l.bf16 %v7376_v56  ;;  %v7929_v31 = vunpack.c.h.bf16 %v7376_v56  ;;  %v1620_v55 = vpop.f32.mrf.mxu2 }
 0x5b5   : > { %v7412_v4 = vadd.f32 %v1620_v55, %v5879_v21 }
 0x5b6   : > { %v2908_v12 = vadd.f32 %v7929_v31, %v7930_v50 }
 0x5b7   : > { %v1978_v63 = vmax.f32 %v7412_v4, %v7409_v15 }
 0x5b8   : > { %v4962_v20 = vpop.eup %4961  ;;  %2909 = vadd.xlane.f32.xlu2 %v2908_v12  ;;  %v1792_v46 = vpop.f32.mrf.mxu3 }
 0x5b9   : > { %v4964_v19 = vpop.eup %4963  ;;  %1973 = vmax.xlane.f32.xlu1 %v1972_v62  ;;  %v7417_v44 = vadd.f32 %v1792_v46, %v5882_v23 }
 0x5ba   : > { %v7392_v3 = vpack.c.bf16 %v4964_v19, %v4962_v20 }
 0x5bc   : > { %v7928_v7 = vunpack.c.l.bf16 %v7392_v3  ;;  %v7927_v1 = vunpack.c.h.bf16 %v7392_v3  ;;  %v1623_v54 = vpop.f32.mrf.mxu2 }
 0x5bd   : > { %v7420_v12 = vadd.f32 %v1623_v54, %v5879_v21 }
 0x5be   : > { %v2911_v60 = vadd.f32 %v7927_v1, %v7928_v7 }
 0x5bf   : > { %v1981_v62 = vmax.f32 %v7420_v12, %v7417_v44 }
 0x5c0   : > { %2912 = vadd.xlane.f32.xlu2 %v2911_v60 }
 0x5c1   : > { %1976 = vmax.xlane.f32.xlu1 %v1975_v36 }
 0x5c8   : > { %1979 = vmax.xlane.f32.xlu2 %v1978_v63 }
 0x5d0   : > { %1982 = vmax.xlane.f32.xlu2 %v1981_v62 }
 0x5de   : > { %v3422_v20 = vpop.f32.mrf.mxu0  ;;  %v3591_v19 = vpop.f32.mrf.mxu1 }
 0x5df   : > { %v3592_v57 = vadd.f32 %v3591_v19, %v3422_v20 }
 0x5e1   : > { %3709 = vst [vmem:[%s6586_s27 + $0xe0] sm:$0xff] %v3592_v57 }
 0x5e6   : > { %v3424_v60 = vpop.f32.mrf.mxu0  ;;  %v3593_v55 = vpop.f32.mrf.mxu1 }
 0x5e7   : > { %v3594_v36 = vadd.f32 %v3593_v55, %v3424_v60 }
 0x5e9   : > { %3710 = vst [vmem:[%s6586_s27 + $0xe8] sm:$0xff] %v3594_v36 }
 0x5ef   : > { %v3427_v63 = vpop.f32.mrf.mxu0 }
 0x5f0   : > { %v3596_v46 = vpop.f32.mrf.mxu1 }
 0x5f1   : > { %v3597_v54 = vadd.f32 %v3596_v46, %v3427_v63 }
 0x5f2   : > { %v2886_v1 = vpop.xlane.xlu1 %2885 }
 0x5f3   : > { %4965 = vrcp.f32 %v2886_v1  ;;  %3711 = vst [vmem:[%s6586_s27 + $0xf0] sm:$0xff] %v3597_v54 }
 0x5f7   : > { %v3429_v7 = vpop.f32.mrf.mxu0 }
 0x5f8   : > { %v3598_v62 = vpop.f32.mrf.mxu1 }
 0x5f9   : > { %v4966_v31 = vpop.eup %4965  ;;  %v3599_v52 = vadd.f32 %v3598_v62, %v3429_v7 }
 0x5fa   : > { %v2889_v50 = vpop.xlane.xlu1 %2888  ;;  %v3101_v20 = vmul.f32 %v4966_v31, %v2717_v13  ;;  %v3102_v19 = vmul.f32 %v4966_v31, %v2718_v6 }
 0x5fb   : > { %4967 = vrcp.f32 %v2889_v50  ;;  %3712 = vst [vmem:[%s6586_s27 + $0xf8] sm:$0xff] %v3599_v52 }
 0x5fc   : > { %v3189_v57 = vpack.c.bf16 %v3101_v20, %v7330_v30  ;;  %v3190_v60 = vpack.c.bf16 %v3102_v19, %v7334_v5  ;;  %3823 = vst [vmem:[%s6302_s21 + $0x270] sm:$0xff] %v3101_v20 }
 0x5fd   : > { %3824 = vst [vmem:[%s6302_s21 + $0x278] sm:$0xff] %v3102_v19 }
 0x5fe   : > { %3446 = vmatmul.bf16.gmra.mxu0 %v3189_v57  ;;  %3615 = vmatmul.bf16.gmra.mxu1 %v3190_v60 }
 0x5ff   : > { %v3432_v7 = vpop.f32.mrf.mxu0 }
 0x600   : > { %v3601_v55 = vpop.f32.mrf.mxu1 }
 0x601   : > { %v4968_v1 = vpop.eup %4967  ;;  %v2892_v13 = vpop.xlane.xlu2 %2891  ;;  %v3602_v47 = vadd.f32 %v3601_v55, %v3432_v7 }
 0x602   : > { %v1956_v36 = vpop.xlane.xlu1 %1955  ;;  %4969 = vrcp.f32 %v2892_v13  ;;  %v3103_v6 = vmul.f32 %v4968_v1, %v2719_v17  ;;  %v3104_v30 = vmul.f32 %v4968_v1, %v2720_v27 }
 0x603   : > { %v2097_v5 = vsub.f32 %v7234_v14, %v1956_v36  ;;  %v2098_v52 = vsub.f32 %v7226_v8, %v1956_v36  ;;  %3713 = vst [vmem:[%s6586_s27 + $0x100] sm:$0xff] %v3602_v47 }
 0x604   : > { %3825 = vst [vmem:[%s6302_s21 + $0x280] sm:$0xff] %v3103_v6 }
 0x605   : > { %v2176_v50 = vpack.c.bf16 %v2098_v52, %v2097_v5  ;;  %3826 = vst [vmem:[%s6302_s21 + $0x288] sm:$0xff] %v3104_v30 }
 0x607   : > { %v2289_v31 = vunpack.c.l.bf16 %v2176_v50  ;;  %v2290_v63 = vunpack.c.h.bf16 %v2176_v50  ;;  %v3434_v54 = vpop.f32.mrf.mxu0 }
 0x608   : > { %v4970_v46 = vpop.eup %4969  ;;  %v3603_v17 = vpop.f32.mrf.mxu1 }
 0x609   : > { %v2515_v62 = vmul.f32 1.442695, %v2289_v31  ;;  %v2517_v20 = vmul.f32 1.442695, %v2290_v63  ;;  %v2895_v34 = vpop.xlane.xlu2 %2894  ;;  %v3105_v27 = vmul.f32 %v4970_v46, %v2721_v18  ;;  %v3106_v8 = vmul.f32 %v4970_v46, %v2722_v35 }
 0x60a   : > { %v1959_v14 = vpop.xlane.xlu1 %1958  ;;  %v3604_v19 = vadd.f32 %v3603_v17, %v3434_v54  ;;  %4971 = vrcp.f32 %v2895_v34 }
 0x60b   : > { %4973 = vpow2.f32 %v2515_v62  ;;  %v2099_v57 = vsub.f32 %v7265_v0, %v1959_v14  ;;  %v2100_v60 = vsub.f32 %v7253_v51, %v1959_v14  ;;  %v3191_v7 = vpack.c.bf16 %v3105_v27, %v3103_v6  ;;  %3827 = vst [vmem:[%s6302_s21 + $0x290] sm:$0xff] %v3105_v27 }
 0x60c   : > { %4975 = vpow2.f32 %v2517_v20  ;;  %3714 = vst [vmem:[%s6586_s27 + $0x108] sm:$0xff] %v3604_v19  ;;  %v3192_v1 = vpack.c.bf16 %v3106_v8, %v3104_v30  ;;  %v1794_v20 = vpop.f32.mrf.mxu3 }
 0x60d   : > { %v2177_v55 = vpack.c.bf16 %v2100_v60, %v2099_v57  ;;  %3828 = vst [vmem:[%s6302_s21 + $0x298] sm:$0xff] %v3106_v8 }
 0x60e   : > { %3451 = vmatmul.bf16.gmra.mxu0 %v3191_v7  ;;  %3620 = vmatmul.bf16.gmra.mxu1 %v3192_v1 }
 0x60f   : > { %v2291_v18 = vunpack.c.l.bf16 %v2177_v55  ;;  %v2292_v41 = vunpack.c.h.bf16 %v2177_v55  ;;  %v3437_v13 = vpop.f32.mrf.mxu0  ;;  %v2898_v36 = vpop.xlane.xlu0 %2897 }
 0x610   : > { %v4972_v35 = vpop.eup %4971  ;;  %v3606_v51 = vpop.f32.mrf.mxu1  ;;  %4977 = vrcp.f32 %v2898_v36 }
 0x611   : > { %v4974_v47 = vpop.eup %4973  ;;  %v2519_v0 = vmul.f32 1.442695, %v2291_v18  ;;  %v2521_v5 = vmul.f32 1.442695, %v2292_v41  ;;  %v1962_v6 = vpop.xlane.xlu2 %1961  ;;  %v3107_v30 = vmul.f32 %v4972_v35, %v2723_v9  ;;  %v3607_v50 = vadd.f32 %v3606_v51, %v3437_v13 }
 0x612   : > { %v4976_v52 = vpop.eup %4975  ;;  %v2101_v31 = vsub.f32 %v7292_v24, %v1962_v6  ;;  %v2102_v63 = vsub.f32 %v7284_v42, %v1962_v6  ;;  %v3108_v46 = vmul.f32 %v4972_v35, %v2724_v16  ;;  %v1625_v42 = vpop.f32.mrf.mxu2 }
 0x613   : > { %4979 = vpow2.f32 %v2519_v0  ;;  %v7460_v54 = vpack.c.bf16 %v4976_v52, %v4974_v47  ;;  %3829 = vst [vmem:[%s6302_s21 + $0x2a0] sm:$0xff] %v3107_v30 }
 0x614   : > { %4981 = vpow2.f32 %v2521_v5  ;;  %3715 = vst [vmem:[%s6586_s27 + $0x110] sm:$0xff] %v3607_v50  ;;  %v2178_v62 = vpack.c.bf16 %v2102_v63, %v2101_v31  ;;  %v1797_v6 = vpop.f32.mrf.mxu3 }
 0x615   : > { %v2737_v17 = vunpack.c.l.bf16 %v7460_v54  ;;  %v2738_v9 = vunpack.c.h.bf16 %v7460_v54  ;;  %3830 = vst [vmem:[%s6302_s21 + $0x2a8] sm:$0xff] %v3108_v46 }
 0x616   : > { %v2293_v34 = vunpack.c.l.bf16 %v2178_v62  ;;  %v2294_v24 = vunpack.c.h.bf16 %v2178_v62  ;;  %v4978_v27 = vpop.eup %4977 }
 0x617   : > { %v2914_v39 = vadd.f32 %v2738_v9, %v2737_v17  ;;  %v3439_v14 = vpop.f32.mrf.mxu0  ;;  %v2901_v19 = vpop.xlane.xlu0 %2900  ;;  %v3109_v57 = vmul.f32 %v4978_v27, %v2725_v45  ;;  %v3110_v60 = vmul.f32 %v4978_v27, %v2726_v48 }
 0x618   : > { %v2523_v16 = vmul.f32 1.442695, %v2293_v34  ;;  %v2525_v8 = vmul.f32 1.442695, %v2294_v24  ;;  %v3608_v1 = vpop.f32.mrf.mxu1  ;;  %4983 = vrcp.f32 %v2901_v19 }
 0x619   : > { %v4980_v7 = vpop.eup %4979  ;;  %2915 = vadd.xlane.f32.xlu0 %v2914_v39  ;;  %v1965_v55 = vpop.xlane.xlu2 %1964  ;;  %v3609_v41 = vadd.f32 %v3608_v1, %v3439_v14  ;;  %3831 = vst [vmem:[%s6302_s21 + $0x2b0] sm:$0xff] %v3109_v57  ;;  %v3193_v45 = vpack.c.bf16 %v3109_v57, %v3107_v30  ;;  %v3194_v36 = vpack.c.bf16 %v3110_v60, %v3108_v46 }
 0x61a   : > { %v4982_v18 = vpop.eup %4981  ;;  %4985 = vpow2.f32 %v2523_v16  ;;  %v2103_v35 = vsub.f32 %v7318_v2, %v1965_v55  ;;  %v2104_v13 = vsub.f32 %v7311_v10, %v1965_v55  ;;  %3832 = vst [vmem:[%s6302_s21 + $0x2b8] sm:$0xff] %v3110_v60  ;;  %v7495_v14 = vadd.f32 %v1794_v20, %v5882_v23 }
 0x61b   : > { %4987 = vpow2.f32 %v2525_v8  ;;  %v7479_v11 = vpack.c.bf16 %v4982_v18, %v4980_v7  ;;  %3716 = vst [vmem:[%s6586_s27 + $0x118] sm:$0xff] %v3609_v41  ;;  %v1628_v8 = vpop.f32.mrf.mxu2  ;;  %v7502_v60 = vadd.f32 %v1625_v42, %v5879_v21 }
 0x61c   : > { %v2179_v48 = vpack.c.bf16 %v2104_v13, %v2103_v35  ;;  %v2904_v30 = vpop.xlane.xlu1 %2903 }
 0x61d   : > { %v2739_v47 = vunpack.c.l.bf16 %v7479_v11  ;;  %v2740_v0 = vunpack.c.h.bf16 %v7479_v11  ;;  %4989 = vrcp.f32 %v2904_v30  ;;  %v1984_v7 = vmax.f32 %v7502_v60, %v7495_v14 }
 0x61e   : > { %v2295_v5 = vunpack.c.l.bf16 %v2179_v48  ;;  %v2296_v51 = vunpack.c.h.bf16 %v2179_v48  ;;  %3456 = vmatmul.bf16.gmra.mxu0 %v3193_v45  ;;  %3625 = vmatmul.bf16.gmra.mxu1 %v3194_v36  ;;  %v4984_v2 = vpop.eup %4983  ;;  %v7518_v45 = vadd.f32 %v1797_v6, %v5882_v23 }
 0x61f   : > { %v2917_v10 = vadd.f32 %v2740_v0, %v2739_v47  ;;  %v3442_v63 = vpop.f32.mrf.mxu0  ;;  %v1968_v46 = vpop.xlane.xlu0 %1967  ;;  %v3111_v62 = vmul.f32 %v4984_v2, %v2727_v49  ;;  %v3112_v16 = vmul.f32 %v4984_v2, %v2728_v32 }
 0x620   : > { %v4986_v52 = vpop.eup %4985  ;;  %v2527_v50 = vmul.f32 1.442695, %v2295_v5  ;;  %v2529_v31 = vmul.f32 1.442695, %v2296_v51  ;;  %v3611_v24 = vpop.f32.mrf.mxu1  ;;  %v2105_v27 = vsub.f32 %v7350_v43, %v1968_v46  ;;  %v2106_v39 = vsub.f32 %v7343_v25, %v1968_v46 }
 0x621   : > { %v4988_v34 = vpop.eup %4987  ;;  %2918 = vadd.xlane.f32.xlu0 %v2917_v10  ;;  %v3612_v19 = vadd.f32 %v3611_v24, %v3442_v63  ;;  %3833 = vst [vmem:[%s6302_s21 + $0x2c0] sm:$0xff] %v3111_v62 }
 0x622   : > { %4991 = vpow2.f32 %v2527_v50  ;;  %v7497_v57 = vpack.c.bf16 %v4988_v34, %v4986_v52  ;;  %v2180_v49 = vpack.c.bf16 %v2106_v39, %v2105_v27  ;;  %3834 = vst [vmem:[%s6302_s21 + $0x2c8] sm:$0xff] %v3112_v16  ;;  %v7527_v50 = vadd.f32 %v1628_v8, %v5879_v21 }
 0x623   : > { %4993 = vpow2.f32 %v2529_v31  ;;  %3717 = vst [vmem:[%s6586_s27 + $0x120] sm:$0xff] %v3612_v19  ;;  %v4990_v20 = vpop.eup %4989  ;;  %v1630_v31 = vpop.f32.mrf.mxu2 }
 0x624   : > { %v2741_v25 = vunpack.c.l.bf16 %v7497_v57  ;;  %v2742_v53 = vunpack.c.h.bf16 %v7497_v57  ;;  %v2297_v32 = vunpack.c.l.bf16 %v2180_v49  ;;  %v2298_v43 = vunpack.c.h.bf16 %v2180_v49  ;;  %v2907_v42 = vpop.xlane.xlu1 %2906 }
 0x625   : > { %v3113_v41 = vmul.f32 %v4990_v20, %v2729_v58  ;;  %v3114_v35 = vmul.f32 %v4990_v20, %v2730_v26  ;;  %4995 = vrcp.f32 %v2907_v42  ;;  %v1799_v26 = vpop.f32.mrf.mxu3  ;;  %v1987_v34 = vmax.f32 %v7527_v50, %v7518_v45 }
 0x626   : > { %v2920_v1 = vadd.f32 %v2742_v53, %v2741_v25  ;;  %v2531_v55 = vmul.f32 1.442695, %v2297_v32  ;;  %v2533_v18 = vmul.f32 1.442695, %v2298_v43 }
 0x627   : > { %v3444_v36 = vpop.f32.mrf.mxu0  ;;  %v1971_v48 = vpop.xlane.xlu0 %1970  ;;  %v3195_v61 = vpack.c.bf16 %v3113_v41, %v3111_v62  ;;  %3835 = vst [vmem:[%s6302_s21 + $0x2d0] sm:$0xff] %v3113_v41  ;;  %v3196_v10 = vpack.c.bf16 %v3114_v35, %v3112_v16 }
 0x628   : > { %v4992_v13 = vpop.eup %4991  ;;  %2921 = vadd.xlane.f32.xlu1 %v2920_v1  ;;  %4997 = vpow2.f32 %v2531_v55  ;;  %v3613_v51 = vpop.f32.mrf.mxu1  ;;  %v2107_v2 = vsub.f32 %v7368_v28, %v1971_v48  ;;  %v2108_v58 = vsub.f32 %v7363_v59, %v1971_v48  ;;  %3836 = vst [vmem:[%s6302_s21 + $0x2d8] sm:$0xff] %v3114_v35  ;;  %v7545_v55 = vadd.f32 %v1799_v26, %v5882_v23 }
 0x629   : > { %v4994_v5 = vpop.eup %4993  ;;  %1985 = vmax.xlane.f32.xlu0 %v1984_v7  ;;  %4999 = vpow2.f32 %v2533_v18  ;;  %v3614_v6 = vadd.f32 %v3613_v51, %v3444_v36  ;;  %v8043_v7 = vunpack.c.h.bf16 %v7360_v33 }
 0x62a   : > { %v7524_v30 = vpack.c.bf16 %v4994_v5, %v4992_v13  ;;  %v2181_v52 = vpack.c.bf16 %v2108_v58, %v2107_v2 }
 0x62b   : > { %3718 = vst [vmem:[%s6586_s27 + $0x128] sm:$0xff] %v3614_v6  ;;  %v4996_v62 = vpop.eup %4995  ;;  %v2910_v27 = vpop.xlane.xlu2 %2909  ;;  %v8045_v6 = vunpack.c.h.bf16 %v7376_v56 }
 0x62c   : > { %v2743_v63 = vunpack.c.l.bf16 %v7524_v30  ;;  %v2744_v28 = vunpack.c.h.bf16 %v7524_v30  ;;  %v2299_v59 = vunpack.c.l.bf16 %v2181_v52  ;;  %v2300_v46 = vunpack.c.h.bf16 %v2181_v52  ;;  %v1974_v19 = vpop.xlane.xlu1 %1973  ;;  %v1633_v5 = vpop.f32.mrf.mxu2 }
 0x62d   : > { %5001 = vrcp.f32 %v2910_v27  ;;  %v3115_v49 = vmul.f32 %v4996_v62, %v2731_v37  ;;  %v2109_v43 = vsub.f32 %v7384_v38, %v1974_v19  ;;  %v2110_v20 = vsub.f32 %v7379_v29, %v1974_v19  ;;  %v1802_v33 = vpop.f32.mrf.mxu3 }
 0x62e   : > { %3461 = vmatmul.bf16.gmra.mxu0 %v3195_v61  ;;  %3630 = vmatmul.bf16.gmra.mxu1 %v3196_v10  ;;  %v2923_v24 = vadd.f32 %v2744_v28, %v2743_v63  ;;  %v4998_v39 = vpop.eup %4997  ;;  %v2535_v16 = vmul.f32 1.442695, %v2299_v59  ;;  %v2537_v8 = vmul.f32 1.442695, %v2300_v46  ;;  %v3116_v1 = vmul.f32 %v4996_v62, %v8043_v7 }
 0x62f   : > { %v5000_v32 = vpop.eup %4999  ;;  %3837 = vst [vmem:[%s6302_s21 + $0x2e0] sm:$0xff] %v3115_v49  ;;  %v2182_v42 = vpack.c.bf16 %v2110_v20, %v2109_v43  ;;  %v7552_v37 = vadd.f32 %v1630_v31, %v5879_v21  ;;  %v8044_v61 = vunpack.c.l.bf16 %v7376_v56 }
 0x630   : > { %2924 = vadd.xlane.f32.xlu1 %v2923_v24  ;;  %5003 = vpow2.f32 %v2535_v16  ;;  %v7547_v18 = vpack.c.bf16 %v5000_v32, %v4998_v39  ;;  %3838 = vst [vmem:[%s6302_s21 + $0x2e8] sm:$0xff] %v3116_v1  ;;  %v7576_v16 = vadd.f32 %v1633_v5, %v5879_v21 }
 0x631   : > { %1988 = vmax.xlane.f32.xlu0 %v1987_v34  ;;  %5005 = vpow2.f32 %v2537_v8  ;;  %v2301_v41 = vunpack.c.l.bf16 %v2182_v42  ;;  %v2302_v35 = vunpack.c.h.bf16 %v2182_v42  ;;  %v1990_v36 = vmax.f32 %v7552_v37, %v7545_v55 }
 0x632   : > { %v2745_v38 = vunpack.c.l.bf16 %v7547_v18  ;;  %v2746_v29 = vunpack.c.h.bf16 %v7547_v18  ;;  %v7570_v34 = vadd.f32 %v1802_v33, %v5882_v23 }
 0x633   : > { %v5002_v13 = vpop.eup %5001  ;;  %v2539_v51 = vmul.f32 1.442695, %v2301_v41  ;;  %v2541_v2 = vmul.f32 1.442695, %v2302_v35  ;;  %v2913_v58 = vpop.xlane.xlu2 %2912  ;;  %v8046_v41 = vunpack.c.l.bf16 %v7392_v3 }
 0x634   : > { %v2926_v48 = vadd.f32 %v2746_v29, %v2745_v38  ;;  %v3117_v26 = vmul.f32 %v5002_v13, %v8044_v61  ;;  %v3118_v10 = vmul.f32 %v5002_v13, %v8045_v6  ;;  %v1977_v31 = vpop.xlane.xlu1 %1976  ;;  %5007 = vrcp.f32 %v2913_v58 }
 0x635   : > { %5009 = vpow2.f32 %v2539_v51  ;;  %v2111_v46 = vsub.f32 %v7400_v22, %v1977_v31  ;;  %v2112_v62 = vsub.f32 %v7395_v40, %v1977_v31  ;;  %v1993_v43 = vmax.f32 %v7576_v16, %v7570_v34  ;;  %v1804_v7 = vpop.f32.mrf.mxu3 }
 0x636   : > { %v5004_v52 = vpop.eup %5003  ;;  %2927 = vadd.xlane.f32.xlu2 %v2926_v48  ;;  %3839 = vst [vmem:[%s6302_s21 + $0x2f0] sm:$0xff] %v3117_v26  ;;  %5011 = vpow2.f32 %v2541_v2  ;;  %v3197_v27 = vpack.c.bf16 %v3117_v26, %v3115_v49  ;;  %v3198_v39 = vpack.c.bf16 %v3118_v10, %v3116_v1  ;;  %v8047_v13 = vunpack.c.h.bf16 %v7392_v3  ;;  %v1635_v2 = vpop.f32.mrf.mxu2 }
 0x637   : > { %v5006_v59 = vpop.eup %5005  ;;  %3840 = vst [vmem:[%s6302_s21 + $0x2f8] sm:$0xff] %v3118_v10  ;;  %v2183_v56 = vpack.c.bf16 %v2112_v62, %v2111_v46  ;;  %v7601_v61 = vadd.f32 %v1804_v7, %v5882_v23 }
 0x638   : > { %1991 = vmax.xlane.f32.xlu1 %v1990_v36  ;;  %v7573_v24 = vpack.c.bf16 %v5006_v59, %v5004_v52 }
 0x639   : > { %v2303_v19 = vunpack.c.l.bf16 %v2183_v56  ;;  %v2304_v40 = vunpack.c.h.bf16 %v2183_v56 }
 0x63a   : > { %v2747_v8 = vunpack.c.l.bf16 %v7573_v24  ;;  %v2748_v22 = vunpack.c.h.bf16 %v7573_v24  ;;  %v5008_v32 = vpop.eup %5007 }
 0x63b   : > { %v5010_v49 = vpop.eup %5009  ;;  %v2543_v1 = vmul.f32 1.442695, %v2303_v19  ;;  %v2545_v42 = vmul.f32 1.442695, %v2304_v40  ;;  %v1980_v33 = vpop.xlane.xlu2 %1979  ;;  %v7588_v35 = vmul.f32 %v5008_v32, %v8046_v41  ;;  %v7592_v36 = vmul.f32 %v5008_v32, %v8047_v13 }
 0x63c   : > { %v2929_v20 = vadd.f32 %v2748_v22, %v2747_v8  ;;  %v5012_v48 = vpop.eup %5011  ;;  %v2113_v5 = vsub.f32 %v7412_v4, %v1980_v33  ;;  %v2114_v51 = vsub.f32 %v7409_v15, %v1980_v33  ;;  %v7608_v15 = vadd.f32 %v1635_v2, %v5879_v21 }
 0x63d   : > { %5013 = vpow2.f32 %v2543_v1  ;;  %v7596_v58 = vpack.c.bf16 %v5012_v48, %v5010_v49  ;;  %3841 = vst [vmem:[%s6302_s21 + $0x300] sm:$0xff] %v7588_v35 }
 0x63e   : > { %3466 = vmatmul.bf16.gmra.mxu0 %v3197_v27  ;;  %3635 = vmatmul.bf16.gmra.mxu1 %v3198_v39  ;;  %5015 = vpow2.f32 %v2545_v42  ;;  %v2184_v3 = vpack.c.bf16 %v2114_v51, %v2113_v5  ;;  %3842 = vst [vmem:[%s6302_s21 + $0x308] sm:$0xff] %v7592_v36  ;;  %v1996_v59 = vmax.f32 %v7608_v15, %v7601_v61 }
 0x63f   : > { %2930 = vadd.xlane.f32.xlu2 %v2929_v20  ;;  %v2749_v26 = vunpack.c.l.bf16 %v7596_v58  ;;  %v2750_v4 = vunpack.c.h.bf16 %v7596_v58 }
 0x640   : > { %1994 = vmax.xlane.f32.xlu1 %v1993_v43  ;;  %v2305_v6 = vunpack.c.l.bf16 %v2184_v3  ;;  %v2306_v10 = vunpack.c.h.bf16 %v2184_v3 }
 0x641   : > { %v2932_v52 = vadd.f32 %v2750_v4, %v2749_v26 }
 0x642   : > { %v2547_v23 = vmul.f32 1.442695, %v2305_v6  ;;  %v2549_v31 = vmul.f32 1.442695, %v2306_v10 }
 0x643   : > { %v5014_v46 = vpop.eup %5013  ;;  %2933 = vadd.xlane.f32.xlu0 %v2932_v52  ;;  %v1983_v62 = vpop.xlane.xlu2 %1982 }
 0x644   : > { %v5016_v56 = vpop.eup %5015  ;;  %5017 = vpow2.f32 %v2547_v23  ;;  %v2115_v21 = vsub.f32 %v7420_v12, %v1983_v62  ;;  %v2116_v27 = vsub.f32 %v7417_v44, %v1983_v62 }
 0x645   : > { %5019 = vpow2.f32 %v2549_v31  ;;  %v7618_v39 = vpack.c.bf16 %v5016_v56, %v5014_v46 }
 0x646   : > { %v2185_v19 = vpack.c.bf16 %v2116_v27, %v2115_v21 }
 0x647   : > { %1997 = vmax.xlane.f32.xlu2 %v1996_v59  ;;  %v2751_v40 = vunpack.c.l.bf16 %v7618_v39  ;;  %v2752_v32 = vunpack.c.h.bf16 %v7618_v39 }
 0x648   : > { %v2307_v43 = vunpack.c.l.bf16 %v2185_v19  ;;  %v2308_v20 = vunpack.c.h.bf16 %v2185_v19 }
 0x649   : > { %v2935_v49 = vadd.f32 %v2752_v32, %v2751_v40 }
 0x64a   : > { %v5018_v7 = vpop.eup %5017  ;;  %v2551_v1 = vmul.f32 1.442695, %v2307_v43  ;;  %v2553_v12 = vmul.f32 1.442695, %v2308_v20 }
 0x64b   : > { %v5020_v42 = vpop.eup %5019  ;;  %2936 = vadd.xlane.f32.xlu0 %v2935_v49 }
 0x64c   : > { %5021 = vpow2.f32 %v2551_v1  ;;  %v7626_v44 = vpack.c.bf16 %v5020_v42, %v5018_v7 }
 0x64d   : > { %5023 = vpow2.f32 %v2553_v12 }
 0x64e   : > { %v2753_v33 = vunpack.c.l.bf16 %v7626_v44  ;;  %v2754_v41 = vunpack.c.h.bf16 %v7626_v44 }
 0x650   : > { %v2938_v13 = vadd.f32 %v2754_v41, %v2753_v33 }
 0x652   : > { %v5022_v48 = vpop.eup %5021  ;;  %2939 = vadd.xlane.f32.xlu1 %v2938_v13 }
 0x653   : > { %v5024_v5 = vpop.eup %5023 }
 0x654   : > { %v7634_v51 = vpack.c.bf16 %v5024_v5, %v5022_v48 }
 0x656   : > { %v2755_v2 = vunpack.c.l.bf16 %v7634_v51  ;;  %v2756_v3 = vunpack.c.h.bf16 %v7634_v51 }
 0x658   : > { %v2941_v6 = vadd.f32 %v2756_v3, %v2755_v2 }
 0x65a   : > { %2942 = vadd.xlane.f32.xlu2 %v2941_v6 }
 0x67b   : > { %v3447_v10 = vpop.f32.mrf.mxu0  ;;  %v3616_v52 = vpop.f32.mrf.mxu1 }
 0x67c   : > { %v3617_v23 = vadd.f32 %v3616_v52, %v3447_v10 }
 0x67e   : > { %3719 = vst [vmem:[%s6586_s27 + $0x130] sm:$0xff] %v3617_v23 }
 0x683   : > { %v3449_v31 = vpop.f32.mrf.mxu0  ;;  %v3618_v59 = vpop.f32.mrf.mxu1 }
 0x684   : > { %v3619_v46 = vadd.f32 %v3618_v59, %v3449_v31 }
 0x686   : > { %3720 = vst [vmem:[%s6586_s27 + $0x138] sm:$0xff] %v3619_v46 }
 0x68b   : > { %v3452_v62 = vpop.f32.mrf.mxu0  ;;  %v3621_v56 = vpop.f32.mrf.mxu1 }
 0x68c   : > { %v3622_v21 = vadd.f32 %v3621_v56, %v3452_v62  ;;  %v2916_v27 = vpop.xlane.xlu0 %2915 }
 0x68d   : > { %5025 = vrcp.f32 %v2916_v27 }
 0x68e   : > { %3721 = vst [vmem:[%s6586_s27 + $0x140] sm:$0xff] %v3622_v21 }
 0x693   : > { %v5026_v19 = vpop.eup %5025  ;;  %v3454_v43 = vpop.f32.mrf.mxu0 }
 0x694   : > { %v3623_v20 = vpop.f32.mrf.mxu1  ;;  %v2919_v7 = vpop.xlane.xlu0 %2918  ;;  %v3121_v1 = vmul.f32 %v5026_v19, %v2737_v17  ;;  %v3122_v12 = vmul.f32 %v5026_v19, %v2738_v9 }
 0x695   : > { %v3624_v49 = vadd.f32 %v3623_v20, %v3454_v43  ;;  %5027 = vrcp.f32 %v2919_v7 }
 0x696   : > { %v3199_v42 = vpack.c.bf16 %v3121_v1, %v7588_v35  ;;  %v3200_v13 = vpack.c.bf16 %v3122_v12, %v7592_v36  ;;  %3843 = vst [vmem:[%s6302_s21 + $0x310] sm:$0xff] %v3121_v1 }
 0x697   : > { %3722 = vst [vmem:[%s6586_s27 + $0x148] sm:$0xff] %v3624_v49 }
 0x698   : > { %3471 = vmatmul.bf16.gmra.mxu0 %v3199_v42  ;;  %3640 = vmatmul.bf16.gmra.mxu1 %v3200_v13  ;;  %3844 = vst [vmem:[%s6302_s21 + $0x318] sm:$0xff] %v3122_v12 }
 0x69b   : > { %v5028_v48 = vpop.eup %5027  ;;  %v2922_v5 = vpop.xlane.xlu1 %2921 }
 0x69c   : > { %v3457_v6 = vpop.f32.mrf.mxu0  ;;  %5029 = vrcp.f32 %v2922_v5  ;;  %v3626_v17 = vpop.f32.mrf.mxu1  ;;  %v3123_v9 = vmul.f32 %v5028_v48, %v2739_v47  ;;  %v3124_v35 = vmul.f32 %v5028_v48, %v2740_v0 }
 0x69d   : > { %v1986_v54 = vpop.xlane.xlu0 %1985  ;;  %v3627_v36 = vadd.f32 %v3626_v17, %v3457_v6 }
 0x69e   : > { %v2117_v10 = vsub.f32 %v7502_v60, %v1986_v54  ;;  %v2118_v52 = vsub.f32 %v7495_v14, %v1986_v54  ;;  %3845 = vst [vmem:[%s6302_s21 + $0x320] sm:$0xff] %v3123_v9 }
 0x69f   : > { %3723 = vst [vmem:[%s6586_s27 + $0x150] sm:$0xff] %v3627_v36 }
 0x6a0   : > { %v2186_v23 = vpack.c.bf16 %v2118_v52, %v2117_v10  ;;  %3846 = vst [vmem:[%s6302_s21 + $0x328] sm:$0xff] %v3124_v35 }
 0x6a2   : > { %v2309_v31 = vunpack.c.l.bf16 %v2186_v23  ;;  %v2310_v59 = vunpack.c.h.bf16 %v2186_v23  ;;  %v5030_v46 = vpop.eup %5029 }
 0x6a3   : > { %v2925_v47 = vpop.xlane.xlu1 %2924  ;;  %v3125_v0 = vmul.f32 %v5030_v46, %v2741_v25  ;;  %v3126_v14 = vmul.f32 %v5030_v46, %v2742_v53 }
 0x6a4   : > { %v2555_v62 = vmul.f32 1.442695, %v2309_v31  ;;  %v2557_v56 = vmul.f32 1.442695, %v2310_v59  ;;  %v3459_v11 = vpop.f32.mrf.mxu0  ;;  %5031 = vrcp.f32 %v2925_v47  ;;  %v3628_v60 = vpop.f32.mrf.mxu1 }
 0x6a5   : > { %v1989_v21 = vpop.xlane.xlu0 %1988  ;;  %v3629_v27 = vadd.f32 %v3628_v60, %v3459_v11  ;;  %3847 = vst [vmem:[%s6302_s21 + $0x330] sm:$0xff] %v3125_v0  ;;  %v3201_v20 = vpack.c.bf16 %v3125_v0, %v3123_v9  ;;  %v3202_v49 = vpack.c.bf16 %v3126_v14, %v3124_v35 }
 0x6a6   : > { %5033 = vpow2.f32 %v2555_v62  ;;  %v2119_v19 = vsub.f32 %v7527_v50, %v1989_v21  ;;  %v2120_v43 = vsub.f32 %v7518_v45, %v1989_v21  ;;  %3848 = vst [vmem:[%s6302_s21 + $0x338] sm:$0xff] %v3126_v14 }
 0x6a7   : > { %5035 = vpow2.f32 %v2557_v56  ;;  %3724 = vst [vmem:[%s6586_s27 + $0x158] sm:$0xff] %v3629_v27 }
 0x6a8   : > { %v2187_v7 = vpack.c.bf16 %v2120_v43, %v2119_v19  ;;  %3476 = vmatmul.bf16.gmra.mxu0 %v3201_v20  ;;  %3645 = vmatmul.bf16.gmra.mxu1 %v3202_v49 }
 0x6a9   : > { %v2928_v1 = vpop.xlane.xlu2 %2927 }
 0x6aa   : > { %v2311_v57 = vunpack.c.l.bf16 %v2187_v7  ;;  %v2312_v25 = vunpack.c.h.bf16 %v2187_v7  ;;  %v5032_v53 = vpop.eup %5031  ;;  %5037 = vrcp.f32 %v2928_v1 }
 0x6ab   : > { %v1992_v50 = vpop.xlane.xlu1 %1991  ;;  %v3127_v48 = vmul.f32 %v5032_v53, %v2743_v63  ;;  %v3128_v9 = vmul.f32 %v5032_v53, %v2744_v28 }
 0x6ac   : > { %v5034_v12 = vpop.eup %5033  ;;  %v2559_v42 = vmul.f32 1.442695, %v2311_v57  ;;  %v2561_v13 = vmul.f32 1.442695, %v2312_v25  ;;  %v3462_v45 = vpop.f32.mrf.mxu0  ;;  %v2121_v6 = vsub.f32 %v7552_v37, %v1992_v50  ;;  %v2122_v17 = vsub.f32 %v7545_v55, %v1992_v50 }
 0x6ad   : > { %v5036_v5 = vpop.eup %5035  ;;  %v3631_v54 = vpop.f32.mrf.mxu1  ;;  %3849 = vst [vmem:[%s6302_s21 + $0x340] sm:$0xff] %v3127_v48 }
 0x6ae   : > { %5039 = vpow2.f32 %v2559_v42  ;;  %v3632_v35 = vadd.f32 %v3631_v54, %v3462_v45  ;;  %v7678_v36 = vpack.c.bf16 %v5036_v5, %v5034_v12  ;;  %v2188_v10 = vpack.c.bf16 %v2122_v17, %v2121_v6  ;;  %3850 = vst [vmem:[%s6302_s21 + $0x348] sm:$0xff] %v3128_v9 }
 0x6af   : > { %5041 = vpow2.f32 %v2561_v13 }
 0x6b0   : > { %3725 = vst [vmem:[%s6586_s27 + $0x160] sm:$0xff] %v3632_v35  ;;  %v2757_v63 = vunpack.c.l.bf16 %v7678_v36  ;;  %v2758_v52 = vunpack.c.h.bf16 %v7678_v36  ;;  %v2313_v37 = vunpack.c.l.bf16 %v2188_v10  ;;  %v2314_v23 = vunpack.c.h.bf16 %v2188_v10  ;;  %v5038_v55 = vpop.eup %5037 }
 0x6b1   : > { %v3129_v46 = vmul.f32 %v5038_v55, %v2745_v38  ;;  %v3130_v62 = vmul.f32 %v5038_v55, %v2746_v29 }
 0x6b2   : > { %v2944_v30 = vadd.f32 %v2758_v52, %v2757_v63  ;;  %v2563_v28 = vmul.f32 1.442695, %v2313_v37  ;;  %v2565_v31 = vmul.f32 1.442695, %v2314_v23  ;;  %v2931_v59 = vpop.xlane.xlu2 %2930 }
 0x6b3   : > { %v1995_v47 = vpop.xlane.xlu1 %1994  ;;  %5043 = vrcp.f32 %v2931_v59  ;;  %v3203_v27 = vpack.c.bf16 %v3129_v46, %v3127_v48  ;;  %3851 = vst [vmem:[%s6302_s21 + $0x350] sm:$0xff] %v3129_v46  ;;  %v3204_v18 = vpack.c.bf16 %v3130_v62, %v3128_v9 }
 0x6b4   : > { %v5040_v56 = vpop.eup %5039  ;;  %2945 = vadd.xlane.f32.xlu0 %v2944_v30  ;;  %v3464_v11 = vpop.f32.mrf.mxu0  ;;  %5045 = vpow2.f32 %v2563_v28  ;;  %v2123_v14 = vsub.f32 %v7576_v16, %v1995_v47  ;;  %v2124_v60 = vsub.f32 %v7570_v34, %v1995_v47  ;;  %3852 = vst [vmem:[%s6302_s21 + $0x358] sm:$0xff] %v3130_v62 }
 0x6b5   : > { %v5042_v0 = vpop.eup %5041  ;;  %v3633_v21 = vpop.f32.mrf.mxu1  ;;  %5047 = vpow2.f32 %v2565_v31 }
 0x6b6   : > { %v3634_v38 = vadd.f32 %v3633_v21, %v3464_v11  ;;  %v7697_v29 = vpack.c.bf16 %v5042_v0, %v5040_v56  ;;  %v2189_v19 = vpack.c.bf16 %v2124_v60, %v2123_v14  ;;  %v2934_v57 = vpop.xlane.xlu0 %2933 }
 0x6b7   : > { %5049 = vrcp.f32 %v2934_v57 }
 0x6b8   : > { %3726 = vst [vmem:[%s6586_s27 + $0x168] sm:$0xff] %v3634_v38  ;;  %v2759_v43 = vunpack.c.l.bf16 %v7697_v29  ;;  %v2760_v20 = vunpack.c.h.bf16 %v7697_v29  ;;  %v2315_v49 = vunpack.c.l.bf16 %v2189_v19  ;;  %v2316_v7 = vunpack.c.h.bf16 %v2189_v19  ;;  %3481 = vmatmul.bf16.gmra.mxu0 %v3203_v27  ;;  %3650 = vmatmul.bf16.gmra.mxu1 %v3204_v18 }
 0x6b9   : > { %v5044_v34 = vpop.eup %5043 }
 0x6ba   : > { %v2947_v16 = vadd.f32 %v2760_v20, %v2759_v43  ;;  %v5046_v25 = vpop.eup %5045  ;;  %v2567_v53 = vmul.f32 1.442695, %v2315_v49  ;;  %v2569_v1 = vmul.f32 1.442695, %v2316_v7  ;;  %v1998_v12 = vpop.xlane.xlu2 %1997  ;;  %v3131_v42 = vmul.f32 %v5044_v34, %v2747_v8 }
 0x6bb   : > { %v5048_v13 = vpop.eup %5047  ;;  %v2125_v45 = vsub.f32 %v7608_v15, %v1998_v12  ;;  %v2126_v48 = vsub.f32 %v7601_v61, %v1998_v12  ;;  %v3132_v5 = vmul.f32 %v5044_v34, %v2748_v22 }
 0x6bc   : > { %2948 = vadd.xlane.f32.xlu1 %v2947_v16  ;;  %v3467_v50 = vpop.f32.mrf.mxu0  ;;  %5051 = vpow2.f32 %v2567_v53  ;;  %v7712_v17 = vpack.c.bf16 %v5048_v13, %v5046_v25  ;;  %3853 = vst [vmem:[%s6302_s21 + $0x360] sm:$0xff] %v3131_v42 }
 0x6bd   : > { %v3636_v6 = vpop.f32.mrf.mxu1  ;;  %5053 = vpow2.f32 %v2569_v1  ;;  %v2190_v9 = vpack.c.bf16 %v2126_v48, %v2125_v45  ;;  %3854 = vst [vmem:[%s6302_s21 + $0x368] sm:$0xff] %v3132_v5  ;;  %v5050_v10 = vpop.eup %5049 }
 0x6be   : > { %v3637_v54 = vadd.f32 %v3636_v6, %v3467_v50  ;;  %v2761_v8 = vunpack.c.l.bf16 %v7712_v17  ;;  %v2762_v35 = vunpack.c.h.bf16 %v7712_v17  ;;  %v2937_v23 = vpop.xlane.xlu0 %2936  ;;  %v3133_v55 = vmul.f32 %v5050_v10, %v2749_v26 }
 0x6bf   : > { %v2317_v15 = vunpack.c.l.bf16 %v2190_v9  ;;  %v2318_v61 = vunpack.c.h.bf16 %v2190_v9  ;;  %v3134_v30 = vmul.f32 %v5050_v10, %v2750_v4  ;;  %5055 = vrcp.f32 %v2937_v23 }
 0x6c0   : > { %3727 = vst [vmem:[%s6586_s27 + $0x170] sm:$0xff] %v3637_v54  ;;  %v2950_v24 = vadd.f32 %v2762_v35, %v2761_v8  ;;  %v3205_v62 = vpack.c.bf16 %v3133_v55, %v3131_v42 }
 0x6c1   : > { %v2571_v22 = vmul.f32 1.442695, %v2317_v15  ;;  %v2573_v37 = vmul.f32 1.442695, %v2318_v61  ;;  %3855 = vst [vmem:[%s6302_s21 + $0x370] sm:$0xff] %v3133_v55  ;;  %v3206_v56 = vpack.c.bf16 %v3134_v30, %v3132_v5 }
 0x6c2   : > { %v5052_v28 = vpop.eup %5051  ;;  %2951 = vadd.xlane.f32.xlu2 %v2950_v24  ;;  %3856 = vst [vmem:[%s6302_s21 + $0x378] sm:$0xff] %v3134_v30 }
 0x6c3   : > { %v5054_v31 = vpop.eup %5053  ;;  %5057 = vpow2.f32 %v2571_v22 }
 0x6c4   : > { %v3469_v59 = vpop.f32.mrf.mxu0  ;;  %5059 = vpow2.f32 %v2573_v37  ;;  %v7729_v47 = vpack.c.bf16 %v5054_v31, %v5052_v28 }
 0x6c5   : > { %v3638_v46 = vpop.f32.mrf.mxu1  ;;  %v5056_v4 = vpop.eup %5055 }
 0x6c6   : > { %v3639_v11 = vadd.f32 %v3638_v46, %v3469_v59  ;;  %v2763_v58 = vunpack.c.l.bf16 %v7729_v47  ;;  %v2764_v26 = vunpack.c.h.bf16 %v7729_v47  ;;  %v2940_v14 = vpop.xlane.xlu1 %2939  ;;  %v3135_v21 = vmul.f32 %v5056_v4, %v2751_v40 }
 0x6c7   : > { %5061 = vrcp.f32 %v2940_v14  ;;  %v3136_v27 = vmul.f32 %v5056_v4, %v2752_v32 }
 0x6c8   : > { %3728 = vst [vmem:[%s6586_s27 + $0x178] sm:$0xff] %v3639_v11  ;;  %3486 = vmatmul.bf16.gmra.mxu0 %v3205_v62  ;;  %3655 = vmatmul.bf16.gmra.mxu1 %v3206_v56  ;;  %v2953_v0 = vadd.f32 %v2764_v26, %v2763_v58 }
 0x6c9   : > { %v5058_v60 = vpop.eup %5057  ;;  %3857 = vst [vmem:[%s6302_s21 + $0x380] sm:$0xff] %v3135_v21 }
 0x6ca   : > { %v5060_v38 = vpop.eup %5059  ;;  %2954 = vadd.xlane.f32.xlu0 %v2953_v0  ;;  %3858 = vst [vmem:[%s6302_s21 + $0x388] sm:$0xff] %v3136_v27 }
 0x6cb   : > { %v7742_v18 = vpack.c.bf16 %v5060_v38, %v5058_v60 }
 0x6cd   : > { %v2765_v19 = vunpack.c.l.bf16 %v7742_v18  ;;  %v2766_v49 = vunpack.c.h.bf16 %v7742_v18  ;;  %v5062_v7 = vpop.eup %5061  ;;  %v2943_v40 = vpop.xlane.xlu2 %2942 }
 0x6ce   : > { %v3137_v32 = vmul.f32 %v5062_v7, %v2753_v33  ;;  %v3138_v34 = vmul.f32 %v5062_v7, %v2754_v41  ;;  %5063 = vrcp.f32 %v2943_v40 }
 0x6cf   : > { %v2956_v39 = vadd.f32 %v2766_v49, %v2765_v19 }
 0x6d0   : > { %3859 = vst [vmem:[%s6302_s21 + $0x390] sm:$0xff] %v3137_v32  ;;  %v3207_v16 = vpack.c.bf16 %v3137_v32, %v3135_v21  ;;  %v3208_v57 = vpack.c.bf16 %v3138_v34, %v3136_v27 }
 0x6d1   : > { %2957 = vadd.xlane.f32.xlu1 %v2956_v39  ;;  %3860 = vst [vmem:[%s6302_s21 + $0x398] sm:$0xff] %v3138_v34 }
 0x6d4   : > { %v5064_v25 = vpop.eup %5063 }
 0x6d5   : > { %v3139_v53 = vmul.f32 %v5064_v25, %v2755_v2  ;;  %v3140_v33 = vmul.f32 %v5064_v25, %v2756_v3 }
 0x6d7   : > { %3861 = vst [vmem:[%s6302_s21 + $0x3a0] sm:$0xff] %v3139_v53 }
 0x6d8   : > { %3491 = vmatmul.bf16.gmra.mxu0 %v3207_v16  ;;  %3660 = vmatmul.bf16.gmra.mxu1 %v3208_v57  ;;  %3862 = vst [vmem:[%s6302_s21 + $0x3a8] sm:$0xff] %v3140_v33 }
 0x715   : > { %v3472_v44 = vpop.f32.mrf.mxu0  ;;  %v3641_v41 = vpop.f32.mrf.mxu1 }
 0x716   : > { %v3642_v1 = vadd.f32 %v3641_v41, %v3472_v44 }
 0x718   : > { %3729 = vst [vmem:[%s6586_s27 + $0x180] sm:$0xff] %v3642_v1 }
 0x71d   : > { %v3474_v12 = vpop.f32.mrf.mxu0  ;;  %v3643_v42 = vpop.f32.mrf.mxu1 }
 0x71e   : > { %v3644_v13 = vadd.f32 %v3643_v42, %v3474_v12 }
 0x720   : > { %3730 = vst [vmem:[%s6586_s27 + $0x188] sm:$0xff] %v3644_v13 }
 0x725   : > { %v3477_v50 = vpop.f32.mrf.mxu0  ;;  %v3646_v45 = vpop.f32.mrf.mxu1 }
 0x726   : > { %v3647_v48 = vadd.f32 %v3646_v45, %v3477_v50 }
 0x727   : > { %v2946_v2 = vpop.xlane.xlu0 %2945 }
 0x728   : > { %5065 = vrcp.f32 %v2946_v2  ;;  %3731 = vst [vmem:[%s6586_s27 + $0x190] sm:$0xff] %v3647_v48 }
 0x72d   : > { %v3479_v3 = vpop.f32.mrf.mxu0  ;;  %v3648_v5 = vpop.f32.mrf.mxu1 }
 0x72e   : > { %v5066_v51 = vpop.eup %5065  ;;  %v3649_v6 = vadd.f32 %v3648_v5, %v3479_v3 }
 0x72f   : > { %v2949_v54 = vpop.xlane.xlu1 %2948  ;;  %v3141_v9 = vmul.f32 %v5066_v51, %v2757_v63  ;;  %v3142_v15 = vmul.f32 %v5066_v51, %v2758_v52 }
 0x730   : > { %5067 = vrcp.f32 %v2949_v54  ;;  %3732 = vst [vmem:[%s6586_s27 + $0x198] sm:$0xff] %v3649_v6 }
 0x731   : > { %v3209_v61 = vpack.c.bf16 %v3141_v9, %v3139_v53  ;;  %v3210_v10 = vpack.c.bf16 %v3142_v15, %v3140_v33  ;;  %3863 = vst [vmem:[%s6302_s21 + $0x3b0] sm:$0xff] %v3141_v9 }
 0x732   : > { %3864 = vst [vmem:[%s6302_s21 + $0x3b8] sm:$0xff] %v3142_v15 }
 0x733   : > { %3496 = vmatmul.bf16.gmra.mxu0 %v3209_v61  ;;  %3665 = vmatmul.bf16.gmra.mxu1 %v3210_v10 }
 0x735   : > { %v2952_v22 = vpop.xlane.xlu2 %2951  ;;  %v3482_v37 = vpop.f32.mrf.mxu0 }
 0x736   : > { %v5068_v24 = vpop.eup %5067  ;;  %5069 = vrcp.f32 %v2952_v22  ;;  %v3651_v23 = vpop.f32.mrf.mxu1 }
 0x737   : > { %v3143_v36 = vmul.f32 %v5068_v24, %v2759_v43  ;;  %v3144_v63 = vmul.f32 %v5068_v24, %v2760_v20  ;;  %v3652_v52 = vadd.f32 %v3651_v23, %v3482_v37 }
 0x739   : > { %3865 = vst [vmem:[%s6302_s21 + $0x3c0] sm:$0xff] %v3143_v36 }
 0x73a   : > { %3733 = vst [vmem:[%s6586_s27 + $0x1a0] sm:$0xff] %v3652_v52 }
 0x73b   : > { %3866 = vst [vmem:[%s6302_s21 + $0x3c8] sm:$0xff] %v3144_v63 }
 0x73c   : > { %v5070_v55 = vpop.eup %5069 }
 0x73d   : > { %v3484_v30 = vpop.f32.mrf.mxu0  ;;  %v2955_v28 = vpop.xlane.xlu0 %2954  ;;  %v3145_v31 = vmul.f32 %v5070_v55, %v2761_v8  ;;  %v3146_v59 = vmul.f32 %v5070_v55, %v2762_v35 }
 0x73e   : > { %v3653_v46 = vpop.f32.mrf.mxu1  ;;  %5071 = vrcp.f32 %v2955_v28 }
 0x73f   : > { %v3654_v43 = vadd.f32 %v3653_v46, %v3484_v30  ;;  %v3211_v29 = vpack.c.bf16 %v3145_v31, %v3143_v36  ;;  %3867 = vst [vmem:[%s6302_s21 + $0x3d0] sm:$0xff] %v3145_v31  ;;  %v3212_v20 = vpack.c.bf16 %v3146_v59, %v3144_v63 }
 0x740   : > { %3868 = vst [vmem:[%s6302_s21 + $0x3d8] sm:$0xff] %v3146_v59 }
 0x741   : > { %3734 = vst [vmem:[%s6586_s27 + $0x1a8] sm:$0xff] %v3654_v43 }
 0x743   : > { %3501 = vmatmul.bf16.gmra.mxu0 %v3211_v29  ;;  %3670 = vmatmul.bf16.gmra.mxu1 %v3212_v20 }
 0x744   : > { %v5072_v62 = vpop.eup %5071  ;;  %v2958_v56 = vpop.xlane.xlu1 %2957 }
 0x745   : > { %5073 = vrcp.f32 %v2958_v56  ;;  %v3487_v8 = vpop.f32.mrf.mxu0  ;;  %v3147_v17 = vmul.f32 %v5072_v62, %v2763_v58  ;;  %v3148_v35 = vmul.f32 %v5072_v62, %v2764_v26 }
 0x746   : > { %v3656_v11 = vpop.f32.mrf.mxu1 }
 0x747   : > { %v3657_v4 = vadd.f32 %v3656_v11, %v3487_v8  ;;  %3869 = vst [vmem:[%s6302_s21 + $0x3e0] sm:$0xff] %v3147_v17 }
 0x748   : > { %3870 = vst [vmem:[%s6302_s21 + $0x3e8] sm:$0xff] %v3148_v35 }
 0x749   : > { %3735 = vst [vmem:[%s6586_s27 + $0x1b0] sm:$0xff] %v3657_v4 }
 0x74b   : > { %v5074_v0 = vpop.eup %5073 }
 0x74c   : > { %v3149_v14 = vmul.f32 %v5074_v0, %v2765_v19  ;;  %v3150_v60 = vmul.f32 %v5074_v0, %v2766_v49 }
 0x74d   : > { %v3489_v58 = vpop.f32.mrf.mxu0 }
 0x74e   : > { %v3658_v21 = vpop.f32.mrf.mxu1  ;;  %v3213_v47 = vpack.c.bf16 %v3149_v14, %v3147_v17  ;;  %3871 = vst [vmem:[%s6302_s21 + $0x3f0] sm:$0xff] %v3149_v14  ;;  %v3214_v26 = vpack.c.bf16 %v3150_v60, %v3148_v35 }
 0x74f   : > { %v3659_v27 = vadd.f32 %v3658_v21, %v3489_v58  ;;  %3872 = vst [vmem:[%s6302_s21 + $0x3f8] sm:$0xff] %v3150_v60 }
 0x751   : > { %3736 = vst [vmem:[%s6586_s27 + $0x1b8] sm:$0xff] %v3659_v27 }
 0x753   : > { %3506 = vmatmul.bf16.gmra.mxu0 %v3213_v47  ;;  %3675 = vmatmul.bf16.gmra.mxu1 %v3214_v26 }
 0x755   : > { %v3492_v38 = vpop.f32.mrf.mxu0 }
 0x756   : > { %v3661_v7 = vpop.f32.mrf.mxu1 }
 0x757   : > { %v3662_v19 = vadd.f32 %v3661_v7, %v3492_v38 }
 0x759   : > { %3737 = vst [vmem:[%s6586_s27 + $0x1c0] sm:$0xff] %v3662_v19 }
 0x75d   : > { %v3494_v18 = vpop.f32.mrf.mxu0 }
 0x75e   : > { %v3663_v49 = vpop.f32.mrf.mxu1 }
 0x75f   : > { %v3664_v39 = vadd.f32 %v3663_v49, %v3494_v18 }
 0x761   : > { %3738 = vst [vmem:[%s6586_s27 + $0x1c8] sm:$0xff] %v3664_v39 }
 0x762   : > { %5282 = shalt.err (!%p5279_p12)
}
 0x763   : > { %s5393_s14 = smov 256   ;;  %s5394_s11 = smov 16  }
 0x764   : > { %4596 = dma.vmem_to_hbm [thread:$0]  (%p5522_p5), %s3914_s7, 16384, %s3916_s15, %s3879_s19, %s5393_s14, %s5393_s14, %s5394_s11  }
 0x765   : > { %s4561_s13 = sshll.u32 %s8048_s24, 9  ;;  %s8051_s17 = sld [smem:[#allocation56_spill]] }
 0x766   : > { %s3893_s29 = sshll.u32 %s6586_s27, 4  ;;  %s3874_s4 = scalar_lea.sflag [#allocation4], %s5592_s1  ;;  %s3894_s29 = int_to_ptr.vmem [resolvable:$true] %s3893_s29 }
 0x76b   : > { %s3892_s20 = scalar_lea.hbm %s8051_s17, %s4561_s13  ;;  %s5303_s0 = scalar_lea.hbm %s8051_s17, 1024 }
 0x76c   : > { %s3895_s12 = sshll.u32 %s3892_s20, 4  ;;  %s3896_s12 = int_to_ptr.hbm [resolvable:$true] %s3895_s12 }
 0x76d   : > { %s5297_s7 = sshra.s32 %s3896_s12, 4  ;;  %s5298_s7 = int_to_ptr.hbm [resolvable:$true] %s5297_s7 }
 0x76e   : > { %s5299_s24 = scalar_lea.hbm %s5298_s7, 512  ;;  %p5304_p7 = scmp.lt.s32.totalorder %s5298_s7, %s8051_s17 }
 0x76f   : > { %p5300_p13 = scmp.ne.s32.totalorder %s5298_s7, %s5299_s24  ;;  %p5305_p9 = scmp.lt.s32.totalorder %s5303_s0, %s5299_s24 }
 0x771   : > { %p5301_p0 = pnand %p5300_p13, %p5522_p5  ;;  %p5306_p1 = por %p5305_p9, %p5304_p7 }
 0x773   : > { %p5302_p3 = pneg %p5301_p0 }
 0x775   : > { %p5307_p2 = pnand %p5306_p1, %p5302_p3 }
 0x7b0   : > { %v3497_v40 = vpop.f32.mrf.mxu0  ;;  %v3666_v32 = vpop.f32.mrf.mxu1 }
 0x7b1   : > { %v3667_v34 = vadd.f32 %v3666_v32, %v3497_v40 }
 0x7b3   : > { %3739 = vst [vmem:[%s6586_s27 + $0x1d0] sm:$0xff] %v3667_v34 }
 0x7b8   : > { %v3499_v16 = vpop.f32.mrf.mxu0  ;;  %v3668_v57 = vpop.f32.mrf.mxu1 }
 0x7b9   : > { %v3669_v25 = vadd.f32 %v3668_v57, %v3499_v16 }
 0x7bb   : > { %3740 = vst [vmem:[%s6586_s27 + $0x1d8] sm:$0xff] %v3669_v25 }
 0x7c0   : > { %v3502_v53 = vpop.f32.mrf.mxu0  ;;  %v3671_v33 = vpop.f32.mrf.mxu1 }
 0x7c1   : > { %v3672_v44 = vadd.f32 %v3671_v33, %v3502_v53 }
 0x7c3   : > { %3741 = vst [vmem:[%s6586_s27 + $0x1e0] sm:$0xff] %v3672_v44 }
 0x7c8   : > { %v3504_v41 = vpop.f32.mrf.mxu0  ;;  %v3673_v1 = vpop.f32.mrf.mxu1 }
 0x7c9   : > { %v3674_v12 = vadd.f32 %v3673_v1, %v3504_v41 }
 0x7cb   : > { %3742 = vst [vmem:[%s6586_s27 + $0x1e8] sm:$0xff] %v3674_v12 }
 0x7d0   : > { %v3507_v42 = vpop.f32.mrf.mxu0  ;;  %v3676_v13 = vpop.f32.mrf.mxu1 }
 0x7d1   : > { %v3677_v50 = vadd.f32 %v3676_v13, %v3507_v42 }
 0x7d3   : > { %3743 = vst [vmem:[%s6586_s27 + $0x1f0] sm:$0xff] %v3677_v50 }
 0x7d8   : > { %v3509_v45 = vpop.f32.mrf.mxu0  ;;  %v3678_v48 = vpop.f32.mrf.mxu1 }
 0x7d9   : > { %v3679_v2 = vadd.f32 %v3678_v48, %v3509_v45 }
 0x7db   : > { %3744 = vst [vmem:[%s6586_s27 + $0x1f8] sm:$0xff] %v3679_v2 }
 0x7dc   : > { %5310 = shalt.err (!%p5307_p2)
}
 0x7dd   : > { %s5395_s1 = smov 128   ;;  %s5396_s27 = smov 8  }
 0x7de   : > { %4595 = dma.vmem_to_hbm [thread:$0]  (%p5522_p5), %s3894_s29, 8192, %s3896_s12, %s3874_s4, %s5395_s1, %s5395_s1, %s5396_s27  }
 0x7df PF: > { %s8052_s16 = sld [smem:[#allocation23_spill]]  ;;  %p8054_p4 = scmp.ge.s32.totalorder %s5385_s10, 2 }
 0x7e1   : > { %p4620_p8 = pnand %p8054_p4, %p5487_p6 }
 0x7e3   : > { %p4621_p10 = pneg %p4620_p8 }
 0x7e5   : > { %s3930_s23 = sand.u32 1, %s8052_s16  }
 0x7e6   : > { %s3931_s26 = scalar_lea.sflag [#allocation4], %s3930_s23 }
 0x7e7   : > { %5356 = dma.done.wait (%p4621_p10), %s3931_s26, 8192  }
 0x7e8   : > { %5358 = vsyncadd (%p4621_p10), %s3931_s26, 4294959104  ;;  %s3941_s14 = scalar_lea.sflag [#allocation15], %s3930_s23 }
 0x7e9   : > { %5360 = dma.done.wait (%p4621_p10), %s3941_s14, 16384  }
 0x7ea   : > { %5362 = vsyncadd (%p4621_p10), %s3941_s14, 4294950912  ;;  %s35_s10 = sadd.s32 1, %s5385_s10   ;;  %s8055_s22 = sld [smem:[#allocation24_spill]] }
 0x7eb   : > { %p32_p11 = scmp.ge.s32.totalorder %s35_s10, 4   ;;  %s8056_s29 = sld [smem:[#allocation29_spill]] }
 0x7ec   : > { %s8057_s11 = sld [smem:[#allocation27_spill]]  ;;  %s8058_s27 = smov %s5369_s28 }
 0x7ed   : > { %s8060_s30 = smov %s5381_s9 }
 0x7ee   :  { %34 = sbr.rel (!%p32_p11) target bundleno = 20 (0x14), region = 155 }
 0x7f0   : > { %s8059_s28 = smov %s8055_s22 }
 0x7f2   : > { %s8061_s9 = smov %s8057_s11 }
 0x7f3   :  { %3947 = vsyncpa [#allocation3], 1 }
 0x7f4   :  { %3949 = vsyncpa [#allocation3 + $0x1], 1 }
 0x7f5   :  { %3950 = vsyncpa [#allocation6], 1 }
 0x7f6   :  { %3952 = vsyncpa [#allocation6 + $0x1], 1 }
 0x7f7   :  { %3953 = vsyncpa [#allocation9], 1 }
 0x7f8   :  { %3955 = vsyncpa [#allocation9 + $0x1], 1 }
 0x7f9   :  { %3956 = vsyncpa [#allocation12], 1 }
 0x7fa   :  { %3957 = vsyncpa [#allocation4], 1 }
 0x7fb   :  { %3959 = vsyncpa [#allocation4 + $0x1], 1 }
 0x7fc   :  { %3960 = vsyncpa [#allocation15], 1 }
 0x7fd   :  { %3962 = vsyncpa [#allocation15 + $0x1], 1 }

</bundles_post_ra>
